<compile_context>
chip_gen: v6e
topology: v6e:2x2x1
jax: 0.10.0
libtpu: 0.0.40
codegen_flags: <defaults>
</compile_context>

<pallas_src>
import functools

import jax
import jax.numpy as jnp
import numpy as np
from jax import lax
from jax.experimental import pallas as pl
from jax.experimental.pallas import tpu as pltpu

EPS = 1e-5            # nn.BatchNorm2d default eps
NEG_SLOPE = 0.01      # nn.LeakyReLU default negative_slope
LANE = 128            # TPU lane width; channels are padded to a multiple of this
_VMEM_LIMIT = 32 * 1024 * 1024


def _round_up(x, m):
    return ((x + m - 1) // m) * m


# ---------------------------------------------------------------------------
# Pass 1: 3x3 conv (9 shifted bf16 matmuls, f32 accumulate) + BN partial stats
# ---------------------------------------------------------------------------
def _conv_stats_kernel(x0_ref, x1_ref, x2_ref, w_ref, b_ref,
                       y_ref, sum_ref, sq_ref, *, n_valid_pix):
    i = pl.program_id(0)

    @pl.when(i == 0)
    def _init():
        sum_ref[...] = jnp.zeros_like(sum_ref)
        sq_ref[...] = jnp.zeros_like(sq_ref)

    TR, Wp2, Cp = x0_ref.shape          # (rows-per-tile, W+2, padded channels)
    W = Wp2 - 2
    TM = TR * W                         # output pixels per tile

    # 3x3 conv as 9 accumulated MXU matmuls over shifted input views.
    y_ref[...] = jnp.zeros_like(y_ref)
    x_refs = (x0_ref, x1_ref, x2_ref)   # already H-shifted by ky-1 on the host
    for ky in range(3):
        for kx in range(3):
            a = x_refs[ky][:, kx:kx + W, :].reshape(TM, Cp)     # bf16
            y_ref[...] += jnp.dot(a, w_ref[3 * ky + kx],
                                  preferred_element_type=jnp.float32)

    y = y_ref[...] + b_ref[...]         # conv bias (f32)
    y_ref[...] = y

    # Per-channel sum / sum-of-squares partials for the batch statistics.
    # Mask only matters for the zero-padded tail rows of the last tile.
    pix = i * TM + lax.broadcasted_iota(jnp.int32, (TM, 1), 0)
    ym = jnp.where(pix < n_valid_pix, y, 0.0)
    sum_ref[...] += jnp.sum(ym, axis=0, keepdims=True)
    sq_ref[...] += jnp.sum(ym * ym, axis=0, keepdims=True)


def _conv_with_stats(x_sh, w, b, TR, n_valid_pix):
    M_rows_pad, Wp2, Cp = x_sh[0].shape
    W = Wp2 - 2
    TM = TR * W
    n_tiles = M_rows_pad // TR
    M_pix_pad = M_rows_pad * W

    kernel = functools.partial(_conv_stats_kernel, n_valid_pix=n_valid_pix)
    flops = 2 * M_pix_pad * 9 * Cp * Cp
    bytes_accessed = (3 * M_rows_pad * Wp2 * Cp * 2      # bf16 shifted inputs
                      + 9 * Cp * Cp * 2 + Cp * 4         # weights + bias
                      + M_pix_pad * Cp * 4 + 2 * Cp * 4)  # conv out + stats

    y, ssum, ssq = pl.pallas_call(
        kernel,
        grid=(n_tiles,),
        in_specs=[
            pl.BlockSpec((TR, Wp2, Cp), lambda i: (i, 0, 0)),
            pl.BlockSpec((TR, Wp2, Cp), lambda i: (i, 0, 0)),
            pl.BlockSpec((TR, Wp2, Cp), lambda i: (i, 0, 0)),
            pl.BlockSpec((9, Cp, Cp), lambda i: (0, 0, 0)),   # resident weights
            pl.BlockSpec((1, Cp), lambda i: (0, 0)),          # resident bias
        ],
        out_specs=[
            pl.BlockSpec((TM, Cp), lambda i: (i, 0)),         # conv output tile
            pl.BlockSpec((1, Cp), lambda i: (0, 0)),          # sum accumulator
            pl.BlockSpec((1, Cp), lambda i: (0, 0)),          # sumsq accumulator
        ],
        out_shape=[
            jax.ShapeDtypeStruct((M_pix_pad, Cp), jnp.float32),
            jax.ShapeDtypeStruct((1, Cp), jnp.float32),
            jax.ShapeDtypeStruct((1, Cp), jnp.float32),
        ],
        compiler_params=pltpu.CompilerParams(
            dimension_semantics=("arbitrary",),   # cross-tile stats reduction
            vmem_limit_bytes=_VMEM_LIMIT),
        cost_estimate=pl.CostEstimate(flops=flops, transcendentals=0,
                                      bytes_accessed=bytes_accessed),
    )(x_sh[0], x_sh[1], x_sh[2], w, b)
    return y, ssum, ssq


# ---------------------------------------------------------------------------
# Pass 2: y * scale + shift  ->  LeakyReLU  (-> + residual)
# ---------------------------------------------------------------------------
def _bn_act_kernel(y_ref, scale_ref, shift_ref, o_ref):
    z = y_ref[...] * scale_ref[...] + shift_ref[...]
    z = jnp.where(z > 0, z, NEG_SLOPE * z)
    o_ref[...] = z.astype(o_ref.dtype)


def _bn_act_res_kernel(y_ref, scale_ref, shift_ref, res_ref, o_ref):
    z = y_ref[...] * scale_ref[...] + shift_ref[...]
    z = jnp.where(z > 0, z, NEG_SLOPE * z)
    o_ref[...] = (z + res_ref[...]).astype(o_ref.dtype)


def _bn_act(y, scale, shift, TM, residual=None, out_dtype=jnp.float32):
    M_pix_pad, Cp = y.shape
    n_tiles = M_pix_pad // TM
    tile_spec = pl.BlockSpec((TM, Cp), lambda i: (i, 0))
    vec_spec = pl.BlockSpec((1, Cp), lambda i: (0, 0))
    if residual is None:
        kernel = _bn_act_kernel
        in_specs = [tile_spec, vec_spec, vec_spec]
        args = (y, scale, shift)
        nbytes = 2 * M_pix_pad * Cp * 4
    else:
        kernel = _bn_act_res_kernel
        in_specs = [tile_spec, vec_spec, vec_spec, tile_spec]
        args = (y, scale, shift, residual)
        nbytes = 3 * M_pix_pad * Cp * 4
    return pl.pallas_call(
        kernel,
        grid=(n_tiles,),
        in_specs=in_specs,
        out_specs=pl.BlockSpec((TM, Cp), lambda i: (i, 0)),
        out_shape=jax.ShapeDtypeStruct((M_pix_pad, Cp), out_dtype),
        compiler_params=pltpu.CompilerParams(
            dimension_semantics=("parallel",),    # megacore-shardable on v7x
            vmem_limit_bytes=_VMEM_LIMIT),
        cost_estimate=pl.CostEstimate(flops=4 * M_pix_pad * Cp, transcendentals=0,
                                      bytes_accessed=nbytes),
    )(*args)


# ---------------------------------------------------------------------------
# Host-side glue (cheap data movement + tiny per-channel finalize math)
# ---------------------------------------------------------------------------
def _shifted_rows(x_cp, TR):
    """Three H-shifted, W-padded, row-tiled bf16 copies of an NHWC tensor."""
    N, H, W, Cp = x_cp.shape
    xp = jnp.pad(x_cp, ((0, 0), (1, 1), (1, 1), (0, 0)))        # (N, H+2, W+2, Cp)
    M_rows = N * H
    M_rows_pad = _round_up(M_rows, TR)
    out = []
    for ky in range(3):
        s = xp[:, ky:ky + H, :, :].reshape(M_rows, W + 2, Cp)
        s = jnp.pad(s, ((0, M_rows_pad - M_rows), (0, 0), (0, 0)))
        out.append(s.astype(jnp.bfloat16))
    return out, M_rows_pad


def _bn_scale_shift(ssum, ssq, gamma, beta, count):
    mean = ssum / count
    var = jnp.maximum(ssq / count - mean * mean, 0.0)     # E[y^2] - E[y]^2
    inv = lax.rsqrt(var + EPS)
    scale = gamma * inv
    shift = beta - mean * scale
    return scale, shift


def res_block_forward(x_nchw, params):
    x = jnp.transpose(x_nchw, (0, 2, 3, 1)).astype(jnp.float32)   # NCHW -> NHWC
    N, H, W, C = x.shape
    Cp = _round_up(max(C, LANE), LANE)                            # lane-dense channels

    # Rows per tile: ~1024 output pixels per tile, but at least 2 tiles when
    # the input has enough rows (exercises the cross-tile BN reduction).
    target_rows = max(1024 // W, 1)
    half_rows = max((N * H + 1) // 2, 1)
    TR = _round_up(min(target_rows, half_rows), 8)
    TM = TR * W
    M_pix = N * H * W

    x_cp = jnp.pad(x, ((0, 0), (0, 0), (0, 0), (0, Cp - C)))

    # ---- block 1: conv1 -> bn1 -> leaky (no residual, no zeros round trip) --
    s1, M_rows_pad = _shifted_rows(x_cp, TR)
    y1_raw, sum1, sq1 = _conv_with_stats(s1, params["w1"], params["b1"], TR, M_pix)
    sc1, sh1 = _bn_scale_shift(sum1, sq1, params["g1"], params["bt1"], float(M_pix))
    y1 = _bn_act(y1_raw, sc1, sh1, TM, residual=None, out_dtype=jnp.bfloat16)

    # ---- block 2: conv2 -> bn2 -> leaky -> + x -----------------------------
    # TODO(synk): keep y1 tiles resident in VMEM across both conv stages
    # (needs in-kernel halo DMA); one HBM round trip remains because BN needs
    # the global batch statistics before normalization.
    y1_img = y1[:M_pix].reshape(N, H, W, Cp)
    s2, _ = _shifted_rows(y1_img, TR)
    y2_raw, sum2, sq2 = _conv_with_stats(s2, params["w2"], params["b2"], TR, M_pix)
    sc2, sh2 = _bn_scale_shift(sum2, sq2, params["g2"], params["bt2"], float(M_pix))

    x_res = jnp.pad(x_cp.reshape(M_pix, Cp),
                    ((0, M_rows_pad * W - M_pix), (0, 0)))
    out = _bn_act(y2_raw, sc2, sh2, TM, residual=x_res, out_dtype=jnp.float32)

    out = out[:M_pix].reshape(N, H, W, Cp)[..., :C]
    return jnp.transpose(out, (0, 3, 1, 2))                       # back to NCHW


# ---------------------------------------------------------------------------
# Pure-JAX f32 reference (mirrors the PyTorch module, training-mode BN)
# ---------------------------------------------------------------------------
def ref_forward(x, raw):
    def conv(x, w_oihw, b):
        y = lax.conv_general_dilated(
            x, w_oihw, (1, 1), ((1, 1), (1, 1)),
            dimension_numbers=("NCHW", "OIHW", "NCHW"),
            precision=lax.Precision.HIGHEST)
        return y + b[None, :, None, None]

    def bn(x, g, b):
        mean = jnp.mean(x, axis=(0, 2, 3), keepdims=True)
        var = jnp.mean((x - mean) ** 2, axis=(0, 2, 3), keepdims=True)
        return (x - mean) * lax.rsqrt(var + EPS) * g[None, :, None, None] \
               + b[None, :, None, None]

    act = lambda t: jnp.where(t > 0, t, NEG_SLOPE * t)
    y = act(bn(conv(x, raw["w1"], raw["b1"]), raw["g1"], raw["bt1"]))
    y = act(bn(conv(y, raw["w2"], raw["b2"]), raw["g2"], raw["bt2"]))
    return y + x


# ---------------------------------------------------------------------------
def init_params(key, channels, Cp):
    C = channels
    ks = jax.random.split(key, 8)
    raw = {
        "w1": 0.1 * jax.random.normal(ks[0], (C, C, 3, 3), jnp.float32),  # OIHW
        "b1": 0.1 * jax.random.normal(ks[1], (C,), jnp.float32),
        "g1": 1.0 + 0.1 * jax.random.normal(ks[2], (C,), jnp.float32),
        "bt1": 0.1 * jax.random.normal(ks[3], (C,), jnp.float32),
        "w2": 0.1 * jax.random.normal(ks[4], (C, C, 3, 3), jnp.float32),
        "b2": 0.1 * jax.random.normal(ks[5], (C,), jnp.float32),
        "g2": 1.0 + 0.1 * jax.random.normal(ks[6], (C,), jnp.float32),
        "bt2": 0.1 * jax.random.normal(ks[7], (C,), jnp.float32),
    }

    def pack_w(w_oihw):                     # OIHW -> (ky,kx,Ci,Co) -> (9,Cp,Cp) bf16
        w = jnp.transpose(w_oihw, (2, 3, 1, 0))
        w = jnp.pad(w, ((0, 0), (0, 0), (0, Cp - C), (0, Cp - C)))
        return w.reshape(9, Cp, Cp).astype(jnp.bfloat16)

    def pack_v(v):
        return jnp.pad(v, (0, Cp - C))[None, :].astype(jnp.float32)

    packed = {
        "w1": pack_w(raw["w1"]), "b1": pack_v(raw["b1"]),
        "g1": pack_v(raw["g1"]), "bt1": pack_v(raw["bt1"]),
        "w2": pack_w(raw["w2"]), "b2": pack_v(raw["b2"]),
        "g2": pack_v(raw["g2"]), "bt2": pack_v(raw["bt2"]),
    }
    return raw, packed


if __name__ == "__main__":
    key = jax.random.PRNGKey(0)
    k_x, k_p = jax.random.split(key)

    N, C, H, W = 2, 4, 16, 16                      # NCHW, like the PyTorch module
    x = jax.random.normal(k_x, (N, C, H, W), jnp.float32)

    Cp = _round_up(max(C, LANE), LANE)
    raw_params, packed_params = init_params(k_p, C, Cp)

    fwd = jax.jit(res_block_forward)
    out = jax.block_until_ready(fwd(x, packed_params))

    ref = jax.block_until_ready(ref_forward(x, raw_params))
    # Tolerance reflects the intentional bf16 MXU inputs (f32 accumulation).
    np.testing.assert_allclose(np.asarray(out), np.asarray(ref),
                               rtol=2e-2, atol=3e-2)

    print("KERNEL_OK")
</pallas_src>

<mosaic_0001>
module attributes {stable_mosaic.version = 11 : i64} {
  func.func @_conv_stats_kernel(%arg0: i32, %arg1: memref<16x18x128xbf16, #tpu.memory_space<vmem>>, %arg2: memref<16x18x128xbf16, #tpu.memory_space<vmem>>, %arg3: memref<16x18x128xbf16, #tpu.memory_space<vmem>>, %arg4: memref<9x128x128xbf16, #tpu.memory_space<vmem>>, %arg5: memref<1x128xf32, #tpu.memory_space<vmem>>, %arg6: memref<256x128xf32, #tpu.memory_space<vmem>>, %arg7: memref<1x128xf32, #tpu.memory_space<vmem>>, %arg8: memref<1x128xf32, #tpu.memory_space<vmem>>) attributes {dimension_semantics = [#tpu.dimension_semantics<arbitrary>], iteration_bounds = array<i64: 2>, scalar_prefetch = 0 : i64, scratch_operands = 0 : i64, tpu.core_type = #tpu.core_type<tc>, window_params = [{transform_indices = @transform_0, window_bounds = array<i64: 16, 18, 128>}, {transform_indices = @transform_1, window_bounds = array<i64: 16, 18, 128>}, {transform_indices = @transform_2, window_bounds = array<i64: 16, 18, 128>}, {pipeline_mode = #tpu.pipeline_mode<synchronous>, transform_indices = @transform_3, window_bounds = array<i64: 9, 128, 128>}, {pipeline_mode = #tpu.pipeline_mode<synchronous>, transform_indices = @transform_4, window_bounds = array<i64: 1, 128>}, {transform_indices = @transform_5, window_bounds = array<i64: 256, 128>}, {pipeline_mode = #tpu.pipeline_mode<synchronous>, transform_indices = @transform_6, window_bounds = array<i64: 1, 128>}, {pipeline_mode = #tpu.pipeline_mode<synchronous>, transform_indices = @transform_7, window_bounds = array<i64: 1, 128>}]} {
    %c0_i32 = arith.constant 0 : i32
    %0 = arith.cmpi eq, %arg0, %c0_i32 : i32
    %1 = arith.extui %0 : i1 to i32
    %c0_i32_0 = arith.constant 0 : i32
    %2 = arith.cmpi ne, %1, %c0_i32_0 : i32
    scf.if %2 {
      %cst_110 = arith.constant 0.000000e+00 : f32
      %103 = vector.broadcast %cst_110 : f32 to vector<1x128xf32>
      %c0_111 = arith.constant 0 : index
      %c0_112 = arith.constant 0 : index
      %104 = vector.load %arg7[%c0_111, %c0_112] : memref<1x128xf32, #tpu.memory_space<vmem>>, vector<1x128xf32>
      tpu.vector_store %arg7[%c0_111, %c0_112], %103 {strides = array<i32>} : memref<1x128xf32, #tpu.memory_space<vmem>>, vector<1x128xf32>,
      %cst_113 = arith.constant 0.000000e+00 : f32
      %105 = vector.broadcast %cst_113 : f32 to vector<1x128xf32>
      %c0_114 = arith.constant 0 : index
      %c0_115 = arith.constant 0 : index
      %106 = vector.load %arg8[%c0_114, %c0_115] : memref<1x128xf32, #tpu.memory_space<vmem>>, vector<1x128xf32>
      tpu.vector_store %arg8[%c0_114, %c0_115], %105 {strides = array<i32>} : memref<1x128xf32, #tpu.memory_space<vmem>>, vector<1x128xf32>,
    } else {
    }
    %cst = arith.constant 0.000000e+00 : f32
    %3 = vector.broadcast %cst : f32 to vector<256x128xf32>
    %c0 = arith.constant 0 : index
    %c0_1 = arith.constant 0 : index
    %4 = vector.load %arg6[%c0, %c0_1] : memref<256x128xf32, #tpu.memory_space<vmem>>, vector<256x128xf32>
    tpu.vector_store %arg6[%c0, %c0_1], %3 {strides = array<i32>} : memref<256x128xf32, #tpu.memory_space<vmem>>, vector<256x128xf32>,
    %c0_2 = arith.constant 0 : index
    %c0_3 = arith.constant 0 : index
    %c0_4 = arith.constant 0 : index
    %5 = vector.load %arg1[%c0_2, %c0_3, %c0_4] : memref<16x18x128xbf16, #tpu.memory_space<vmem>>, vector<16x16x128xbf16>
    %6 = vector.shape_cast %5 : vector<16x16x128xbf16> to vector<256x128xbf16>
    %c0_5 = arith.constant 0 : index
    %c0_6 = arith.constant 0 : index
    %7 = vector.load %arg6[%c0_5, %c0_6] : memref<256x128xf32, #tpu.memory_space<vmem>>, vector<256x128xf32>
    %c0_7 = arith.constant 0 : index
    %c0_8 = arith.constant 0 : index
    %c0_9 = arith.constant 0 : index
    %8 = vector.load %arg4[%c0_7, %c0_8, %c0_9] : memref<9x128x128xbf16, #tpu.memory_space<vmem>>, vector<1x128x128xbf16>
    %9 = vector.shape_cast %8 : vector<1x128x128xbf16> to vector<128x128xbf16>
    %cst_10 = arith.constant dense<0.000000e+00> : vector<256x128xf32>
    %10 = tpu.matmul %6, %9, %cst_10 {dimension_numbers = #tpu.dot_dimension_numbers<[1], [0], [0], [1], [0, 0, 1, 1], [], []>} : vector<256x128xbf16>, vector<128x128xbf16>, vector<256x128xf32> -> vector<256x128xf32>
    %11 = arith.addf %7, %10 : vector<256x128xf32>
    %c0_11 = arith.constant 0 : index
    %c0_12 = arith.constant 0 : index
    %12 = vector.load %arg6[%c0_11, %c0_12] : memref<256x128xf32, #tpu.memory_space<vmem>>, vector<256x128xf32>
    tpu.vector_store %arg6[%c0_11, %c0_12], %11 {strides = array<i32>} : memref<256x128xf32, #tpu.memory_space<vmem>>, vector<256x128xf32>,
    %c0_13 = arith.constant 0 : index
    %c1 = arith.constant 1 : index
    %c0_14 = arith.constant 0 : index
    %13 = vector.load %arg1[%c0_13, %c1, %c0_14] : memref<16x18x128xbf16, #tpu.memory_space<vmem>>, vector<16x16x128xbf16>
    %14 = vector.shape_cast %13 : vector<16x16x128xbf16> to vector<256x128xbf16>
    %c0_15 = arith.constant 0 : index
    %c0_16 = arith.constant 0 : index
    %15 = vector.load %arg6[%c0_15, %c0_16] : memref<256x128xf32, #tpu.memory_space<vmem>>, vector<256x128xf32>
    %c1_17 = arith.constant 1 : index
    %c0_18 = arith.constant 0 : index
    %c0_19 = arith.constant 0 : index
    %16 = vector.load %arg4[%c1_17, %c0_18, %c0_19] : memref<9x128x128xbf16, #tpu.memory_space<vmem>>, vector<1x128x128xbf16>
    %17 = vector.shape_cast %16 : vector<1x128x128xbf16> to vector<128x128xbf16>
    %cst_20 = arith.constant dense<0.000000e+00> : vector<256x128xf32>
    %18 = tpu.matmul %14, %17, %cst_20 {dimension_numbers = #tpu.dot_dimension_numbers<[1], [0], [0], [1], [0, 0, 1, 1], [], []>} : vector<256x128xbf16>, vector<128x128xbf16>, vector<256x128xf32> -> vector<256x128xf32>
    %19 = arith.addf %15, %18 : vector<256x128xf32>
    %c0_21 = arith.constant 0 : index
    %c0_22 = arith.constant 0 : index
    %20 = vector.load %arg6[%c0_21, %c0_22] : memref<256x128xf32, #tpu.memory_space<vmem>>, vector<256x128xf32>
    tpu.vector_store %arg6[%c0_21, %c0_22], %19 {strides = array<i32>} : memref<256x128xf32, #tpu.memory_space<vmem>>, vector<256x128xf32>,
    %c0_23 = arith.constant 0 : index
    %c2 = arith.constant 2 : index
    %c0_24 = arith.constant 0 : index
    %21 = vector.load %arg1[%c0_23, %c2, %c0_24] : memref<16x18x128xbf16, #tpu.memory_space<vmem>>, vector<16x16x128xbf16>
    %22 = vector.shape_cast %21 : vector<16x16x128xbf16> to vector<256x128xbf16>
    %c0_25 = arith.constant 0 : index
    %c0_26 = arith.constant 0 : index
    %23 = vector.load %arg6[%c0_25, %c0_26] : memref<256x128xf32, #tpu.memory_space<vmem>>, vector<256x128xf32>
    %c2_27 = arith.constant 2 : index
    %c0_28 = arith.constant 0 : index
    %c0_29 = arith.constant 0 : index
    %24 = vector.load %arg4[%c2_27, %c0_28, %c0_29] : memref<9x128x128xbf16, #tpu.memory_space<vmem>>, vector<1x128x128xbf16>
    %25 = vector.shape_cast %24 : vector<1x128x128xbf16> to vector<128x128xbf16>
    %cst_30 = arith.constant dense<0.000000e+00> : vector<256x128xf32>
    %26 = tpu.matmul %22, %25, %cst_30 {dimension_numbers = #tpu.dot_dimension_numbers<[1], [0], [0], [1], [0, 0, 1, 1], [], []>} : vector<256x128xbf16>, vector<128x128xbf16>, vector<256x128xf32> -> vector<256x128xf32>
    %27 = arith.addf %23, %26 : vector<256x128xf32>
    %c0_31 = arith.constant 0 : index
    %c0_32 = arith.constant 0 : index
    %28 = vector.load %arg6[%c0_31, %c0_32] : memref<256x128xf32, #tpu.memory_space<vmem>>, vector<256x128xf32>
    tpu.vector_store %arg6[%c0_31, %c0_32], %27 {strides = array<i32>} : memref<256x128xf32, #tpu.memory_space<vmem>>, vector<256x128xf32>,
    %c0_33 = arith.constant 0 : index
    %c0_34 = arith.constant 0 : index
    %c0_35 = arith.constant 0 : index
    %29 = vector.load %arg2[%c0_33, %c0_34, %c0_35] : memref<16x18x128xbf16, #tpu.memory_space<vmem>>, vector<16x16x128xbf16>
    %30 = vector.shape_cast %29 : vector<16x16x128xbf16> to vector<256x128xbf16>
    %c0_36 = arith.constant 0 : index
    %c0_37 = arith.constant 0 : index
    %31 = vector.load %arg6[%c0_36, %c0_37] : memref<256x128xf32, #tpu.memory_space<vmem>>, vector<256x128xf32>
    %c3 = arith.constant 3 : index
    %c0_38 = arith.constant 0 : index
    %c0_39 = arith.constant 0 : index
    %32 = vector.load %arg4[%c3, %c0_38, %c0_39] : memref<9x128x128xbf16, #tpu.memory_space<vmem>>, vector<1x128x128xbf16>
    %33 = vector.shape_cast %32 : vector<1x128x128xbf16> to vector<128x128xbf16>
    %cst_40 = arith.constant dense<0.000000e+00> : vector<256x128xf32>
    %34 = tpu.matmul %30, %33, %cst_40 {dimension_numbers = #tpu.dot_dimension_numbers<[1], [0], [0], [1], [0, 0, 1, 1], [], []>} : vector<256x128xbf16>, vector<128x128xbf16>, vector<256x128xf32> -> vector<256x128xf32>
    %35 = arith.addf %31, %34 : vector<256x128xf32>
    %c0_41 = arith.constant 0 : index
    %c0_42 = arith.constant 0 : index
    %36 = vector.load %arg6[%c0_41, %c0_42] : memref<256x128xf32, #tpu.memory_space<vmem>>, vector<256x128xf32>
    tpu.vector_store %arg6[%c0_41, %c0_42], %35 {strides = array<i32>} : memref<256x128xf32, #tpu.memory_space<vmem>>, vector<256x128xf32>,
    %c0_43 = arith.constant 0 : index
    %c1_44 = arith.constant 1 : index
    %c0_45 = arith.constant 0 : index
    %37 = vector.load %arg2[%c0_43, %c1_44, %c0_45] : memref<16x18x128xbf16, #tpu.memory_space<vmem>>, vector<16x16x128xbf16>
    %38 = vector.shape_cast %37 : vector<16x16x128xbf16> to vector<256x128xbf16>
    %c0_46 = arith.constant 0 : index
    %c0_47 = arith.constant 0 : index
    %39 = vector.load %arg6[%c0_46, %c0_47] : memref<256x128xf32, #tpu.memory_space<vmem>>, vector<256x128xf32>
    %c4 = arith.constant 4 : index
    %c0_48 = arith.constant 0 : index
    %c0_49 = arith.constant 0 : index
    %40 = vector.load %arg4[%c4, %c0_48, %c0_49] : memref<9x128x128xbf16, #tpu.memory_space<vmem>>, vector<1x128x128xbf16>
    %41 = vector.shape_cast %40 : vector<1x128x128xbf16> to vector<128x128xbf16>
    %cst_50 = arith.constant dense<0.000000e+00> : vector<256x128xf32>
    %42 = tpu.matmul %38, %41, %cst_50 {dimension_numbers = #tpu.dot_dimension_numbers<[1], [0], [0], [1], [0, 0, 1, 1], [], []>} : vector<256x128xbf16>, vector<128x128xbf16>, vector<256x128xf32> -> vector<256x128xf32>
    %43 = arith.addf %39, %42 : vector<256x128xf32>
    %c0_51 = arith.constant 0 : index
    %c0_52 = arith.constant 0 : index
    %44 = vector.load %arg6[%c0_51, %c0_52] : memref<256x128xf32, #tpu.memory_space<vmem>>, vector<256x128xf32>
    tpu.vector_store %arg6[%c0_51, %c0_52], %43 {strides = array<i32>} : memref<256x128xf32, #tpu.memory_space<vmem>>, vector<256x128xf32>,
    %c0_53 = arith.constant 0 : index
    %c2_54 = arith.constant 2 : index
    %c0_55 = arith.constant 0 : index
    %45 = vector.load %arg2[%c0_53, %c2_54, %c0_55] : memref<16x18x128xbf16, #tpu.memory_space<vmem>>, vector<16x16x128xbf16>
    %46 = vector.shape_cast %45 : vector<16x16x128xbf16> to vector<256x128xbf16>
    %c0_56 = arith.constant 0 : index
    %c0_57 = arith.constant 0 : index
    %47 = vector.load %arg6[%c0_56, %c0_57] : memref<256x128xf32, #tpu.memory_space<vmem>>, vector<256x128xf32>
    %c5 = arith.constant 5 : index
    %c0_58 = arith.constant 0 : index
    %c0_59 = arith.constant 0 : index
    %48 = vector.load %arg4[%c5, %c0_58, %c0_59] : memref<9x128x128xbf16, #tpu.memory_space<vmem>>, vector<1x128x128xbf16>
    %49 = vector.shape_cast %48 : vector<1x128x128xbf16> to vector<128x128xbf16>
    %cst_60 = arith.constant dense<0.000000e+00> : vector<256x128xf32>
    %50 = tpu.matmul %46, %49, %cst_60 {dimension_numbers = #tpu.dot_dimension_numbers<[1], [0], [0], [1], [0, 0, 1, 1], [], []>} : vector<256x128xbf16>, vector<128x128xbf16>, vector<256x128xf32> -> vector<256x128xf32>
    %51 = arith.addf %47, %50 : vector<256x128xf32>
    %c0_61 = arith.constant 0 : index
    %c0_62 = arith.constant 0 : index
    %52 = vector.load %arg6[%c0_61, %c0_62] : memref<256x128xf32, #tpu.memory_space<vmem>>, vector<256x128xf32>
    tpu.vector_store %arg6[%c0_61, %c0_62], %51 {strides = array<i32>} : memref<256x128xf32, #tpu.memory_space<vmem>>, vector<256x128xf32>,
    %c0_63 = arith.constant 0 : index
    %c0_64 = arith.constant 0 : index
    %c0_65 = arith.constant 0 : index
    %53 = vector.load %arg3[%c0_63, %c0_64, %c0_65] : memref<16x18x128xbf16, #tpu.memory_space<vmem>>, vector<16x16x128xbf16>
    %54 = vector.shape_cast %53 : vector<16x16x128xbf16> to vector<256x128xbf16>
    %c0_66 = arith.constant 0 : index
    %c0_67 = arith.constant 0 : index
    %55 = vector.load %arg6[%c0_66, %c0_67] : memref<256x128xf32, #tpu.memory_space<vmem>>, vector<256x128xf32>
    %c6 = arith.constant 6 : index
    %c0_68 = arith.constant 0 : index
    %c0_69 = arith.constant 0 : index
    %56 = vector.load %arg4[%c6, %c0_68, %c0_69] : memref<9x128x128xbf16, #tpu.memory_space<vmem>>, vector<1x128x128xbf16>
    %57 = vector.shape_cast %56 : vector<1x128x128xbf16> to vector<128x128xbf16>
    %cst_70 = arith.constant dense<0.000000e+00> : vector<256x128xf32>
    %58 = tpu.matmul %54, %57, %cst_70 {dimension_numbers = #tpu.dot_dimension_numbers<[1], [0], [0], [1], [0, 0, 1, 1], [], []>} : vector<256x128xbf16>, vector<128x128xbf16>, vector<256x128xf32> -> vector<256x128xf32>
    %59 = arith.addf %55, %58 : vector<256x128xf32>
    %c0_71 = arith.constant 0 : index
    %c0_72 = arith.constant 0 : index
    %60 = vector.load %arg6[%c0_71, %c0_72] : memref<256x128xf32, #tpu.memory_space<vmem>>, vector<256x128xf32>
    tpu.vector_store %arg6[%c0_71, %c0_72], %59 {strides = array<i32>} : memref<256x128xf32, #tpu.memory_space<vmem>>, vector<256x128xf32>,
    %c0_73 = arith.constant 0 : index
    %c1_74 = arith.constant 1 : index
    %c0_75 = arith.constant 0 : index
    %61 = vector.load %arg3[%c0_73, %c1_74, %c0_75] : memref<16x18x128xbf16, #tpu.memory_space<vmem>>, vector<16x16x128xbf16>
    %62 = vector.shape_cast %61 : vector<16x16x128xbf16> to vector<256x128xbf16>
    %c0_76 = arith.constant 0 : index
    %c0_77 = arith.constant 0 : index
    %63 = vector.load %arg6[%c0_76, %c0_77] : memref<256x128xf32, #tpu.memory_space<vmem>>, vector<256x128xf32>
    %c7 = arith.constant 7 : index
    %c0_78 = arith.constant 0 : index
    %c0_79 = arith.constant 0 : index
    %64 = vector.load %arg4[%c7, %c0_78, %c0_79] : memref<9x128x128xbf16, #tpu.memory_space<vmem>>, vector<1x128x128xbf16>
    %65 = vector.shape_cast %64 : vector<1x128x128xbf16> to vector<128x128xbf16>
    %cst_80 = arith.constant dense<0.000000e+00> : vector<256x128xf32>
    %66 = tpu.matmul %62, %65, %cst_80 {dimension_numbers = #tpu.dot_dimension_numbers<[1], [0], [0], [1], [0, 0, 1, 1], [], []>} : vector<256x128xbf16>, vector<128x128xbf16>, vector<256x128xf32> -> vector<256x128xf32>
    %67 = arith.addf %63, %66 : vector<256x128xf32>
    %c0_81 = arith.constant 0 : index
    %c0_82 = arith.constant 0 : index
    %68 = vector.load %arg6[%c0_81, %c0_82] : memref<256x128xf32, #tpu.memory_space<vmem>>, vector<256x128xf32>
    tpu.vector_store %arg6[%c0_81, %c0_82], %67 {strides = array<i32>} : memref<256x128xf32, #tpu.memory_space<vmem>>, vector<256x128xf32>,
    %c0_83 = arith.constant 0 : index
    %c2_84 = arith.constant 2 : index
    %c0_85 = arith.constant 0 : index
    %69 = vector.load %arg3[%c0_83, %c2_84, %c0_85] : memref<16x18x128xbf16, #tpu.memory_space<vmem>>, vector<16x16x128xbf16>
    %70 = vector.shape_cast %69 : vector<16x16x128xbf16> to vector<256x128xbf16>
    %c0_86 = arith.constant 0 : index
    %c0_87 = arith.constant 0 : index
    %71 = vector.load %arg6[%c0_86, %c0_87] : memref<256x128xf32, #tpu.memory_space<vmem>>, vector<256x128xf32>
    %c8 = arith.constant 8 : index
    %c0_88 = arith.constant 0 : index
    %c0_89 = arith.constant 0 : index
    %72 = vector.load %arg4[%c8, %c0_88, %c0_89] : memref<9x128x128xbf16, #tpu.memory_space<vmem>>, vector<1x128x128xbf16>
    %73 = vector.shape_cast %72 : vector<1x128x128xbf16> to vector<128x128xbf16>
    %cst_90 = arith.constant dense<0.000000e+00> : vector<256x128xf32>
    %74 = tpu.matmul %70, %73, %cst_90 {dimension_numbers = #tpu.dot_dimension_numbers<[1], [0], [0], [1], [0, 0, 1, 1], [], []>} : vector<256x128xbf16>, vector<128x128xbf16>, vector<256x128xf32> -> vector<256x128xf32>
    %75 = arith.addf %71, %74 : vector<256x128xf32>
    %c0_91 = arith.constant 0 : index
    %c0_92 = arith.constant 0 : index
    %76 = vector.load %arg6[%c0_91, %c0_92] : memref<256x128xf32, #tpu.memory_space<vmem>>, vector<256x128xf32>
    tpu.vector_store %arg6[%c0_91, %c0_92], %75 {strides = array<i32>} : memref<256x128xf32, #tpu.memory_space<vmem>>, vector<256x128xf32>,
    %c0_93 = arith.constant 0 : index
    %c0_94 = arith.constant 0 : index
    %77 = vector.load %arg6[%c0_93, %c0_94] : memref<256x128xf32, #tpu.memory_space<vmem>>, vector<256x128xf32>
    %c0_95 = arith.constant 0 : index
    %c0_96 = arith.constant 0 : index
    %78 = vector.load %arg5[%c0_95, %c0_96] : memref<1x128xf32, #tpu.memory_space<vmem>>, vector<1x128xf32>
    %79 = vector.broadcast %78 : vector<1x128xf32> to vector<256x128xf32>
    %80 = arith.addf %77, %79 : vector<256x128xf32>
    %c0_97 = arith.constant 0 : index
    %c0_98 = arith.constant 0 : index
    %81 = vector.load %arg6[%c0_97, %c0_98] : memref<256x128xf32, #tpu.memory_space<vmem>>, vector<256x128xf32>
    tpu.vector_store %arg6[%c0_97, %c0_98], %80 {strides = array<i32>} : memref<256x128xf32, #tpu.memory_space<vmem>>, vector<256x128xf32>,
    %c256_i32 = arith.constant 256 : i32
    %82 = arith.muli %arg0, %c256_i32 : i32
    %83 = tpu.iota {dimensions = array<i32: 0>} : vector<256x1xi32>
    %84 = vector.broadcast %82 : i32 to vector<256x1xi32>
    %85 = arith.addi %84, %83 : vector<256x1xi32>
    %c512_i32 = arith.constant 512 : i32
    %86 = vector.broadcast %c512_i32 : i32 to vector<256x1xi32>
    %87 = arith.cmpi slt, %85, %86 : vector<256x1xi32>
    %cst_99 = arith.constant 0.000000e+00 : f32
    %88 = vector.shape_cast %87 : vector<256x1xi1> to vector<256x1xi1>
    %89 = vector.broadcast %88 : vector<256x1xi1> to vector<256x128xi1>
    %90 = vector.broadcast %cst_99 : f32 to vector<256x128xf32>
    %91 = arith.select %89, %80, %90 : vector<256x128xi1>, vector<256x128xf32>
    %c0_100 = arith.constant 0 : index
    %c0_101 = arith.constant 0 : index
    %92 = vector.load %arg7[%c0_100, %c0_101] : memref<1x128xf32, #tpu.memory_space<vmem>>, vector<1x128xf32>
    %cst_102 = arith.constant dense<0.000000e+00> : vector<128xf32>
    %93 = vector.multi_reduction <add>, %91, %cst_102 [0] : vector<256x128xf32> to vector<128xf32>
    %94 = vector.shape_cast %93 : vector<128xf32> to vector<1x128xf32>
    %95 = arith.addf %92, %94 : vector<1x128xf32>
    %c0_103 = arith.constant 0 : index
    %c0_104 = arith.constant 0 : index
    %96 = vector.load %arg7[%c0_103, %c0_104] : memref<1x128xf32, #tpu.memory_space<vmem>>, vector<1x128xf32>
    tpu.vector_store %arg7[%c0_103, %c0_104], %95 {strides = array<i32>} : memref<1x128xf32, #tpu.memory_space<vmem>>, vector<1x128xf32>,
    %c0_105 = arith.constant 0 : index
    %c0_106 = arith.constant 0 : index
    %97 = vector.load %arg8[%c0_105, %c0_106] : memref<1x128xf32, #tpu.memory_space<vmem>>, vector<1x128xf32>
    %98 = arith.mulf %91, %91 : vector<256x128xf32>
    %cst_107 = arith.constant dense<0.000000e+00> : vector<128xf32>
    %99 = vector.multi_reduction <add>, %98, %cst_107 [0] : vector<256x128xf32> to vector<128xf32>
    %100 = vector.shape_cast %99 : vector<128xf32> to vector<1x128xf32>
    %101 = arith.addf %97, %100 : vector<1x128xf32>
    %c0_108 = arith.constant 0 : index
    %c0_109 = arith.constant 0 : index
    %102 = vector.load %arg8[%c0_108, %c0_109] : memref<1x128xf32, #tpu.memory_space<vmem>>, vector<1x128xf32>
    tpu.vector_store %arg8[%c0_108, %c0_109], %101 {strides = array<i32>} : memref<1x128xf32, #tpu.memory_space<vmem>>, vector<1x128xf32>,
    return
  }
  func.func @transform_0(%arg0: i32) -> (i32, i32, i32) {
    %c0_i32 = arith.constant 0 : i32
    %c0_i32_0 = arith.constant 0 : i32
    %c0_i32_1 = arith.constant 0 : i32
    return %arg0, %c0_i32, %c0_i32_0 : i32, i32, i32
  }
  func.func @transform_1(%arg0: i32) -> (i32, i32, i32) {
    %c0_i32 = arith.constant 0 : i32
    %c0_i32_0 = arith.constant 0 : i32
    %c0_i32_1 = arith.constant 0 : i32
    return %arg0, %c0_i32, %c0_i32_0 : i32, i32, i32
  }
  func.func @transform_2(%arg0: i32) -> (i32, i32, i32) {
    %c0_i32 = arith.constant 0 : i32
    %c0_i32_0 = arith.constant 0 : i32
    %c0_i32_1 = arith.constant 0 : i32
    return %arg0, %c0_i32, %c0_i32_0 : i32, i32, i32
  }
  func.func @transform_3(%arg0: i32) -> (i32, i32, i32) {
    %c0_i32 = arith.constant 0 : i32
    %c0_i32_0 = arith.constant 0 : i32
    %c0_i32_1 = arith.constant 0 : i32
    %c0_i32_2 = arith.constant 0 : i32
    return %c0_i32, %c0_i32_0, %c0_i32_1 : i32, i32, i32
  }
  func.func @transform_4(%arg0: i32) -> (i32, i32) {
    %c0_i32 = arith.constant 0 : i32
    %c0_i32_0 = arith.constant 0 : i32
    %c0_i32_1 = arith.constant 0 : i32
    return %c0_i32, %c0_i32_0 : i32, i32
  }
  func.func @transform_5(%arg0: i32) -> (i32, i32) {
    %c0_i32 = arith.constant 0 : i32
    %c0_i32_0 = arith.constant 0 : i32
    return %arg0, %c0_i32 : i32, i32
  }
  func.func @transform_6(%arg0: i32) -> (i32, i32) {
    %c0_i32 = arith.constant 0 : i32
    %c0_i32_0 = arith.constant 0 : i32
    %c0_i32_1 = arith.constant 0 : i32
    return %c0_i32, %c0_i32_0 : i32, i32
  }
  func.func @transform_7(%arg0: i32) -> (i32, i32) {
    %c0_i32 = arith.constant 0 : i32
    %c0_i32_0 = arith.constant 0 : i32
    %c0_i32_1 = arith.constant 0 : i32
    return %c0_i32, %c0_i32_0 : i32, i32
  }
}

module attributes {stable_mosaic.version = 11 : i64} {
  func.func @_bn_act_kernel(%arg0: i32, %arg1: memref<256x128xf32, #tpu.memory_space<vmem>>, %arg2: memref<1x128xf32, #tpu.memory_space<vmem>>, %arg3: memref<1x128xf32, #tpu.memory_space<vmem>>, %arg4: memref<256x128xbf16, #tpu.memory_space<vmem>>) attributes {dimension_semantics = [#tpu.dimension_semantics<parallel>], iteration_bounds = array<i64: 2>, scalar_prefetch = 0 : i64, scratch_operands = 0 : i64, tpu.core_type = #tpu.core_type<tc>, window_params = [{transform_indices = @transform_0, window_bounds = array<i64: 256, 128>}, {pipeline_mode = #tpu.pipeline_mode<synchronous>, transform_indices = @transform_1, window_bounds = array<i64: 1, 128>}, {pipeline_mode = #tpu.pipeline_mode<synchronous>, transform_indices = @transform_2, window_bounds = array<i64: 1, 128>}, {transform_indices = @transform_3, window_bounds = array<i64: 256, 128>}]} {
    %c0 = arith.constant 0 : index
    %c0_0 = arith.constant 0 : index
    %0 = vector.load %arg1[%c0, %c0_0] : memref<256x128xf32, #tpu.memory_space<vmem>>, vector<256x128xf32>
    %c0_1 = arith.constant 0 : index
    %c0_2 = arith.constant 0 : index
    %1 = vector.load %arg2[%c0_1, %c0_2] : memref<1x128xf32, #tpu.memory_space<vmem>>, vector<1x128xf32>
    %2 = vector.broadcast %1 : vector<1x128xf32> to vector<256x128xf32>
    %3 = arith.mulf %0, %2 : vector<256x128xf32>
    %c0_3 = arith.constant 0 : index
    %c0_4 = arith.constant 0 : index
    %4 = vector.load %arg3[%c0_3, %c0_4] : memref<1x128xf32, #tpu.memory_space<vmem>>, vector<1x128xf32>
    %5 = vector.broadcast %4 : vector<1x128xf32> to vector<256x128xf32>
    %6 = arith.addf %3, %5 : vector<256x128xf32>
    %cst = arith.constant 0.000000e+00 : f32
    %7 = vector.broadcast %cst : f32 to vector<256x128xf32>
    %8 = arith.cmpf ogt, %6, %7 : vector<256x128xf32>
    %cst_5 = arith.constant 0.00999999977 : f32
    %9 = vector.broadcast %cst_5 : f32 to vector<256x128xf32>
    %10 = arith.mulf %9, %6 : vector<256x128xf32>
    %11 = arith.select %8, %6, %10 : vector<256x128xi1>, vector<256x128xf32>
    %12 = arith.truncf %11 : vector<256x128xf32> to vector<256x128xbf16>
    %c0_6 = arith.constant 0 : index
    %c0_7 = arith.constant 0 : index
    %13 = vector.load %arg4[%c0_6, %c0_7] : memref<256x128xbf16, #tpu.memory_space<vmem>>, vector<256x128xbf16>
    tpu.vector_store %arg4[%c0_6, %c0_7], %12 {strides = array<i32>} : memref<256x128xbf16, #tpu.memory_space<vmem>>, vector<256x128xbf16>,
    return
  }
  func.func @transform_0(%arg0: i32) -> (i32, i32) {
    %c0_i32 = arith.constant 0 : i32
    %c0_i32_0 = arith.constant 0 : i32
    return %arg0, %c0_i32 : i32, i32
  }
  func.func @transform_1(%arg0: i32) -> (i32, i32) {
    %c0_i32 = arith.constant 0 : i32
    %c0_i32_0 = arith.constant 0 : i32
    %c0_i32_1 = arith.constant 0 : i32
    return %c0_i32, %c0_i32_0 : i32, i32
  }
  func.func @transform_2(%arg0: i32) -> (i32, i32) {
    %c0_i32 = arith.constant 0 : i32
    %c0_i32_0 = arith.constant 0 : i32
    %c0_i32_1 = arith.constant 0 : i32
    return %c0_i32, %c0_i32_0 : i32, i32
  }
  func.func @transform_3(%arg0: i32) -> (i32, i32) {
    %c0_i32 = arith.constant 0 : i32
    %c0_i32_0 = arith.constant 0 : i32
    return %arg0, %c0_i32 : i32, i32
  }
}

module attributes {stable_mosaic.version = 11 : i64} {
  func.func @_bn_act_res_kernel(%arg0: i32, %arg1: memref<256x128xf32, #tpu.memory_space<vmem>>, %arg2: memref<1x128xf32, #tpu.memory_space<vmem>>, %arg3: memref<1x128xf32, #tpu.memory_space<vmem>>, %arg4: memref<256x128xf32, #tpu.memory_space<vmem>>, %arg5: memref<256x128xf32, #tpu.memory_space<vmem>>) attributes {dimension_semantics = [#tpu.dimension_semantics<parallel>], iteration_bounds = array<i64: 2>, scalar_prefetch = 0 : i64, scratch_operands = 0 : i64, tpu.core_type = #tpu.core_type<tc>, window_params = [{transform_indices = @transform_0, window_bounds = array<i64: 256, 128>}, {pipeline_mode = #tpu.pipeline_mode<synchronous>, transform_indices = @transform_1, window_bounds = array<i64: 1, 128>}, {pipeline_mode = #tpu.pipeline_mode<synchronous>, transform_indices = @transform_2, window_bounds = array<i64: 1, 128>}, {transform_indices = @transform_3, window_bounds = array<i64: 256, 128>}, {transform_indices = @transform_4, window_bounds = array<i64: 256, 128>}]} {
    %c0 = arith.constant 0 : index
    %c0_0 = arith.constant 0 : index
    %0 = vector.load %arg1[%c0, %c0_0] : memref<256x128xf32, #tpu.memory_space<vmem>>, vector<256x128xf32>
    %c0_1 = arith.constant 0 : index
    %c0_2 = arith.constant 0 : index
    %1 = vector.load %arg2[%c0_1, %c0_2] : memref<1x128xf32, #tpu.memory_space<vmem>>, vector<1x128xf32>
    %2 = vector.broadcast %1 : vector<1x128xf32> to vector<256x128xf32>
    %3 = arith.mulf %0, %2 : vector<256x128xf32>
    %c0_3 = arith.constant 0 : index
    %c0_4 = arith.constant 0 : index
    %4 = vector.load %arg3[%c0_3, %c0_4] : memref<1x128xf32, #tpu.memory_space<vmem>>, vector<1x128xf32>
    %5 = vector.broadcast %4 : vector<1x128xf32> to vector<256x128xf32>
    %6 = arith.addf %3, %5 : vector<256x128xf32>
    %cst = arith.constant 0.000000e+00 : f32
    %7 = vector.broadcast %cst : f32 to vector<256x128xf32>
    %8 = arith.cmpf ogt, %6, %7 : vector<256x128xf32>
    %cst_5 = arith.constant 0.00999999977 : f32
    %9 = vector.broadcast %cst_5 : f32 to vector<256x128xf32>
    %10 = arith.mulf %9, %6 : vector<256x128xf32>
    %11 = arith.select %8, %6, %10 : vector<256x128xi1>, vector<256x128xf32>
    %c0_6 = arith.constant 0 : index
    %c0_7 = arith.constant 0 : index
    %12 = vector.load %arg4[%c0_6, %c0_7] : memref<256x128xf32, #tpu.memory_space<vmem>>, vector<256x128xf32>
    %13 = arith.addf %11, %12 : vector<256x128xf32>
    %c0_8 = arith.constant 0 : index
    %c0_9 = arith.constant 0 : index
    %14 = vector.load %arg5[%c0_8, %c0_9] : memref<256x128xf32, #tpu.memory_space<vmem>>, vector<256x128xf32>
    tpu.vector_store %arg5[%c0_8, %c0_9], %13 {strides = array<i32>} : memref<256x128xf32, #tpu.memory_space<vmem>>, vector<256x128xf32>,
    return
  }
  func.func @transform_0(%arg0: i32) -> (i32, i32) {
    %c0_i32 = arith.constant 0 : i32
    %c0_i32_0 = arith.constant 0 : i32
    return %arg0, %c0_i32 : i32, i32
  }
  func.func @transform_1(%arg0: i32) -> (i32, i32) {
    %c0_i32 = arith.constant 0 : i32
    %c0_i32_0 = arith.constant 0 : i32
    %c0_i32_1 = arith.constant 0 : i32
    return %c0_i32, %c0_i32_0 : i32, i32
  }
  func.func @transform_2(%arg0: i32) -> (i32, i32) {
    %c0_i32 = arith.constant 0 : i32
    %c0_i32_0 = arith.constant 0 : i32
    %c0_i32_1 = arith.constant 0 : i32
    return %c0_i32, %c0_i32_0 : i32, i32
  }
  func.func @transform_3(%arg0: i32) -> (i32, i32) {
    %c0_i32 = arith.constant 0 : i32
    %c0_i32_0 = arith.constant 0 : i32
    return %arg0, %c0_i32 : i32, i32
  }
  func.func @transform_4(%arg0: i32) -> (i32, i32) {
    %c0_i32 = arith.constant 0 : i32
    %c0_i32_0 = arith.constant 0 : i32
    return %arg0, %c0_i32 : i32, i32
  }
}

</mosaic_0001>

<bundles_post_ra>
// kernel: res_block_forward.5
= control target key start
LH: loop header
LB: loop body
LE: loop exit
PB: predicated region body
PF: predicated region fallthrough
CT: control target
= control target key end

     0   :  { %s804_s12 = smov 0   ;;  %s952_s0 = inlined_call_operand.vmem [shape: f32[512,128], index: 0, kind: input, shape index: {}]   ;;  %s953_s1 = inlined_call_operand.vmem [shape: f32[1,128], index: 1, kind: input, shape index: {}]   ;;  %s954_s2 = inlined_call_operand.vmem [shape: f32[1,128], index: 2, kind: input, shape index: {}]   ;;  %s955_s3 = inlined_call_operand.vmem [shape: bf16[512,128], index: 3, kind: output, shape index: {}]  }
   0x1 LB: > { %s596_s13 = sadd.s32 4294967295, %s782_s12   ;;  %p600_p0 = scmp.ge.s32.totalorder %s782_s12, 1  ;;  %s782_s12 = sphi %s804_s12, %s13_s12  }
   0x2   : > { %p138_p1 = scmp.lt.s32.totalorder %s782_s12, 3 }
   0x4   : > { %p139_p2 = pnand %p600_p0, %p138_p1 }
   0x5   : > { %s601_s14 = sshll.u32 (!%p139_p2), %s596_s13, 5 }
   0x6   : > { %142 = sbr.rel (%p139_p2) target bundleno = 65 (0x41), region = 32  ;;  %p163_p3 = scmp.lt.s32.totalorder (!%p139_p2), %s601_s14, 63 }
   0xb   : > { %s957_s14 = smov (!%p163_p3, %s601_s14), 63  ;;  %v818_v0 = vld [vmem:[%s953_s1] ss:$0 sm:$0xff] }
   0xc   : > { %s602_s15 = sshll.u32 %s957_s14, 3  ;;  %v828_v1 = vld [vmem:[%s954_s2] ss:$0 sm:$0xff]  ;;  %s604_s23 = sshll.u32 %s957_s14, 2 }
   0xd   : > { %s823_s20 = scalar_lea.vmem %s952_s0, %s602_s15  ;;  %s856_s26 = scalar_lea.vmem %s955_s3, %s604_s23 }
   0xe   : > { %v174_v2 = vld [vmem:[%s823_s20] sm:$0xff]  ;;  %v175_v3 = vld [vmem:[%s823_s20 + $0x8] sm:$0xff]  ;;  %v176_v4 = vld [vmem:[%s823_s20 + $0x10] sm:$0xff] }
   0xf   : > { %v213_v5 = vmul.f32 %v818_v0, %v174_v2  ;;  %v214_v6 = vmul.f32 %v818_v0, %v175_v3  ;;  %v177_v7 = vld [vmem:[%s823_s20 + $0x18] sm:$0xff]  ;;  %v215_v8 = vmul.f32 %v818_v0, %v176_v4  ;;  %v178_v9 = vld [vmem:[%s823_s20 + $0x20] sm:$0xff]  ;;  %v179_v10 = vld [vmem:[%s823_s20 + $0x28] sm:$0xff] }
  0x10   : > { %v216_v11 = vmul.f32 %v818_v0, %v177_v7  ;;  %v217_v12 = vmul.f32 %v818_v0, %v178_v9  ;;  %v218_v13 = vmul.f32 %v818_v0, %v179_v10  ;;  %v180_v14 = vld [vmem:[%s823_s20 + $0x30] sm:$0xff]  ;;  %v181_v15 = vld [vmem:[%s823_s20 + $0x38] sm:$0xff]  ;;  %v182_v30 = vld [vmem:[%s823_s20 + $0x40] sm:$0xff] }
  0x11   : > { %v252_v16 = vadd.f32 %v828_v1, %v213_v5  ;;  %v253_v17 = vadd.f32 %v828_v1, %v214_v6  ;;  %v254_v18 = vadd.f32 %v828_v1, %v215_v8  ;;  %v219_v19 = vmul.f32 %v818_v0, %v180_v14  ;;  %v183_v31 = vld [vmem:[%s823_s20 + $0x48] sm:$0xff]  ;;  %v184_v32 = vld [vmem:[%s823_s20 + $0x50] sm:$0xff]  ;;  %v185_v44 = vld [vmem:[%s823_s20 + $0x58] sm:$0xff] }
  0x12   : > { %v255_v20 = vadd.f32 %v828_v1, %v216_v11  ;;  %v256_v21 = vadd.f32 %v828_v1, %v217_v12  ;;  %v257_v22 = vadd.f32 %v828_v1, %v218_v13  ;;  %v220_v23 = vmul.f32 %v818_v0, %v181_v15  ;;  %v186_v46 = vld [vmem:[%s823_s20 + $0x60] sm:$0xff]  ;;  %v187_v56 = vld [vmem:[%s823_s20 + $0x68] sm:$0xff]  ;;  %v188_v60 = vld [vmem:[%s823_s20 + $0x70] sm:$0xff] }
  0x13   : > { %vm284_vm0 = vcmp.gt.f32.partialorder %v252_v16, 0.0  ;;  %vm285_vm1 = vcmp.gt.f32.partialorder %v253_v17, 0.0  ;;  %v316_v24 = vmul.f32 0.01, %v252_v16  ;;  %v317_v25 = vmul.f32 0.01, %v253_v17 }
  0x14   : > { %vm286_vm2 = vcmp.gt.f32.partialorder %v254_v18, 0.0  ;;  %vm287_vm3 = vcmp.gt.f32.partialorder %v255_v20, 0.0  ;;  %v318_v26 = vmul.f32 0.01, %v254_v18  ;;  %v319_v27 = vmul.f32 0.01, %v255_v20 }
  0x15   : > { %v348_v28 = vsel %vm284_vm0, %v252_v16, %v316_v24  ;;  %v349_v29 = vsel %vm285_vm1, %v253_v17, %v317_v25  ;;  %vm288_vm4 = vcmp.gt.f32.partialorder %v256_v21, 0.0  ;;  %vm289_vm5 = vcmp.gt.f32.partialorder %v257_v22, 0.0  ;;  %v189_v6 = vld [vmem:[%s823_s20 + $0x78] sm:$0xff]  ;;  %v190_v10 = vld [vmem:[%s823_s20 + $0x80] sm:$0xff] }
  0x16   : > { %v676_v33 = vpack.c.bf16 %v349_v29, %v348_v28  ;;  %v350_v34 = vsel %vm286_vm2, %v254_v18, %v318_v26  ;;  %v351_v35 = vsel %vm287_vm3, %v255_v20, %v319_v27  ;;  %v320_v36 = vmul.f32 0.01, %v256_v21  ;;  %v191_v18 = vld [vmem:[%s823_s20 + $0x88] sm:$0xff]  ;;  %v193_v26 = vld [vmem:[%s823_s20 + $0x98] sm:$0xff] }
  0x17   : > { %v681_v37 = vpack.c.bf16 %v351_v35, %v350_v34  ;;  %v321_v38 = vmul.f32 0.01, %v257_v22  ;;  %v258_v39 = vadd.f32 %v828_v1, %v219_v19  ;;  %v259_v40 = vadd.f32 %v828_v1, %v220_v23  ;;  %v192_v19 = vld [vmem:[%s823_s20 + $0x90] sm:$0xff] }
  0x18   : > { %677 = vst [vmem:[%s856_s26] sm:$0xff] %v676_v33   ;;  %v352_v41 = vsel %vm288_vm4, %v256_v21, %v320_v36  ;;  %v221_v42 = vmul.f32 %v818_v0, %v182_v30  ;;  %v222_v43 = vmul.f32 %v818_v0, %v183_v31  ;;  %v223_v45 = vmul.f32 %v818_v0, %v184_v32  ;;  %v194_v31 = vld [vmem:[%s823_s20 + $0xa0] sm:$0xff]  ;;  %v195_v32 = vld [vmem:[%s823_s20 + $0xa8] sm:$0xff] }
  0x19   : > { %753 = vst [vmem:[%s856_s26 + $0x8] sm:$0xff] %v681_v37   ;;  %v353_v47 = vsel %vm289_vm5, %v257_v22, %v321_v38  ;;  %vm290_vm6 = vcmp.gt.f32.partialorder %v258_v39, 0.0  ;;  %vm291_vm7 = vcmp.gt.f32.partialorder %v259_v40, 0.0  ;;  %v322_v48 = vmul.f32 0.01, %v258_v39 }
  0x1a   : > { %v686_v49 = vpack.c.bf16 %v353_v47, %v352_v41  ;;  %v323_v50 = vmul.f32 0.01, %v259_v40  ;;  %v260_v51 = vadd.f32 %v828_v1, %v221_v42  ;;  %v261_v52 = vadd.f32 %v828_v1, %v222_v43  ;;  %v196_v43 = vld [vmem:[%s823_s20 + $0xb0] sm:$0xff] }
  0x1b   : > { %v354_v53 = vsel %vm290_vm6, %v258_v39, %v322_v48  ;;  %v224_v54 = vmul.f32 %v818_v0, %v185_v44  ;;  %v262_v55 = vadd.f32 %v828_v1, %v223_v45  ;;  %v225_v57 = vmul.f32 %v818_v0, %v186_v46  ;;  %v197_v44 = vld [vmem:[%s823_s20 + $0xb8] sm:$0xff] }
  0x1c   : > { %754 = vst [vmem:[%s856_s26 + $0x10] sm:$0xff] %v686_v49   ;;  %v355_v58 = vsel %vm291_vm7, %v259_v40, %v323_v50  ;;  %vm292_vm8 = vcmp.gt.f32.partialorder %v260_v51, 0.0  ;;  %vm293_vm9 = vcmp.gt.f32.partialorder %v261_v52, 0.0  ;;  %v324_v59 = vmul.f32 0.01, %v260_v51 }
  0x1d   : > { %v691_v61 = vpack.c.bf16 %v355_v58, %v354_v53  ;;  %v325_v62 = vmul.f32 0.01, %v261_v52  ;;  %v263_v63 = vadd.f32 %v828_v1, %v224_v54  ;;  %vm294_vm10 = vcmp.gt.f32.partialorder %v262_v55, 0.0 }
  0x1e   : > { %v356_v2 = vsel %vm292_vm8, %v260_v51, %v324_v59  ;;  %v326_v3 = vmul.f32 0.01, %v262_v55  ;;  %v226_v4 = vmul.f32 %v818_v0, %v187_v56  ;;  %v264_v5 = vadd.f32 %v828_v1, %v225_v57  ;;  %v199_v59 = vld [vmem:[%s823_s20 + $0xc8] sm:$0xff] }
  0x1f   : > { %755 = vst [vmem:[%s856_s26 + $0x18] sm:$0xff] %v691_v61   ;;  %v357_v7 = vsel %vm293_vm9, %v261_v52, %v325_v62  ;;  %vm295_vm11 = vcmp.gt.f32.partialorder %v263_v63, 0.0  ;;  %v327_v8 = vmul.f32 0.01, %v263_v63  ;;  %v227_v9 = vmul.f32 %v818_v0, %v188_v60 }
  0x20   : > { %v696_v11 = vpack.c.bf16 %v357_v7, %v356_v2  ;;  %v358_v12 = vsel %vm294_vm10, %v262_v55, %v326_v3  ;;  %v265_v13 = vadd.f32 %v828_v1, %v226_v4  ;;  %vm296_vm12 = vcmp.gt.f32.partialorder %v264_v5, 0.0  ;;  %v198_v55 = vld [vmem:[%s823_s20 + $0xc0] sm:$0xff]  ;;  %v200_v4 = vld [vmem:[%s823_s20 + $0xd0] sm:$0xff] }
  0x21   : > { %v359_v14 = vsel %vm295_vm11, %v263_v63, %v327_v8  ;;  %v328_v15 = vmul.f32 0.01, %v264_v5  ;;  %v228_v16 = vmul.f32 %v818_v0, %v189_v6  ;;  %v266_v17 = vadd.f32 %v828_v1, %v227_v9  ;;  %v201_v9 = vld [vmem:[%s823_s20 + $0xd8] sm:$0xff] }
  0x22   : > { %756 = vst [vmem:[%s856_s26 + $0x20] sm:$0xff] %v696_v11   ;;  %v701_v20 = vpack.c.bf16 %v359_v14, %v358_v12  ;;  %vm297_vm13 = vcmp.gt.f32.partialorder %v265_v13, 0.0  ;;  %v329_v21 = vmul.f32 0.01, %v265_v13  ;;  %v229_v22 = vmul.f32 %v818_v0, %v190_v10  ;;  %v202_v10 = vld [vmem:[%s823_s20 + $0xe0] sm:$0xff]  ;;  %v203_v11 = vld [vmem:[%s823_s20 + $0xe8] sm:$0xff] }
  0x23   : > { %v360_v23 = vsel %vm296_vm12, %v264_v5, %v328_v15  ;;  %v267_v24 = vadd.f32 %v828_v1, %v228_v16  ;;  %vm298_vm14 = vcmp.gt.f32.partialorder %v266_v17, 0.0  ;;  %v330_v25 = vmul.f32 0.01, %v266_v17 }
  0x24   : > { %757 = vst [vmem:[%s856_s26 + $0x28] sm:$0xff] %v701_v20   ;;  %v361_v27 = vsel %vm297_vm13, %v265_v13, %v329_v21  ;;  %v230_v28 = vmul.f32 %v818_v0, %v191_v18  ;;  %v268_v29 = vadd.f32 %v828_v1, %v229_v22  ;;  %v231_v30 = vmul.f32 %v818_v0, %v192_v19  ;;  %v204_v22 = vld [vmem:[%s823_s20 + $0xf0] sm:$0xff] }
  0x25   : > { %v706_v33 = vpack.c.bf16 %v361_v27, %v360_v23  ;;  %vm299_vm15 = vcmp.gt.f32.partialorder %v267_v24, 0.0  ;;  %v331_v34 = vmul.f32 0.01, %v267_v24  ;;  %v362_v35 = vsel %vm298_vm14, %v266_v17, %v330_v25 }
  0x26   : > { %v269_v36 = vadd.f32 %v828_v1, %v230_v28  ;;  %vm300_vm0 = vcmp.gt.f32.partialorder %v268_v29, 0.0  ;;  %v332_v37 = vmul.f32 0.01, %v268_v29  ;;  %v232_v38 = vmul.f32 %v818_v0, %v193_v26 }
  0x27   : > { %758 = vst [vmem:[%s856_s26 + $0x30] sm:$0xff] %v706_v33   ;;  %v363_v39 = vsel %vm299_vm15, %v267_v24, %v331_v34  ;;  %v270_v40 = vadd.f32 %v828_v1, %v231_v30  ;;  %v233_v41 = vmul.f32 %v818_v0, %v194_v31  ;;  %v234_v42 = vmul.f32 %v818_v0, %v195_v32  ;;  %v205_v32 = vld [vmem:[%s823_s20 + $0xf8] sm:$0xff] }
  0x28   : > { %v711_v45 = vpack.c.bf16 %v363_v39, %v362_v35  ;;  %vm301_vm1 = vcmp.gt.f32.partialorder %v269_v36, 0.0  ;;  %v333_v46 = vmul.f32 0.01, %v269_v36  ;;  %v364_v47 = vsel %vm300_vm0, %v268_v29, %v332_v37 }
  0x29   : > { %v271_v48 = vadd.f32 %v828_v1, %v232_v38  ;;  %vm302_vm2 = vcmp.gt.f32.partialorder %v270_v40, 0.0  ;;  %v334_v49 = vmul.f32 0.01, %v270_v40  ;;  %v272_v50 = vadd.f32 %v828_v1, %v233_v41 }
  0x2a   : > { %759 = vst [vmem:[%s856_s26 + $0x38] sm:$0xff] %v711_v45   ;;  %v365_v51 = vsel %vm301_vm1, %v269_v36, %v333_v46  ;;  %v273_v52 = vadd.f32 %v828_v1, %v234_v42  ;;  %v235_v53 = vmul.f32 %v818_v0, %v196_v43  ;;  %v236_v54 = vmul.f32 %v818_v0, %v197_v44 }
  0x2b   : > { %v716_v56 = vpack.c.bf16 %v365_v51, %v364_v47  ;;  %vm303_vm3 = vcmp.gt.f32.partialorder %v271_v48, 0.0  ;;  %v335_v57 = vmul.f32 0.01, %v271_v48  ;;  %v366_v58 = vsel %vm302_vm2, %v270_v40, %v334_v49 }
  0x2c   : > { %vm304_vm4 = vcmp.gt.f32.partialorder %v272_v50, 0.0  ;;  %vm305_vm5 = vcmp.gt.f32.partialorder %v273_v52, 0.0  ;;  %v336_v60 = vmul.f32 0.01, %v272_v50  ;;  %v337_v61 = vmul.f32 0.01, %v273_v52 }
  0x2d   : > { %760 = vst [vmem:[%s856_s26 + $0x40] sm:$0xff] %v716_v56   ;;  %v367_v62 = vsel %vm303_vm3, %v271_v48, %v335_v57  ;;  %v274_v63 = vadd.f32 %v828_v1, %v235_v53  ;;  %v275_v2 = vadd.f32 %v828_v1, %v236_v54  ;;  %v237_v3 = vmul.f32 %v818_v0, %v198_v55 }
  0x2e   : > { %v721_v5 = vpack.c.bf16 %v367_v62, %v366_v58  ;;  %v368_v6 = vsel %vm304_vm4, %v272_v50, %v336_v60  ;;  %v369_v7 = vsel %vm305_vm5, %v273_v52, %v337_v61  ;;  %v238_v8 = vmul.f32 %v818_v0, %v199_v59 }
  0x2f   : > { %v726_v12 = vpack.c.bf16 %v369_v7, %v368_v6  ;;  %vm306_vm6 = vcmp.gt.f32.partialorder %v274_v63, 0.0  ;;  %vm307_vm7 = vcmp.gt.f32.partialorder %v275_v2, 0.0  ;;  %v338_v13 = vmul.f32 0.01, %v274_v63 }
  0x30   : > { %761 = vst [vmem:[%s856_s26 + $0x48] sm:$0xff] %v721_v5   ;;  %v339_v14 = vmul.f32 0.01, %v275_v2  ;;  %v276_v15 = vadd.f32 %v828_v1, %v237_v3  ;;  %v277_v16 = vadd.f32 %v828_v1, %v238_v8  ;;  %v239_v17 = vmul.f32 %v818_v0, %v200_v4 }
  0x31   : > { %762 = vst [vmem:[%s856_s26 + $0x50] sm:$0xff] %v726_v12   ;;  %v370_v18 = vsel %vm306_vm6, %v274_v63, %v338_v13  ;;  %v240_v19 = vmul.f32 %v818_v0, %v201_v9  ;;  %v241_v20 = vmul.f32 %v818_v0, %v202_v10  ;;  %v242_v21 = vmul.f32 %v818_v0, %v203_v11 }
  0x32   : > { %v371_v23 = vsel %vm307_vm7, %v275_v2, %v339_v14  ;;  %vm308_vm8 = vcmp.gt.f32.partialorder %v276_v15, 0.0  ;;  %vm309_vm9 = vcmp.gt.f32.partialorder %v277_v16, 0.0  ;;  %v340_v24 = vmul.f32 0.01, %v276_v15 }
  0x33   : > { %v731_v25 = vpack.c.bf16 %v371_v23, %v370_v18  ;;  %v341_v26 = vmul.f32 0.01, %v277_v16  ;;  %v278_v27 = vadd.f32 %v828_v1, %v239_v17  ;;  %v279_v28 = vadd.f32 %v828_v1, %v240_v19 }
  0x34   : > { %v372_v29 = vsel %vm308_vm8, %v276_v15, %v340_v24  ;;  %v280_v30 = vadd.f32 %v828_v1, %v241_v20  ;;  %v281_v31 = vadd.f32 %v828_v1, %v242_v21  ;;  %v243_v33 = vmul.f32 %v818_v0, %v204_v22 }
  0x35   : > { %763 = vst [vmem:[%s856_s26 + $0x58] sm:$0xff] %v731_v25   ;;  %v373_v34 = vsel %vm309_vm9, %v277_v16, %v341_v26  ;;  %vm310_vm10 = vcmp.gt.f32.partialorder %v278_v27, 0.0  ;;  %vm311_vm11 = vcmp.gt.f32.partialorder %v279_v28, 0.0  ;;  %v342_v35 = vmul.f32 0.01, %v278_v27 }
  0x36   : > { %v736_v36 = vpack.c.bf16 %v373_v34, %v372_v29  ;;  %v343_v37 = vmul.f32 0.01, %v279_v28  ;;  %vm312_vm12 = vcmp.gt.f32.partialorder %v280_v30, 0.0  ;;  %vm313_vm13 = vcmp.gt.f32.partialorder %v281_v31, 0.0 }
  0x37   : > { %v374_v38 = vsel %vm310_vm10, %v278_v27, %v342_v35  ;;  %v344_v39 = vmul.f32 0.01, %v280_v30  ;;  %v345_v40 = vmul.f32 0.01, %v281_v31  ;;  %v244_v41 = vmul.f32 %v818_v0, %v205_v32 }
  0x38   : > { %764 = vst [vmem:[%s856_s26 + $0x60] sm:$0xff] %v736_v36   ;;  %v375_v42 = vsel %vm311_vm11, %v279_v28, %v343_v37  ;;  %v282_v43 = vadd.f32 %v828_v1, %v243_v33 }
  0x39   : > { %v741_v44 = vpack.c.bf16 %v375_v42, %v374_v38  ;;  %v376_v45 = vsel %vm312_vm12, %v280_v30, %v344_v39  ;;  %v377_v46 = vsel %vm313_vm13, %v281_v31, %v345_v40  ;;  %v283_v47 = vadd.f32 %v828_v1, %v244_v41 }
  0x3a   : > { %v746_v48 = vpack.c.bf16 %v377_v46, %v376_v45  ;;  %vm314_vm14 = vcmp.gt.f32.partialorder %v282_v43, 0.0  ;;  %v346_v49 = vmul.f32 0.01, %v282_v43 }
  0x3b   : > { %765 = vst [vmem:[%s856_s26 + $0x68] sm:$0xff] %v741_v44   ;;  %vm315_vm15 = vcmp.gt.f32.partialorder %v283_v47, 0.0  ;;  %v347_v50 = vmul.f32 0.01, %v283_v47 }
  0x3c   : > { %766 = vst [vmem:[%s856_s26 + $0x70] sm:$0xff] %v746_v48   ;;  %v378_v51 = vsel %vm314_vm14, %v282_v43, %v346_v49 }
  0x3d   : > { %v379_v52 = vsel %vm315_vm15, %v283_v47, %v347_v50 }
  0x3e   : > { %v751_v0 = vpack.c.bf16 %v379_v52, %v378_v51 }
  0x40   : > { %767 = vst [vmem:[%s856_s26 + $0x78] sm:$0xff] %v751_v0  }
  0x41 PF: > { %s13_s12 = sadd.s32 1, %s782_s12  }
  0x42   : > { %p10_p4 = scmp.ge.s32.totalorder %s13_s12, 4  }
  0x44   :  { %12 = sbr.rel (!%p10_p4) target bundleno = 1 (0x1), region = 62 }

// kernel: res_block_forward.7
= control target key start
LH: loop header
LB: loop body
LE: loop exit
PB: predicated region body
PF: predicated region fallthrough
CT: control target
= control target key end

     0   :  { %s649_s15 = smov 0   ;;  %s854_s0 = inlined_call_operand.vmem [shape: f32[512,128], index: 0, kind: input, shape index: {}]   ;;  %s855_s1 = inlined_call_operand.vmem [shape: f32[1,128], index: 1, kind: input, shape index: {}]   ;;  %s856_s2 = inlined_call_operand.vmem [shape: f32[1,128], index: 2, kind: input, shape index: {}]   ;;  %s857_s3 = inlined_call_operand.vmem [shape: f32[512,128], index: 3, kind: input, shape index: {}]   ;;  %s858_s4 = inlined_call_operand.vmem [shape: f32[512,128], index: 4, kind: output, shape index: {}]  }
   0x1 LB: > { %s593_s16 = sadd.s32 4294967295, %s622_s15   ;;  %p597_p0 = scmp.ge.s32.totalorder %s622_s15, 1  ;;  %s622_s15 = sphi %s649_s15, %s14_s15  }
   0x2   : > { %p174_p1 = scmp.lt.s32.totalorder %s622_s15, 3 }
   0x4   : > { %p175_p2 = pnand %p597_p0, %p174_p1 }
   0x5   : > { %s598_s17 = sshll.u32 (!%p175_p2), %s593_s16, 5 }
   0x6   : > { %178 = sbr.rel (%p175_p2) target bundleno = 70 (0x46), region = 36  ;;  %p206_p3 = scmp.lt.s32.totalorder (!%p175_p2), %s598_s17, 63 }
   0xb   : > { %s860_s17 = smov (!%p206_p3, %s598_s17), 63  ;;  %v662_v0 = vld [vmem:[%s855_s1] ss:$0 sm:$0xff] }
   0xc   : > { %s657_s18 = sshll.u32 %s860_s17, 3  ;;  %v674_v2 = vld [vmem:[%s856_s2] ss:$0 sm:$0xff] }
   0xd   : > { %s668_s23 = scalar_lea.vmem %s854_s0, %s657_s18  ;;  %s681_s28 = scalar_lea.vmem %s857_s3, %s657_s18 }
   0xe   : > { %v223_v1 = vld [vmem:[%s668_s23] sm:$0xff]  ;;  %v224_v3 = vld [vmem:[%s668_s23 + $0x8] sm:$0xff]  ;;  %v225_v6 = vld [vmem:[%s668_s23 + $0x10] sm:$0xff]  ;;  %s706_s5 = scalar_lea.vmem %s858_s4, %s657_s18 }
   0xf   : > { %v262_v4 = vmul.f32 %v662_v0, %v223_v1  ;;  %v263_v5 = vmul.f32 %v662_v0, %v224_v3  ;;  %v264_v7 = vmul.f32 %v662_v0, %v225_v6  ;;  %v226_v8 = vld [vmem:[%s668_s23 + $0x18] sm:$0xff]  ;;  %v227_v9 = vld [vmem:[%s668_s23 + $0x20] sm:$0xff]  ;;  %v228_v14 = vld [vmem:[%s668_s23 + $0x28] sm:$0xff] }
  0x10   : > { %v265_v12 = vmul.f32 %v662_v0, %v226_v8  ;;  %v266_v13 = vmul.f32 %v662_v0, %v227_v9  ;;  %v429_v15 = vld [vmem:[%s681_s28] sm:$0xff]  ;;  %v430_v16 = vld [vmem:[%s681_s28 + $0x8] sm:$0xff]  ;;  %v267_v18 = vmul.f32 %v662_v0, %v228_v14  ;;  %v229_v19 = vld [vmem:[%s668_s23 + $0x30] sm:$0xff] }
  0x11   : > { %v301_v10 = vadd.f32 %v674_v2, %v262_v4  ;;  %v302_v11 = vadd.f32 %v674_v2, %v263_v5  ;;  %v303_v17 = vadd.f32 %v674_v2, %v264_v7  ;;  %v431_v23 = vld [vmem:[%s681_s28 + $0x10] sm:$0xff]  ;;  %v268_v29 = vmul.f32 %v662_v0, %v229_v19  ;;  %v230_v30 = vld [vmem:[%s668_s23 + $0x38] sm:$0xff]  ;;  %v231_v35 = vld [vmem:[%s668_s23 + $0x40] sm:$0xff] }
  0x12   : > { %v304_v24 = vadd.f32 %v674_v2, %v265_v12  ;;  %v305_v25 = vadd.f32 %v674_v2, %v266_v13  ;;  %v306_v28 = vadd.f32 %v674_v2, %v267_v18  ;;  %v432_v34 = vld [vmem:[%s681_s28 + $0x18] sm:$0xff]  ;;  %v232_v36 = vld [vmem:[%s668_s23 + $0x48] sm:$0xff]  ;;  %v433_v40 = vld [vmem:[%s681_s28 + $0x20] sm:$0xff]  ;;  %v269_v44 = vmul.f32 %v662_v0, %v230_v30 }
  0x13   : > { %vm333_vm0 = vcmp.gt.f32.partialorder %v301_v10, 0.0  ;;  %v365_v20 = vmul.f32 0.01, %v301_v10  ;;  %vm334_vm1 = vcmp.gt.f32.partialorder %v302_v11, 0.0  ;;  %v366_v21 = vmul.f32 0.01, %v302_v11 }
  0x14   : > { %vm335_vm2 = vcmp.gt.f32.partialorder %v303_v17, 0.0  ;;  %v367_v22 = vmul.f32 0.01, %v303_v17  ;;  %vm336_vm3 = vcmp.gt.f32.partialorder %v304_v24, 0.0  ;;  %v368_v38 = vmul.f32 0.01, %v304_v24 }
  0x15   : > { %v397_v26 = vsel %vm333_vm0, %v301_v10, %v365_v20  ;;  %v398_v27 = vsel %vm334_vm1, %v302_v11, %v366_v21  ;;  %vm337_vm4 = vcmp.gt.f32.partialorder %v305_v25, 0.0  ;;  %v369_v39 = vmul.f32 0.01, %v305_v25  ;;  %v434_v42 = vld [vmem:[%s681_s28 + $0x28] sm:$0xff]  ;;  %v233_v49 = vld [vmem:[%s668_s23 + $0x50] sm:$0xff]  ;;  %v234_v50 = vld [vmem:[%s668_s23 + $0x58] sm:$0xff] }
  0x16   : > { %v461_v31 = vadd.f32 %v429_v15, %v397_v26  ;;  %v462_v32 = vadd.f32 %v430_v16, %v398_v27  ;;  %v399_v33 = vsel %vm335_vm2, %v303_v17, %v367_v22  ;;  %vm338_vm5 = vcmp.gt.f32.partialorder %v306_v28, 0.0  ;;  %v235_v51 = vld [vmem:[%s668_s23 + $0x60] sm:$0xff]  ;;  %v435_v57 = vld [vmem:[%s681_s28 + $0x30] sm:$0xff]  ;;  %v436_v60 = vld [vmem:[%s681_s28 + $0x38] sm:$0xff] }
  0x17   : > { %v463_v37 = vadd.f32 %v431_v23, %v399_v33  ;;  %v370_v41 = vmul.f32 0.01, %v306_v28  ;;  %v307_v43 = vadd.f32 %v674_v2, %v268_v29  ;;  %v400_v45 = vsel %vm336_vm3, %v304_v24, %v368_v38  ;;  %v437_v5 = vld [vmem:[%s681_s28 + $0x40] sm:$0xff]  ;;  %v236_v6 = vld [vmem:[%s668_s23 + $0x68] sm:$0xff]  ;;  %v439_v18 = vld [vmem:[%s681_s28 + $0x50] sm:$0xff] }
  0x18   : > { %493 = vst [vmem:[%s706_s5] sm:$0xff] %v461_v31  ;;  %494 = vst [vmem:[%s706_s5 + $0x8] sm:$0xff] %v462_v32  ;;  %v401_v46 = vsel %vm337_vm4, %v305_v25, %v369_v39  ;;  %v270_v47 = vmul.f32 %v662_v0, %v231_v35  ;;  %v271_v48 = vmul.f32 %v662_v0, %v232_v36  ;;  %v438_v10 = vld [vmem:[%s681_s28 + $0x48] sm:$0xff]  ;;  %v237_v20 = vld [vmem:[%s668_s23 + $0x70] sm:$0xff] }
  0x19   : > { %495 = vst [vmem:[%s706_s5 + $0x10] sm:$0xff] %v463_v37  ;;  %v464_v52 = vadd.f32 %v432_v34, %v400_v45  ;;  %v465_v53 = vadd.f32 %v433_v40, %v401_v46  ;;  %v402_v54 = vsel %vm338_vm5, %v306_v28, %v370_v41  ;;  %vm339_vm6 = vcmp.gt.f32.partialorder %v307_v43, 0.0  ;;  %v238_v21 = vld [vmem:[%s668_s23 + $0x78] sm:$0xff]  ;;  %v441_v26 = vld [vmem:[%s681_s28 + $0x60] sm:$0xff]  ;;  %v240_v34 = vld [vmem:[%s668_s23 + $0x88] sm:$0xff] }
  0x1a   : > { %v466_v55 = vadd.f32 %v434_v42, %v402_v54  ;;  %v371_v56 = vmul.f32 0.01, %v307_v43  ;;  %v308_v58 = vadd.f32 %v674_v2, %v269_v44  ;;  %v309_v59 = vadd.f32 %v674_v2, %v270_v47  ;;  %v440_v25 = vld [vmem:[%s681_s28 + $0x58] sm:$0xff]  ;;  %v239_v27 = vld [vmem:[%s668_s23 + $0x80] sm:$0xff]  ;;  %v241_v39 = vld [vmem:[%s668_s23 + $0x90] sm:$0xff] }
  0x1b   : > { %496 = vst [vmem:[%s706_s5 + $0x18] sm:$0xff] %v464_v52  ;;  %497 = vst [vmem:[%s706_s5 + $0x20] sm:$0xff] %v465_v53  ;;  %v310_v61 = vadd.f32 %v674_v2, %v271_v48  ;;  %v272_v62 = vmul.f32 %v662_v0, %v233_v49  ;;  %v273_v63 = vmul.f32 %v662_v0, %v234_v50  ;;  %v242_v40 = vld [vmem:[%s668_s23 + $0x98] sm:$0xff]  ;;  %v243_v41 = vld [vmem:[%s668_s23 + $0xa0] sm:$0xff] }
  0x1c   : > { %v274_v1 = vmul.f32 %v662_v0, %v235_v51  ;;  %498 = vst [vmem:[%s706_s5 + $0x28] sm:$0xff] %v466_v55  ;;  %v403_v3 = vsel %vm339_vm6, %v307_v43, %v371_v56  ;;  %vm340_vm7 = vcmp.gt.f32.partialorder %v308_v58, 0.0  ;;  %v372_v4 = vmul.f32 0.01, %v308_v58  ;;  %v442_v45 = vld [vmem:[%s681_s28 + $0x68] sm:$0xff]  ;;  %v443_v56 = vld [vmem:[%s681_s28 + $0x70] sm:$0xff] }
  0x1d   : > { %vm341_vm8 = vcmp.gt.f32.partialorder %v309_v59, 0.0  ;;  %v467_v7 = vadd.f32 %v435_v57, %v403_v3  ;;  %v373_v8 = vmul.f32 0.01, %v309_v59  ;;  %vm342_vm9 = vcmp.gt.f32.partialorder %v310_v61, 0.0  ;;  %v444_v57 = vld [vmem:[%s681_s28 + $0x78] sm:$0xff] }
  0x1e   : > { %v374_v9 = vmul.f32 0.01, %v310_v61  ;;  %v404_v11 = vsel %vm340_vm7, %v308_v58, %v372_v4  ;;  %v311_v12 = vadd.f32 %v674_v2, %v272_v62  ;;  %v312_v13 = vadd.f32 %v674_v2, %v273_v63 }
  0x1f   : > { %v313_v14 = vadd.f32 %v674_v2, %v274_v1  ;;  %499 = vst [vmem:[%s706_s5 + $0x30] sm:$0xff] %v467_v7  ;;  %v468_v15 = vadd.f32 %v436_v60, %v404_v11  ;;  %v405_v16 = vsel %vm341_vm8, %v309_v59, %v373_v8  ;;  %v275_v19 = vmul.f32 %v662_v0, %v236_v6  ;;  %v445_v60 = vld [vmem:[%s681_s28 + $0x80] sm:$0xff]  ;;  %v446_v7 = vld [vmem:[%s681_s28 + $0x88] sm:$0xff] }
  0x20   : > { %v406_v17 = vsel %vm342_vm9, %v310_v61, %v374_v9  ;;  %v469_v22 = vadd.f32 %v437_v5, %v405_v16  ;;  %vm343_vm10 = vcmp.gt.f32.partialorder %v311_v12, 0.0  ;;  %v375_v24 = vmul.f32 0.01, %v311_v12  ;;  %v244_v8 = vld [vmem:[%s668_s23 + $0xa8] sm:$0xff]  ;;  %v245_v9 = vld [vmem:[%s668_s23 + $0xb0] sm:$0xff] }
  0x21   : > { %v470_v23 = vadd.f32 %v438_v10, %v406_v17  ;;  %500 = vst [vmem:[%s706_s5 + $0x38] sm:$0xff] %v468_v15  ;;  %vm344_vm11 = vcmp.gt.f32.partialorder %v312_v13, 0.0  ;;  %v376_v28 = vmul.f32 0.01, %v312_v13  ;;  %vm345_vm12 = vcmp.gt.f32.partialorder %v313_v14, 0.0  ;;  %v246_v15 = vld [vmem:[%s668_s23 + $0xb8] sm:$0xff] }
  0x22   : > { %v377_v29 = vmul.f32 0.01, %v313_v14  ;;  %501 = vst [vmem:[%s706_s5 + $0x40] sm:$0xff] %v469_v22  ;;  %v407_v30 = vsel %vm343_vm10, %v311_v12, %v375_v24  ;;  %v314_v31 = vadd.f32 %v674_v2, %v275_v19  ;;  %v276_v32 = vmul.f32 %v662_v0, %v237_v20  ;;  %v449_v20 = vld [vmem:[%s681_s28 + $0xa0] sm:$0xff] }
  0x23   : > { %502 = vst [vmem:[%s706_s5 + $0x48] sm:$0xff] %v470_v23  ;;  %v277_v33 = vmul.f32 %v662_v0, %v238_v21  ;;  %v471_v35 = vadd.f32 %v439_v18, %v407_v30  ;;  %v408_v36 = vsel %vm344_vm11, %v312_v13, %v376_v28  ;;  %v278_v38 = vmul.f32 %v662_v0, %v239_v27  ;;  %v447_v13 = vld [vmem:[%s681_s28 + $0x90] sm:$0xff]  ;;  %v247_v23 = vld [vmem:[%s668_s23 + $0xc0] sm:$0xff]  ;;  %v248_v28 = vld [vmem:[%s668_s23 + $0xc8] sm:$0xff] }
  0x24   : > { %v409_v37 = vsel %vm345_vm12, %v313_v14, %v377_v29  ;;  %v472_v42 = vadd.f32 %v440_v25, %v408_v36  ;;  %vm346_vm13 = vcmp.gt.f32.partialorder %v314_v31, 0.0  ;;  %v378_v44 = vmul.f32 0.01, %v314_v31  ;;  %v448_v14 = vld [vmem:[%s681_s28 + $0x98] sm:$0xff]  ;;  %v249_v29 = vld [vmem:[%s668_s23 + $0xd0] sm:$0xff] }
  0x25   : > { %v473_v43 = vadd.f32 %v441_v26, %v409_v37  ;;  %503 = vst [vmem:[%s706_s5 + $0x50] sm:$0xff] %v471_v35  ;;  %v315_v46 = vadd.f32 %v674_v2, %v276_v32  ;;  %v316_v47 = vadd.f32 %v674_v2, %v277_v33  ;;  %v317_v48 = vadd.f32 %v674_v2, %v278_v38  ;;  %v450_v35 = vld [vmem:[%s681_s28 + $0xa8] sm:$0xff] }
  0x26   : > { %v279_v49 = vmul.f32 %v662_v0, %v240_v34  ;;  %504 = vst [vmem:[%s706_s5 + $0x58] sm:$0xff] %v472_v42  ;;  %v410_v50 = vsel %vm346_vm13, %v314_v31, %v378_v44  ;;  %v280_v51 = vmul.f32 %v662_v0, %v241_v39  ;;  %v281_v52 = vmul.f32 %v662_v0, %v242_v40  ;;  %v451_v40 = vld [vmem:[%s681_s28 + $0xb0] sm:$0xff]  ;;  %v250_v44 = vld [vmem:[%s668_s23 + $0xd8] sm:$0xff] }
  0x27   : > { %505 = vst [vmem:[%s706_s5 + $0x60] sm:$0xff] %v473_v43  ;;  %v282_v53 = vmul.f32 %v662_v0, %v243_v41  ;;  %v474_v54 = vadd.f32 %v442_v45, %v410_v50  ;;  %vm347_vm14 = vcmp.gt.f32.partialorder %v315_v46, 0.0  ;;  %v379_v55 = vmul.f32 0.01, %v315_v46  ;;  %v452_v41 = vld [vmem:[%s681_s28 + $0xb8] sm:$0xff] }
  0x28   : > { %vm348_vm15 = vcmp.gt.f32.partialorder %v316_v47, 0.0  ;;  %v380_v58 = vmul.f32 0.01, %v316_v47  ;;  %vm349_vm0 = vcmp.gt.f32.partialorder %v317_v48, 0.0  ;;  %v381_v59 = vmul.f32 0.01, %v317_v48 }
  0x29   : > { %v318_v61 = vadd.f32 %v674_v2, %v279_v49  ;;  %506 = vst [vmem:[%s706_s5 + $0x68] sm:$0xff] %v474_v54  ;;  %v411_v62 = vsel %vm347_vm14, %v315_v46, %v379_v55  ;;  %v319_v63 = vadd.f32 %v674_v2, %v280_v51  ;;  %v320_v1 = vadd.f32 %v674_v2, %v281_v52  ;;  %v453_v54 = vld [vmem:[%s681_s28 + $0xc0] sm:$0xff] }
  0x2a   : > { %v321_v3 = vadd.f32 %v674_v2, %v282_v53  ;;  %v475_v4 = vadd.f32 %v443_v56, %v411_v62  ;;  %v412_v5 = vsel %vm348_vm15, %v316_v47, %v380_v58  ;;  %v413_v6 = vsel %vm349_vm0, %v317_v48, %v381_v59  ;;  %v251_v56 = vld [vmem:[%s668_s23 + $0xe0] sm:$0xff]  ;;  %v455_v62 = vld [vmem:[%s681_s28 + $0xd0] sm:$0xff] }
  0x2b   : > { %vm350_vm1 = vcmp.gt.f32.partialorder %v318_v61, 0.0  ;;  %v476_v10 = vadd.f32 %v444_v57, %v412_v5  ;;  %v477_v11 = vadd.f32 %v445_v60, %v413_v6  ;;  %v382_v12 = vmul.f32 0.01, %v318_v61  ;;  %v252_v57 = vld [vmem:[%s668_s23 + $0xe8] sm:$0xff] }
  0x2c   : > { %vm351_vm2 = vcmp.gt.f32.partialorder %v319_v63, 0.0  ;;  %507 = vst [vmem:[%s706_s5 + $0x70] sm:$0xff] %v475_v4  ;;  %v383_v16 = vmul.f32 0.01, %v319_v63  ;;  %vm352_vm3 = vcmp.gt.f32.partialorder %v320_v1, 0.0  ;;  %vm353_vm4 = vcmp.gt.f32.partialorder %v321_v3, 0.0 }
  0x2d   : > { %v384_v17 = vmul.f32 0.01, %v320_v1  ;;  %508 = vst [vmem:[%s706_s5 + $0x78] sm:$0xff] %v476_v10  ;;  %509 = vst [vmem:[%s706_s5 + $0x80] sm:$0xff] %v477_v11  ;;  %v414_v18 = vsel %vm350_vm1, %v318_v61, %v382_v12  ;;  %v385_v19 = vmul.f32 0.01, %v321_v3  ;;  %v283_v21 = vmul.f32 %v662_v0, %v244_v8 }
  0x2e   : > { %v284_v22 = vmul.f32 %v662_v0, %v245_v9  ;;  %v478_v24 = vadd.f32 %v446_v7, %v414_v18  ;;  %v415_v25 = vsel %vm351_vm2, %v319_v63, %v383_v16  ;;  %v285_v27 = vmul.f32 %v662_v0, %v246_v15  ;;  %v454_v61 = vld [vmem:[%s681_s28 + $0xc8] sm:$0xff]  ;;  %v253_v63 = vld [vmem:[%s668_s23 + $0xf0] sm:$0xff]  ;;  %v254_v8 = vld [vmem:[%s668_s23 + $0xf8] sm:$0xff] }
  0x2f   : > { %v416_v26 = vsel %vm352_vm3, %v320_v1, %v384_v17  ;;  %v479_v30 = vadd.f32 %v447_v13, %v415_v25  ;;  %v417_v32 = vsel %vm353_vm4, %v321_v3, %v385_v19  ;;  %v322_v33 = vadd.f32 %v674_v2, %v283_v21  ;;  %v456_v16 = vld [vmem:[%s681_s28 + $0xd8] sm:$0xff]  ;;  %v458_v25 = vld [vmem:[%s681_s28 + $0xe8] sm:$0xff] }
  0x30   : > { %v480_v31 = vadd.f32 %v448_v14, %v416_v26  ;;  %510 = vst [vmem:[%s706_s5 + $0x88] sm:$0xff] %v478_v24  ;;  %v481_v34 = vadd.f32 %v449_v20, %v417_v32  ;;  %v323_v36 = vadd.f32 %v674_v2, %v284_v22  ;;  %v324_v37 = vadd.f32 %v674_v2, %v285_v27  ;;  %v457_v24 = vld [vmem:[%s681_s28 + $0xe0] sm:$0xff] }
  0x31   : > { %v286_v38 = vmul.f32 %v662_v0, %v247_v23  ;;  %511 = vst [vmem:[%s706_s5 + $0x90] sm:$0xff] %v479_v30  ;;  %vm354_vm5 = vcmp.gt.f32.partialorder %v322_v33, 0.0  ;;  %v386_v39 = vmul.f32 0.01, %v322_v33  ;;  %v287_v42 = vmul.f32 %v662_v0, %v248_v28  ;;  %v459_v28 = vld [vmem:[%s681_s28 + $0xf0] sm:$0xff] }
  0x32   : > { %512 = vst [vmem:[%s706_s5 + $0x98] sm:$0xff] %v480_v31  ;;  %v288_v43 = vmul.f32 %v662_v0, %v249_v29  ;;  %513 = vst [vmem:[%s706_s5 + $0xa0] sm:$0xff] %v481_v34  ;;  %vm355_vm6 = vcmp.gt.f32.partialorder %v323_v36, 0.0  ;;  %v387_v45 = vmul.f32 0.01, %v323_v36  ;;  %vm356_vm7 = vcmp.gt.f32.partialorder %v324_v37, 0.0 }
  0x33   : > { %v388_v46 = vmul.f32 0.01, %v324_v37  ;;  %v418_v47 = vsel %vm354_vm5, %v322_v33, %v386_v39  ;;  %v325_v48 = vadd.f32 %v674_v2, %v286_v38  ;;  %v326_v49 = vadd.f32 %v674_v2, %v287_v42 }
  0x34   : > { %v327_v50 = vadd.f32 %v674_v2, %v288_v43  ;;  %v482_v51 = vadd.f32 %v450_v35, %v418_v47  ;;  %v419_v52 = vsel %vm355_vm6, %v323_v36, %v387_v45  ;;  %v289_v55 = vmul.f32 %v662_v0, %v250_v44  ;;  %v460_v36 = vld [vmem:[%s681_s28 + $0xf8] sm:$0xff] }
  0x35   : > { %v420_v53 = vsel %vm356_vm7, %v324_v37, %v388_v46  ;;  %v483_v58 = vadd.f32 %v451_v40, %v419_v52  ;;  %vm357_vm8 = vcmp.gt.f32.partialorder %v325_v48, 0.0  ;;  %v389_v60 = vmul.f32 0.01, %v325_v48 }
  0x36   : > { %v484_v59 = vadd.f32 %v452_v41, %v420_v53  ;;  %514 = vst [vmem:[%s706_s5 + $0xa8] sm:$0xff] %v482_v51  ;;  %vm358_vm9 = vcmp.gt.f32.partialorder %v326_v49, 0.0  ;;  %v390_v1 = vmul.f32 0.01, %v326_v49  ;;  %vm359_vm10 = vcmp.gt.f32.partialorder %v327_v50, 0.0 }
  0x37   : > { %v391_v3 = vmul.f32 0.01, %v327_v50  ;;  %515 = vst [vmem:[%s706_s5 + $0xb0] sm:$0xff] %v483_v58  ;;  %v421_v4 = vsel %vm357_vm8, %v325_v48, %v389_v60  ;;  %v328_v5 = vadd.f32 %v674_v2, %v289_v55  ;;  %v290_v6 = vmul.f32 %v662_v0, %v251_v56 }
  0x38   : > { %516 = vst [vmem:[%s706_s5 + $0xb8] sm:$0xff] %v484_v59  ;;  %v291_v7 = vmul.f32 %v662_v0, %v252_v57  ;;  %v485_v9 = vadd.f32 %v453_v54, %v421_v4  ;;  %v422_v10 = vsel %vm358_vm9, %v326_v49, %v390_v1  ;;  %v292_v12 = vmul.f32 %v662_v0, %v253_v63 }
  0x39   : > { %v423_v11 = vsel %vm359_vm10, %v327_v50, %v391_v3  ;;  %v486_v13 = vadd.f32 %v454_v61, %v422_v10  ;;  %vm360_vm11 = vcmp.gt.f32.partialorder %v328_v5, 0.0  ;;  %v392_v15 = vmul.f32 0.01, %v328_v5 }
  0x3a   : > { %v487_v14 = vadd.f32 %v455_v62, %v423_v11  ;;  %517 = vst [vmem:[%s706_s5 + $0xc0] sm:$0xff] %v485_v9  ;;  %v329_v17 = vadd.f32 %v674_v2, %v290_v6  ;;  %v330_v18 = vadd.f32 %v674_v2, %v291_v7  ;;  %v331_v19 = vadd.f32 %v674_v2, %v292_v12 }
  0x3b   : > { %v293_v20 = vmul.f32 %v662_v0, %v254_v8  ;;  %518 = vst [vmem:[%s706_s5 + $0xc8] sm:$0xff] %v486_v13  ;;  %v424_v21 = vsel %vm360_vm11, %v328_v5, %v392_v15 }
  0x3c   : > { %519 = vst [vmem:[%s706_s5 + $0xd0] sm:$0xff] %v487_v14  ;;  %v488_v22 = vadd.f32 %v456_v16, %v424_v21  ;;  %vm361_vm12 = vcmp.gt.f32.partialorder %v329_v17, 0.0  ;;  %v393_v23 = vmul.f32 0.01, %v329_v17  ;;  %vm362_vm13 = vcmp.gt.f32.partialorder %v330_v18, 0.0 }
  0x3d   : > { %v394_v26 = vmul.f32 0.01, %v330_v18  ;;  %vm363_vm14 = vcmp.gt.f32.partialorder %v331_v19, 0.0  ;;  %v395_v27 = vmul.f32 0.01, %v331_v19  ;;  %v332_v29 = vadd.f32 %v674_v2, %v293_v20 }
  0x3e   : > { %520 = vst [vmem:[%s706_s5 + $0xd8] sm:$0xff] %v488_v22  ;;  %v425_v0 = vsel %vm361_vm12, %v329_v17, %v393_v23 }
  0x3f   : > { %v489_v30 = vadd.f32 %v457_v24, %v425_v0  ;;  %v426_v31 = vsel %vm362_vm13, %v330_v18, %v394_v26  ;;  %v427_v32 = vsel %vm363_vm14, %v331_v19, %v395_v27  ;;  %vm364_vm15 = vcmp.gt.f32.partialorder %v332_v29, 0.0 }
  0x40   : > { %v490_v33 = vadd.f32 %v458_v25, %v426_v31  ;;  %v491_v34 = vadd.f32 %v459_v28, %v427_v32  ;;  %v396_v35 = vmul.f32 0.01, %v332_v29 }
  0x41   : > { %521 = vst [vmem:[%s706_s5 + $0xe0] sm:$0xff] %v489_v30 }
  0x42   : > { %522 = vst [vmem:[%s706_s5 + $0xe8] sm:$0xff] %v490_v33  ;;  %523 = vst [vmem:[%s706_s5 + $0xf0] sm:$0xff] %v491_v34  ;;  %v428_v37 = vsel %vm364_vm15, %v332_v29, %v396_v35 }
  0x43   : > { %v492_v38 = vadd.f32 %v460_v36, %v428_v37 }
  0x45   : > { %524 = vst [vmem:[%s706_s5 + $0xf8] sm:$0xff] %v492_v38 }
  0x46 PF: > { %s14_s15 = sadd.s32 1, %s622_s15  }
  0x47   : > { %p11_p4 = scmp.ge.s32.totalorder %s14_s15, 4  }
  0x49   :  { %13 = sbr.rel (!%p11_p4) target bundleno = 1 (0x1), region = 69 }

// kernel: res_block_forward.4
= control target key start
LH: loop header
LB: loop body
LE: loop exit
PB: predicated region body
PF: predicated region fallthrough
CT: control target
= control target key end

     0   :  { %s7716_s24 = smov 0   ;;  %s9669_s0 = inlined_call_operand.vmem [shape: bf16[32,18,128], index: 0, kind: input, shape index: {}]   ;;  %s9670_s1 = inlined_call_operand.vmem [shape: bf16[32,18,128], index: 1, kind: input, shape index: {}]   ;;  %s9671_s2 = inlined_call_operand.vmem [shape: bf16[32,18,128], index: 2, kind: input, shape index: {}]   ;;  %s9672_s3 = inlined_call_operand.vmem [shape: bf16[9,128,128], index: 3, kind: input, shape index: {}]   ;;  %s9673_s4 = inlined_call_operand.vmem [shape: f32[1,128], index: 4, kind: input, shape index: {}]   ;;  %s9674_s5 = inlined_call_operand.vmem [shape: f32[512,128], index: 5, kind: output, shape index: {0}]   ;;  %s9675_s6 = inlined_call_operand.vmem [shape: f32[1,128], index: 6, kind: output, shape index: {1}]   ;;  %s9676_s7 = inlined_call_operand.vmem [shape: f32[1,128], index: 7, kind: output, shape index: {2}]  }
   0x1 LB: > { %s7722_s25 = sadd.s32 4294967295, %s7673_s24   ;;  %p6466_p0 = scmp.ge.s32.totalorder %s7673_s24, 1  ;;  %s7673_s24 = sphi %s7716_s24, %s18_s24  }
   0x2   : > { %p258_p1 = scmp.lt.s32.totalorder %s7673_s24, 3 }
   0x4   : > { %p259_p2 = pnand %p6466_p0, %p258_p1 }
   0x6   : > { %262 = sbr.rel (%p259_p2) target bundleno = 620 (0x26c), region = 40 }
   0xb   : > { %s6467_s26 = sshll.u32 %s7722_s25, 4  ;;  %s6473_s27 = sshll.u32 %s7722_s25, 5 }
   0xc   : > { %p304_p3 = scmp.lt.s32.totalorder %s6467_s26, 31  ;;  %p325_p4 = scmp.lt.s32.totalorder %s6473_s27, 63 }
   0xd   : > { %p6475_p5 = scmp.ne.s32.totalorder %s7722_s25, 0 }
   0xe   : > { %s9730_s26 = smov (!%p304_p3, %s6467_s26), 31  ;;  %s9732_s27 = smov (!%p325_p4, %s6473_s27), 63 }
   0xf   : > { %s7536_s28 = smul.u32 12, %s9730_s26  ;;  %s6474_s29 = sshll.u32 %s9732_s27, 3 }
  0x10   : > { %s7746_s18 = scalar_lea.vmem %s9674_s5, %s6474_s29  ;;  %334 = sbr.rel (%p6475_p5) target bundleno = 23 (0x17), region = 44 }
  0x11   : > { %s7731_s9 = scalar_lea.vmem %s9669_s0, %s7536_s28  ;;  %s7736_s12 = scalar_lea.vmem %s9670_s1, %s7536_s28 }
  0x12   : > { %s7741_s15 = scalar_lea.vmem %s9671_s2, %s7536_s28 }
  0x15   : > { %v7675_v0 = vmov 0.0  }
  0x16   : > { %335 = vst [vmem:[%s9675_s6] sm:$0x1] %v7675_v0  ;;  %336 = vst [vmem:[%s9676_s7] sm:$0x1] %v7675_v0 }
  0x17 PF: > { %v7547_v1 = vld [vmem:[%s9672_s3 + $0x38] sm:$0xff]   ;;  %v7548_v2 = vld [vmem:[%s9672_s3 + $0x30] sm:$0xff]   ;;  %v7549_v3 = vld [vmem:[%s9672_s3 + $0x28] sm:$0xff]   ;;  %vm1735_vm0 = vcmask 1042432   ;;  %vm1736_vm1 = vcmask 1046532  }
  0x18   : > { %7520 = vmatprep.subr.bf16.mxu1 %v7547_v1  ;;  %7088 = vmatprep.subr.bf16.mxu0 %v7547_v1  ;;  %v7550_v4 = vld [vmem:[%s9672_s3 + $0x20] sm:$0xff]   ;;  %v7551_v7 = vld [vmem:[%s9672_s3 + $0x18] sm:$0xff]   ;;  %v7552_v8 = vld [vmem:[%s9672_s3 + $0x10] sm:$0xff]   ;;  %vm866_vm2 = vsmask.f32 3328 }
  0x19   : > { %7528 = vmatpush3.bf16.msra.mxu1 %v7547_v1  ;;  %7089 = vmatpush3.bf16.msra.mxu0 %v7547_v1  ;;  %v7555_v5 = vld [vmem:[%s7731_s9 + $0x60] sm:$0xff]   ;;  %v7553_v9 = vld [vmem:[%s9672_s3 + $0x8] sm:$0xff]   ;;  %v7557_v11 = vld [vmem:[%s9672_s3 + $0x78] sm:$0xff]   ;;  %vm867_vm3 = vsmask.f32 7440 }
  0x1a   : > { %7521 = vmatprep.subr.bf16.mxu1 %v7548_v2  ;;  %7090 = vmatprep.subr.bf16.mxu0 %v7548_v2  ;;  %v7558_v6 = vld [vmem:[%s7731_s9] sm:$0xff]   ;;  %v7561_v12 = vld [vmem:[%s9672_s3 + $0xb8] sm:$0xff]   ;;  %v7556_v13 = vld [vmem:[%s7731_s9 + $0x6c] sm:$0xff]  }
  0x1b   : > { %7120 = vmatprep.mubr.bf16.mxu1 %v7555_v5  ;;  %7104 = vmatprep.mubr.bf16.mxu0 %v7558_v6  ;;  %v7554_v10 = vld [vmem:[%s9672_s3] sm:$0xff]   ;;  %v7559_v14 = vld [vmem:[%s9672_s3 + $0x70] sm:$0xff]   ;;  %v7562_v16 = vld [vmem:[%s7731_s9 + $0x78] sm:$0xff]  }
  0x1c   : > { %v7560_v15 = vld [vmem:[%s7731_s9 + $0xc] sm:$0xff]   ;;  %v7566_v18 = vld [vmem:[%s7731_s9 + $0x18] sm:$0xff]   ;;  %v7563_v20 = vld [vmem:[%s7731_s9 + $0x84] sm:$0xff]  }
  0x1d   : > { %7529 = vmatpush3.bf16.msra.mxu1 %v7548_v2  ;;  %7091 = vmatpush3.bf16.msra.mxu0 %v7548_v2  ;;  %v7565_v17 = vld [vmem:[%s9672_s3 + $0xb0] sm:$0xff]   ;;  %v7564_v19 = vld [vmem:[%s9672_s3 + $0x68] sm:$0xff]   ;;  %v7567_v23 = vld [vmem:[%s9672_s3 + $0x60] sm:$0xff]  }
  0x1e   : > { %7522 = vmatprep.subr.bf16.mxu1 %v7549_v3  ;;  %7092 = vmatprep.subr.bf16.mxu0 %v7549_v3  ;;  %v7569_v21 = vld [vmem:[%s9672_s3 + $0xa8] sm:$0xff]   ;;  %v7570_v24 = vld [vmem:[%s7731_s9 + $0x90] sm:$0xff]   ;;  %v7573_v25 = vld [vmem:[%s9672_s3 + $0xa0] sm:$0xff]  }
  0x1f   : > { %v7568_v22 = vld [vmem:[%s7731_s9 + $0x24] sm:$0xff]   ;;  %v818_v26 = vld [vmem:[%s7731_s9] sm:$0xf]  ;;  %v7574_v31 = vld [vmem:[%s7731_s9 + $0x30] sm:$0xff]  }
  0x20   : > { %v819_v27 = vld [vmem:[%s7731_s9 + $0x4] sm:$0xf]  ;;  %v820_v28 = vld [vmem:[%s7731_s9 + $0x8] sm:$0x1]  ;;  %v870_v29 = vshrl.u32 %v818_v26, 16  ;;  %v873_v30 = vshll.u32 %v818_v26, 16  ;;  %vm7829_vm4 = vmor %vm866_vm2, %vm867_vm3 }
  0x21   : > { %7530 = vmatpush3.bf16.msra.mxu1 %v7549_v3  ;;  %7093 = vmatpush3.bf16.msra.mxu0 %v7549_v3  ;;  %v879_v32 = vshll.u32 %v819_v27, 16  ;;  %v883_v33 = vshrl.u32 %v819_v27, 16  ;;  %v889_v34 = vshll.u32 %v820_v28, 16  ;;  %v821_v35 = vld [vmem:[%s7731_s9 + $0xc] sm:$0xf]  ;;  %v7572_v36 = vld [vmem:[%s9672_s3 + $0x58] sm:$0xff]   ;;  %vm7849_vm5 = vmor %vm1735_vm0, %vm1736_vm1 }
  0x22   : > { %7523 = vmatprep.subr.bf16.mxu1 %v7550_v4  ;;  %7094 = vmatprep.subr.bf16.mxu0 %v7550_v4  ;;  %v872_v37 = vrot.slane %v870_v29, 4  ;;  %v875_v38 = vrot.slane %v873_v30, 5  ;;  %v822_v39 = vld [vmem:[%s7731_s9 + $0x10] sm:$0xf]  ;;  %v823_v40 = vld [vmem:[%s7731_s9 + $0x14] sm:$0x1] }
  0x23   : > { %v881_v41 = vrot.slane %v879_v32, 5  ;;  %v885_v42 = vrot.slane %v883_v33, 4  ;;  %v891_v43 = vrot.slane %v889_v34, 5  ;;  %v894_v44 = vshrl.u32 %v821_v35, 16  ;;  %v7571_v45 = vld [vmem:[%s7731_s9 + $0x9c] sm:$0xff]   ;;  %v7836_v56 = vld [vmem:[%s9672_s3 + $0x50] sm:$0xff]  }
  0x24   : > { %v7576_v46 = vld [vmem:[%s7731_s9 + $0x3c] sm:$0xff]   ;;  %v876_v48 = vor.u32 %v875_v38, %v872_v37  ;;  %v897_v49 = vshll.u32 %v821_v35, 16  ;;  %v903_v50 = vshll.u32 %v822_v39, 16  ;;  %v907_v51 = vshrl.u32 %v822_v39, 16  ;;  %v7578_v57 = vld [vmem:[%s7731_s9 + $0xa8] sm:$0xff]   ;;  %v7581_v63 = vld [vmem:[%s9672_s3 + $0x90] sm:$0xff]  }
  0x25   : > { %7531 = vmatpush3.bf16.msra.mxu1 %v7550_v4  ;;  %7095 = vmatpush3.bf16.msra.mxu0 %v7550_v4  ;;  %v7577_v47 = vld [vmem:[%s9672_s3 + $0x98] sm:$0xff]   ;;  %v886_v53 = vor.u32 %v885_v42, %v881_v41  ;;  %v896_v54 = vrot.slane %v894_v44, 4  ;;  %v913_v55 = vshll.u32 %v823_v40, 16  ;;  %v1639_v62 = vld [vmem:[%s7731_s9] sm:$0xe]  ;;  %v7585_v30 = vld [vmem:[%s9672_s3 + $0x88] sm:$0xff]  }
  0x26   : > { %7524 = vmatprep.subr.bf16.mxu1 %v7551_v7  ;;  %7096 = vmatprep.subr.bf16.mxu0 %v7551_v7  ;;  %v877_v58 = vrot.slane %v876_v48, 4  ;;  %v899_v59 = vrot.slane %v897_v49, 5  ;;  %v905_v60 = vrot.slane %v903_v50, 5  ;;  %v909_v61 = vrot.slane %v907_v51, 4  ;;  %v1640_v2 = vld [vmem:[%s7731_s9 + $0x4] sm:$0xf] }
  0x27   : > { %v887_v0 = vrot.slane %v886_v53, 4  ;;  %v915_v1 = vrot.slane %v913_v55, 5  ;;  %v1641_v3 = vld [vmem:[%s7731_s9 + $0x8] sm:$0x1]  ;;  %v825_v26 = vld [vmem:[%s7731_s9 + $0x1c] sm:$0xf] }
  0x28   : > { %v882_v4 = vsel %vm7829_vm4, %v877_v58, %v881_v41  ;;  %v900_v5 = vor.u32 %v899_v59, %v896_v54  ;;  %v910_v6 = vor.u32 %v909_v61, %v905_v60  ;;  %v826_v27 = vld [vmem:[%s7731_s9 + $0x20] sm:$0x1]  ;;  %v7579_v28 = vld [vmem:[%s7731_s9 + $0xb4] sm:$0xff]   ;;  %v827_v35 = vld [vmem:[%s7731_s9 + $0x24] sm:$0xf]  ;;  %v927_v44 = vshll.u32 %v825_v26, 16 }
  0x29   : > { %7532 = vmatpush3.bf16.msra.mxu1 %v7551_v7  ;;  %7097 = vmatpush3.bf16.msra.mxu0 %v7551_v7  ;;  %v7584_v29 = vld [vmem:[%s7731_s9 + $0x54] sm:$0xff]   ;;  %v829_v41 = vld [vmem:[%s7731_s9 + $0x2c] sm:$0x1]  ;;  %v937_v50 = vshll.u32 %v826_v27, 16  ;;  %v942_v54 = vshrl.u32 %v827_v35, 16  ;;  %v945_v55 = vshll.u32 %v827_v35, 16 }
  0x2a   : > { %7525 = vmatprep.subr.bf16.mxu1 %v7552_v8  ;;  %7098 = vmatprep.subr.bf16.mxu0 %v7552_v8  ;;  %v929_v51 = vrot.slane %v927_v44, 5  ;;  %v831_v27 = vld [vmem:[%s7731_s9 + $0x34] sm:$0xf] }
  0x2b   : > { %v939_v59 = vrot.slane %v937_v50, 5 }
  0x2d   : > { %7533 = vmatpush3.bf16.msra.mxu1 %v7552_v8  ;;  %7099 = vmatpush3.bf16.msra.mxu0 %v7552_v8  ;;  %v6540_v8 = vrot.slane %v1639_v62, 9  ;;  %v1646_v62 = vld [vmem:[%s7731_s9 + $0x1c] sm:$0xf] }
  0x2e   : > { %7526 = vmatprep.subr.bf16.mxu1 %v7553_v9  ;;  %7100 = vmatprep.subr.bf16.mxu0 %v7553_v9 }
  0x31   : > { %7534 = vmatpush3.bf16.msra.mxu1 %v7553_v9  ;;  %7101 = vmatpush3.bf16.msra.mxu0 %v7553_v9  ;;  %v1642_v9 = vld [vmem:[%s7731_s9 + $0xc] sm:$0xe] }
  0x32   : > { %7527 = vmatprep.subr.bf16.mxu1 %v7554_v10  ;;  %7102 = vmatprep.subr.bf16.mxu0 %v7554_v10 }
  0x35   : > { %7535 = vmatpush3.bf16.msra.mxu1 %v7554_v10  ;;  %7103 = vmatpush3.bf16.msra.mxu0 %v7554_v10  ;;  %v1643_v10 = vld [vmem:[%s7731_s9 + $0x10] sm:$0xf] }
  0x36   : > { %7136 = vmatprep.subr.bf16.mxu1 %v7557_v11  ;;  %7184 = vmatprep.subr.bf16.mxu0 %v7561_v12 }
  0x38   : > { %7121 = vmatmul.mubr.bf16.vlgmr.msra.gmra.mxu1 %v7556_v13  ;;  %7105 = vmatmul.mubr.bf16.vlgmr.msra.gmra.mxu0 %v7560_v15  ;;  %v1740_v13 = vrot.slane %v1640_v2, 5  ;;  %v1644_v15 = vld [vmem:[%s7731_s9 + $0x14] sm:$0x1]  ;;  %v947_v2 = vrot.slane %v945_v55, 5  ;;  %v7590_v55 = vld [vmem:[%s9672_s3 + $0xe8] sm:$0xff]  }
  0x39   : > { %7137 = vmatpush3.bf16.msra.mxu1 %v7557_v11  ;;  %7185 = vmatpush3.bf16.msra.mxu0 %v7561_v12  ;;  %v7582_v11 = vld [vmem:[%s7731_s9 + $0x48] sm:$0xff]   ;;  %v892_v12 = vsel %vm7829_vm4, %v887_v0, %v891_v43 }
  0x3a   : > { %7138 = vmatprep.subr.bf16.mxu1 %v7559_v14  ;;  %7124 = vmatprep.mubr.bf16.mxu1 %v7562_v16  ;;  %v6541_v16 = vrot.slane %v1642_v9, 9 }
  0x3b   : > { %7186 = vmatprep.subr.bf16.mxu0 %v7565_v17  ;;  %7108 = vmatprep.mubr.bf16.mxu0 %v7566_v18  ;;  %v901_v18 = vrot.slane %v900_v5, 4 }
  0x3d   : > { %7139 = vmatpush3.bf16.msra.mxu1 %v7559_v14  ;;  %7187 = vmatpush3.bf16.msra.mxu0 %v7565_v17  ;;  %v1743_v14 = vrot.slane %v1641_v3, 5  ;;  %v7580_v17 = vld [vmem:[%s9672_s3 + $0x48] sm:$0xff]   ;;  %v961_v3 = vshll.u32 %v829_v41, 16  ;;  %v834_v41 = vld [vmem:[%s7731_s9 + $0x40] sm:$0xf] }
  0x3e   : > { %7140 = vmatprep.subr.bf16.mxu1 %v7564_v19  ;;  %7188 = vmatprep.subr.bf16.mxu0 %v7569_v21 }
  0x40   : > { %7125 = vmatmul.mubr.bf16.gmra.mxu1 %v7563_v20  ;;  %7109 = vmatmul.mubr.bf16.gmra.mxu0 %v7568_v22  ;;  %v1747_v20 = vrot.slane %v1643_v10, 5  ;;  %v7863_v22 = vcombine.low %v882_v4, %v892_v12  ;;  %v1647_v4 = vld [vmem:[%s7731_s9 + $0x20] sm:$0x1]  ;;  %v1648_v10 = vld [vmem:[%s7731_s9 + $0x24] sm:$0xe] }
  0x41   : > { %7141 = vmatpush3.bf16.msra.mxu1 %v7564_v19  ;;  %7189 = vmatpush3.bf16.msra.mxu0 %v7569_v21  ;;  %v911_v19 = vrot.slane %v910_v6, 4  ;;  %v824_v21 = vld [vmem:[%s7731_s9 + $0x18] sm:$0xf] }
  0x42   : > { %7142 = vmatprep.subr.bf16.mxu1 %v7567_v23  ;;  %7128 = vmatprep.mubr.bf16.mxu1 %v7570_v24  ;;  %v1742_v24 = vrot.slane %v1740_v13, 4  ;;  %v7883_v33 = vsel %vm7849_vm5, %v6541_v16, %v1747_v20  ;;  %v1749_v34 = vrot.slane %v1747_v20, 4  ;;  %v918_v39 = vshrl.u32 %v824_v21, 16  ;;  %v1649_v16 = vld [vmem:[%s7731_s9 + $0x28] sm:$0xf] }
  0x43   : > { %7190 = vmatprep.subr.bf16.mxu0 %v7573_v25  ;;  %7112 = vmatprep.mubr.bf16.mxu0 %v7574_v31  ;;  %v906_v31 = vsel %vm7829_vm4, %v901_v18, %v905_v60  ;;  %v916_v32 = vsel %vm7829_vm4, %v911_v19, %v915_v1  ;;  %v921_v40 = vshll.u32 %v824_v21, 16  ;;  %v944_v1 = vrot.slane %v942_v54, 4  ;;  %v1650_v20 = vld [vmem:[%s7731_s9 + $0x2c] sm:$0x1] }
  0x44   : > { %v7887_v37 = vcombine.low %v906_v31, %v916_v32  ;;  %v1744_v38 = vsel %vm7849_vm5, %v1742_v24, %v1743_v14  ;;  %v920_v48 = vrot.slane %v918_v39, 4  ;;  %v7589_v14 = vld [vmem:[%s9672_s3 + $0x138] sm:$0xff]   ;;  %v1757_v19 = vrot.slane %v1647_v4, 5 }
  0x45   : > { %7143 = vmatpush3.bf16.msra.mxu1 %v7567_v23  ;;  %7191 = vmatpush3.bf16.msra.mxu0 %v7573_v25  ;;  %v7867_v23 = vsel %vm7849_vm5, %v6540_v8, %v1740_v13  ;;  %v1750_v25 = vrot.slane %v1644_v15, 5  ;;  %v923_v49 = vrot.slane %v921_v40, 5  ;;  %v948_v12 = vor.u32 %v947_v2, %v944_v1  ;;  %v833_v40 = vld [vmem:[%s7731_s9 + $0x3c] sm:$0xf] }
  0x46   : > { %7144 = vmatprep.subr.bf16.mxu1 %v7572_v36  ;;  %7192 = vmatprep.subr.bf16.mxu0 %v7577_v47  ;;  %v6572_v42 = vcombine.low %v7867_v23, %v1744_v38  ;;  %v963_v13 = vrot.slane %v961_v3, 5  ;;  %v1754_v15 = vrot.slane %v1646_v62, 5  ;;  %v6543_v21 = vrot.slane %v1648_v10, 9  ;;  %v1652_v62 = vld [vmem:[%s7731_s9 + $0x34] sm:$0xf] }
  0x47   : > { %v7895_v43 = vsel %vm7849_vm5, %v1749_v34, %v1750_v25  ;;  %v924_v58 = vor.u32 %v923_v49, %v920_v48  ;;  %v949_v24 = vrot.slane %v948_v12, 4  ;;  %v1761_v31 = vrot.slane %v1649_v16, 5  ;;  %v832_v34 = vld [vmem:[%s7731_s9 + $0x38] sm:$0x1]  ;;  %v835_v48 = vld [vmem:[%s7731_s9 + $0x44] sm:$0x1] }
  0x48   : > { %7129 = vmatmul.mubr.bf16.gmra.mxu1 %v7571_v45  ;;  %7113 = vmatmul.mubr.bf16.gmra.mxu0 %v7576_v46  ;;  %v931_v45 = vshrl.u32 %v825_v26, 16  ;;  %v7583_v46 = vld [vmem:[%s9672_s3 + $0x40] sm:$0xff]   ;;  %v1756_v26 = vrot.slane %v1754_v15, 4  ;;  %v1764_v32 = vrot.slane %v1650_v20, 5  ;;  %v7591_v49 = vld [vmem:[%s9672_s3 + $0x130] sm:$0xff]   ;;  %v975_v54 = vshll.u32 %v831_v27, 16 }
  0x49   : > { %7145 = vmatpush3.bf16.msra.mxu1 %v7572_v36  ;;  %7193 = vmatpush3.bf16.msra.mxu0 %v7577_v47  ;;  %v828_v36 = vld [vmem:[%s7731_s9 + $0x28] sm:$0xf]  ;;  %v6573_v47 = vcombine.low %v7883_v33, %v7895_v43  ;;  %v925_v5 = vrot.slane %v924_v58, 4  ;;  %v990_v58 = vshrl.u32 %v833_v40, 16  ;;  %v999_v2 = vshll.u32 %v834_v41, 16 }
  0x4a   : > { %7146 = vmatprep.subr.bf16.mxu1 %v7836_v56  ;;  %7132 = vmatprep.mubr.bf16.mxu1 %v7578_v57  ;;  %v933_v53 = vrot.slane %v931_v45, 4  ;;  %v7587_v57 = vld [vmem:[%s9672_s3 + $0x80] sm:$0xff]   ;;  %v951_v60 = vshll.u32 %v828_v36, 16  ;;  %v955_v61 = vshrl.u32 %v828_v36, 16  ;;  %v1758_v36 = vsel %vm7849_vm5, %v1756_v26, %v1757_v19  ;;  %v7593_v33 = vld [vmem:[%s9672_s3 + $0x128] sm:$0xff]  }
  0x4b   : > { %7194 = vmatprep.subr.bf16.mxu0 %v7581_v63  ;;  %7116 = vmatprep.mubr.bf16.mxu0 %v7582_v11  ;;  %v1762_v45 = vsel %vm7849_vm5, %v6543_v21, %v1761_v31  ;;  %v992_v1 = vrot.slane %v990_v58, 4  ;;  %v1653_v3 = vld [vmem:[%s7731_s9 + $0x38] sm:$0x1]  ;;  %v1656_v20 = vld [vmem:[%s7731_s9 + $0x44] sm:$0x1] }
  0x4c   : > { %v934_v0 = vor.u32 %v933_v53, %v929_v51  ;;  %v953_v6 = vrot.slane %v951_v60, 5  ;;  %v957_v8 = vrot.slane %v955_v61, 4  ;;  %v993_v60 = vshll.u32 %v833_v40, 16  ;;  %v1651_v61 = vld [vmem:[%s7731_s9 + $0x30] sm:$0xe]  ;;  %v7595_v26 = vld [vmem:[%s9672_s3 + $0x120] sm:$0xff]  }
  0x4d   : > { %7147 = vmatpush3.bf16.msra.mxu1 %v7836_v56  ;;  %7195 = vmatpush3.bf16.msra.mxu0 %v7581_v63  ;;  %v1645_v56 = vld [vmem:[%s7731_s9 + $0x18] sm:$0xe]  ;;  %v6544_v12 = vrot.slane %v1651_v61, 9  ;;  %v836_v21 = vld [vmem:[%s7731_s9 + $0x48] sm:$0xf] }
  0x4e   : > { %7148 = vmatprep.subr.bf16.mxu1 %v7580_v17  ;;  %7196 = vmatprep.subr.bf16.mxu0 %v7585_v30  ;;  %v7586_v63 = vld [vmem:[%s9672_s3 + $0xf8] sm:$0xff]   ;;  %v6542_v9 = vrot.slane %v1645_v56, 9  ;;  %v935_v11 = vrot.slane %v934_v0, 4  ;;  %v958_v18 = vor.u32 %v957_v8, %v953_v6  ;;  %v954_v35 = vsel %vm7829_vm4, %v949_v24, %v953_v6 }
  0x4f   : > { %v1003_v6 = vshrl.u32 %v834_v41, 16  ;;  %v1009_v8 = vshll.u32 %v835_v48, 16 }
  0x50   : > { %7133 = vmatmul.mubr.bf16.gmra.mxu1 %v7579_v28  ;;  %7117 = vmatmul.mubr.bf16.gmra.mxu0 %v7584_v29  ;;  %v940_v23 = vsel %vm7829_vm4, %v935_v11, %v939_v59  ;;  %v1755_v25 = vsel %vm7849_vm5, %v6542_v9, %v1754_v15  ;;  %v959_v29 = vrot.slane %v958_v18, 4  ;;  %v977_v59 = vrot.slane %v975_v54, 5  ;;  %v1654_v9 = vld [vmem:[%s7731_s9 + $0x3c] sm:$0xe]  ;;  %v7592_v15 = vld [vmem:[%s9672_s3 + $0xe0] sm:$0xff]  }
  0x51   : > { %7149 = vmatpush3.bf16.msra.mxu1 %v7580_v17  ;;  %7197 = vmatpush3.bf16.msra.mxu0 %v7585_v30  ;;  %v930_v17 = vsel %vm7829_vm4, %v925_v5, %v929_v51  ;;  %v7588_v30 = vld [vmem:[%s9672_s3 + $0xf0] sm:$0xff]   ;;  %v6574_v44 = vcombine.low %v1755_v25, %v1758_v36  ;;  %v995_v5 = vrot.slane %v993_v60, 5  ;;  %v1001_v11 = vrot.slane %v999_v2, 5  ;;  %v7597_v54 = vld [vmem:[%s9672_s3 + $0x118] sm:$0xff]  }
  0x52   : > { %7150 = vmatprep.subr.bf16.mxu1 %v7583_v46  ;;  %7152 = vmatprep.mubr.bf16.mxu1 %v7863_v22  ;;  %v830_v22 = vld [vmem:[%s7731_s9 + $0x30] sm:$0xf]  ;;  %v6518_v28 = vcombine.low %v930_v17, %v940_v23  ;;  %v1005_v18 = vrot.slane %v1003_v6, 4  ;;  %v1011_v19 = vrot.slane %v1009_v8, 5  ;;  %v1771_v25 = vrot.slane %v1653_v3, 5 }
  0x53   : > { %7198 = vmatprep.subr.bf16.mxu0 %v7587_v57  ;;  %7200 = vmatprep.mubr.bf16.mxu0 %v6572_v42  ;;  %v966_v38 = vshrl.u32 %v830_v22, 16  ;;  %v969_v39 = vshll.u32 %v830_v22, 16  ;;  %v964_v42 = vsel %vm7829_vm4, %v959_v29, %v963_v13  ;;  %v1768_v13 = vrot.slane %v1652_v62, 5  ;;  %v838_v36 = vld [vmem:[%s7731_s9 + $0x50] sm:$0x1] }
  0x54   : > { %v6519_v50 = vcombine.low %v954_v35, %v964_v42  ;;  %v996_v17 = vor.u32 %v995_v5, %v992_v1  ;;  %v6545_v29 = vrot.slane %v1654_v9, 9  ;;  %v1778_v35 = vrot.slane %v1656_v20, 5  ;;  %v7596_v1 = vld [vmem:[%s9672_s3 + $0xd0] sm:$0xff]  }
  0x55   : > { %7151 = vmatpush3.bf16.msra.mxu1 %v7583_v46  ;;  %7199 = vmatpush3.bf16.msra.mxu0 %v7587_v57  ;;  %v1763_v46 = vrot.slane %v1761_v31, 4  ;;  %v968_v51 = vrot.slane %v966_v38, 4  ;;  %v971_v53 = vrot.slane %v969_v39, 5  ;;  %v985_v57 = vshll.u32 %v832_v34, 16  ;;  %v837_v31 = vld [vmem:[%s7731_s9 + $0x4c] sm:$0xf] }
  0x56   : > { %7232 = vmatprep.subr.bf16.mxu1 %v7586_v63  ;;  %7280 = vmatprep.subr.bf16.mxu0 %v7589_v14  ;;  %v1769_v23 = vsel %vm7849_vm5, %v6544_v12, %v1768_v13  ;;  %v1770_v24 = vrot.slane %v1768_v13, 4  ;;  %v1014_v38 = vshrl.u32 %v836_v21, 16  ;;  %v839_v39 = vld [vmem:[%s7731_s9 + $0x54] sm:$0xf]  ;;  %v1659_v6 = vld [vmem:[%s7731_s9 + $0x50] sm:$0x1] }
  0x57   : > { %v1765_v56 = vsel %vm7849_vm5, %v1763_v46, %v1764_v32  ;;  %v987_v0 = vrot.slane %v985_v57, 5  ;;  %v7594_v46 = vld [vmem:[%s9672_s3 + $0xd8] sm:$0xff]   ;;  %v1033_v57 = vshll.u32 %v838_v36, 16  ;;  %v7599_v8 = vld [vmem:[%s9672_s3 + $0x110] sm:$0xff]   ;;  %v843_v36 = vld [vmem:[%s7731_s9 + $0x64] sm:$0xf] }
  0x58   : > { %7153 = vmatmul.mubr.bf16.vlgmr.msra.gmra.mxu1 %v7887_v37  ;;  %7201 = vmatmul.mubr.bf16.vlgmr.msra.gmra.mxu0 %v6573_v47  ;;  %v979_v37 = vshrl.u32 %v831_v27, 16  ;;  %v6575_v43 = vcombine.low %v1762_v45, %v1765_v56  ;;  %v972_v47 = vor.u32 %v971_v53, %v968_v51  ;;  %v997_v27 = vrot.slane %v996_v17, 4  ;;  %v840_v45 = vld [vmem:[%s7731_s9 + $0x58] sm:$0xf]  ;;  %v841_v53 = vld [vmem:[%s7731_s9 + $0x5c] sm:$0x1] }
  0x59   : > { %7233 = vmatpush3.bf16.msra.mxu1 %v7586_v63  ;;  %7156 = vmatprep.mubr.bf16.mxu1 %v6518_v28  ;;  %v1006_v28 = vor.u32 %v1005_v18, %v1001_v11  ;;  %v1772_v34 = vsel %vm7849_vm5, %v1770_v24, %v1771_v25  ;;  %v1017_v51 = vshll.u32 %v836_v21, 16  ;;  %v1023_v56 = vshll.u32 %v837_v31, 16  ;;  %v1660_v13 = vld [vmem:[%s7731_s9 + $0x54] sm:$0xe]  ;;  %v1662_v24 = vld [vmem:[%s7731_s9 + $0x5c] sm:$0x1] }
  0x5a   : > { %7234 = vmatprep.subr.bf16.mxu1 %v7588_v30  ;;  %7281 = vmatpush3.bf16.msra.mxu0 %v7589_v14  ;;  %v981_v63 = vrot.slane %v979_v37, 4  ;;  %v973_v4 = vrot.slane %v972_v47, 4  ;;  %v1655_v14 = vld [vmem:[%s7731_s9 + $0x40] sm:$0xf]  ;;  %v1002_v41 = vsel %vm7829_vm4, %v997_v27, %v1001_v11  ;;  %v1027_v37 = vshrl.u32 %v837_v31, 16 }
  0x5b   : > { %7204 = vmatprep.mubr.bf16.mxu0 %v6574_v44  ;;  %7282 = vmatprep.subr.bf16.mxu0 %v7591_v49  ;;  %v1007_v42 = vrot.slane %v1006_v28, 4  ;;  %v6576_v44 = vcombine.low %v1769_v23, %v1772_v34  ;;  %v1038_v47 = vshrl.u32 %v839_v39, 16  ;;  %v1025_v61 = vrot.slane %v1023_v56, 5  ;;  %v7605_v56 = vld [vmem:[%s9672_s3 + $0x100] sm:$0xff]  }
  0x5c   : > { %v982_v10 = vor.u32 %v981_v63, %v977_v59  ;;  %v978_v16 = vsel %vm7829_vm4, %v973_v4, %v977_v59  ;;  %v1657_v59 = vld [vmem:[%s7731_s9 + $0x48] sm:$0xe]  ;;  %v1029_v62 = vrot.slane %v1027_v37, 4  ;;  %v1035_v63 = vrot.slane %v1033_v57, 5 }
  0x5d   : > { %7235 = vmatpush3.bf16.msra.mxu1 %v7588_v30  ;;  %v1775_v30 = vrot.slane %v1655_v14, 5  ;;  %v1040_v3 = vrot.slane %v1038_v47, 4  ;;  %v1041_v4 = vshll.u32 %v839_v39, 16  ;;  %v1047_v5 = vshll.u32 %v840_v45, 16  ;;  %v7598_v14 = vld [vmem:[%s9672_s3 + $0xc8] sm:$0xff]   ;;  %v8045_v47 = vld [vmem:[%s9672_s3 + $0x178] sm:$0xff]  }
  0x5e   : > { %7236 = vmatprep.subr.bf16.mxu1 %v7590_v55  ;;  %7283 = vmatpush3.bf16.msra.mxu0 %v7591_v49  ;;  %v983_v22 = vrot.slane %v982_v10, 4  ;;  %v1030_v9 = vor.u32 %v1029_v62, %v1025_v61  ;;  %v1051_v10 = vshrl.u32 %v840_v45, 16  ;;  %v1057_v11 = vshll.u32 %v841_v53, 16  ;;  %v845_v45 = vld [vmem:[%s7731_s9 + $0x6c] sm:$0xf] }
  0x5f   : > { %7284 = vmatprep.subr.bf16.mxu0 %v7593_v33  ;;  %v1776_v48 = vsel %vm7849_vm5, %v6545_v29, %v1775_v30  ;;  %v1777_v49 = vrot.slane %v1775_v30, 4  ;;  %v6546_v12 = vrot.slane %v1657_v59, 9  ;;  %v1049_v17 = vrot.slane %v1047_v5, 5  ;;  %v7601_v29 = vld [vmem:[%s9672_s3 + $0x108] sm:$0xff]   ;;  %v1664_v5 = vld [vmem:[%s7731_s9 + $0x64] sm:$0xf] }
  0x60   : > { %7157 = vmatmul.mubr.bf16.gmra.mxu1 %v6519_v50  ;;  %7205 = vmatmul.mubr.bf16.gmra.mxu0 %v6575_v43  ;;  %v988_v32 = vsel %vm7829_vm4, %v983_v22, %v987_v0  ;;  %v1016_v50 = vrot.slane %v1014_v38, 4  ;;  %v1019_v43 = vrot.slane %v1017_v51, 5  ;;  %v1658_v0 = vld [vmem:[%s7731_s9 + $0x4c] sm:$0xf]  ;;  %v1031_v20 = vrot.slane %v1030_v9, 4  ;;  %v7600_v38 = vld [vmem:[%s9672_s3 + $0xc0] sm:$0xff]  }
  0x61   : > { %7237 = vmatpush3.bf16.msra.mxu1 %v7590_v55  ;;  %v6520_v40 = vcombine.low %v978_v16, %v988_v32  ;;  %v1012_v55 = vsel %vm7829_vm4, %v1007_v42, %v1011_v19  ;;  %7208 = vmatprep.mubr.bf16.mxu0 %v6576_v44  ;;  %v1043_v16 = vrot.slane %v1041_v4, 5  ;;  %v1782_v18 = vrot.slane %v1658_v0, 5  ;;  %v1661_v19 = vld [vmem:[%s7731_s9 + $0x58] sm:$0xf]  ;;  %v844_v44 = vld [vmem:[%s7731_s9 + $0x68] sm:$0x1] }
  0x62   : > { %7238 = vmatprep.subr.bf16.mxu1 %v7592_v15  ;;  %7285 = vmatpush3.bf16.msra.mxu0 %v7593_v33  ;;  %v6521_v58 = vcombine.low %v1002_v41, %v1012_v55  ;;  %v1779_v33 = vsel %vm7849_vm5, %v1777_v49, %v1778_v35  ;;  %v1020_v2 = vor.u32 %v1019_v43, %v1016_v50  ;;  %v1053_v21 = vrot.slane %v1051_v10, 4  ;;  %v842_v35 = vld [vmem:[%s7731_s9 + $0x60] sm:$0xf]  ;;  %v846_v43 = vld [vmem:[%s7731_s9 + $0x70] sm:$0xf] }
  0x63   : > { %7286 = vmatprep.subr.bf16.mxu0 %v7595_v26  ;;  %7160 = vmatprep.mubr.bf16.mxu1 %v6520_v40  ;;  %v6577_v60 = vcombine.low %v1776_v48, %v1779_v33  ;;  %v1059_v22 = vrot.slane %v1057_v11, 5  ;;  %v1785_v23 = vrot.slane %v1659_v6, 5  ;;  %v1783_v27 = vsel %vm7849_vm5, %v6546_v12, %v1782_v18  ;;  %v1663_v0 = vld [vmem:[%s7731_s9 + $0x60] sm:$0xe]  ;;  %v1665_v11 = vld [vmem:[%s7731_s9 + $0x68] sm:$0x1] }
  0x64   : > { %v1784_v28 = vrot.slane %v1782_v18, 4  ;;  %v1036_v30 = vsel %vm7829_vm4, %v1031_v20, %v1035_v63  ;;  %v1054_v31 = vor.u32 %v1053_v21, %v1049_v17  ;;  %v6547_v32 = vrot.slane %v1660_v13, 9  ;;  %v847_v63 = vld [vmem:[%s7731_s9 + $0x74] sm:$0x1]  ;;  %v8054_v12 = vld [vmem:[%s9672_s3 + $0x1b8] sm:$0xff]  }
  0x65   : > { %7239 = vmatpush3.bf16.msra.mxu1 %v7592_v15  ;;  %v1021_v15 = vrot.slane %v1020_v2, 4  ;;  %v1789_v34 = vrot.slane %v1661_v19, 5  ;;  %v1792_v42 = vrot.slane %v1662_v24, 5  ;;  %v1062_v53 = vshrl.u32 %v842_v35, 16 }
  0x66   : > { %7240 = vmatprep.subr.bf16.mxu1 %v7594_v46  ;;  %7287 = vmatpush3.bf16.msra.mxu0 %v7595_v26  ;;  %v1044_v26 = vor.u32 %v1043_v16, %v1040_v3  ;;  %v1786_v41 = vsel %vm7849_vm5, %v1784_v28, %v1785_v23  ;;  %v1071_v55 = vshll.u32 %v843_v36, 16  ;;  %v1081_v33 = vshll.u32 %v844_v44, 16 }
  0x67   : > { %7288 = vmatprep.subr.bf16.mxu0 %v7597_v54  ;;  %v1026_v25 = vsel %vm7829_vm4, %v1021_v15, %v1025_v61  ;;  %v6578_v48 = vcombine.low %v1783_v27, %v1786_v41  ;;  %v1790_v49 = vsel %vm7849_vm5, %v6547_v32, %v1789_v34  ;;  %v1791_v50 = vrot.slane %v1789_v34, 4  ;;  %v1668_v27 = vld [vmem:[%s7731_s9 + $0x74] sm:$0x1]  ;;  %v848_v32 = vld [vmem:[%s7731_s9 + $0x78] sm:$0xf] }
  0x68   : > { %7161 = vmatmul.mubr.bf16.gmra.mxu1 %v6521_v58  ;;  %7209 = vmatmul.mubr.bf16.gmra.mxu0 %v6577_v60  ;;  %v6522_v39 = vcombine.low %v1026_v25, %v1036_v30  ;;  %v1045_v40 = vrot.slane %v1044_v26, 4  ;;  %v1075_v58 = vshrl.u32 %v843_v36, 16  ;;  %v1064_v61 = vrot.slane %v1062_v53, 4 }
  0x69   : > { %7241 = vmatpush3.bf16.msra.mxu1 %v7594_v46  ;;  %v1055_v46 = vrot.slane %v1054_v31, 4  ;;  %7212 = vmatprep.mubr.bf16.mxu0 %v6578_v48  ;;  %v1793_v57 = vsel %vm7849_vm5, %v1791_v50, %v1792_v42  ;;  %v1083_v3 = vrot.slane %v1081_v33, 5  ;;  %v1086_v4 = vshrl.u32 %v845_v45, 16 }
  0x6a   : > { %7242 = vmatprep.subr.bf16.mxu1 %v7596_v1  ;;  %7289 = vmatpush3.bf16.msra.mxu0 %v7597_v54  ;;  %v1050_v51 = vsel %vm7829_vm4, %v1045_v40, %v1049_v17  ;;  %v1065_v54 = vshll.u32 %v842_v35, 16  ;;  %v6579_v60 = vcombine.low %v1790_v49, %v1793_v57  ;;  %v1077_v2 = vrot.slane %v1075_v58, 4  ;;  %v1666_v17 = vld [vmem:[%s7731_s9 + $0x6c] sm:$0xe]  ;;  %v850_v40 = vld [vmem:[%s7731_s9 + $0x80] sm:$0x1] }
  0x6b   : > { %7290 = vmatprep.subr.bf16.mxu0 %v7599_v8  ;;  %7164 = vmatprep.mubr.bf16.mxu1 %v6522_v39  ;;  %v1060_v37 = vsel %vm7829_vm4, %v1055_v46, %v1059_v22  ;;  %v1095_v9 = vshll.u32 %v846_v43, 16  ;;  %v1099_v10 = vshrl.u32 %v846_v43, 16  ;;  %v1105_v15 = vshll.u32 %v847_v63, 16  ;;  %v1667_v22 = vld [vmem:[%s7731_s9 + $0x70] sm:$0xf] }
  0x6c   : > { %v6523_v59 = vcombine.low %v1050_v51, %v1060_v37  ;;  %v1067_v62 = vrot.slane %v1065_v54, 5  ;;  %v6548_v16 = vrot.slane %v1663_v0, 9  ;;  %v1796_v25 = vrot.slane %v1664_v5, 5  ;;  %v849_v39 = vld [vmem:[%s7731_s9 + $0x7c] sm:$0xf] }
  0x6d   : > { %7243 = vmatpush3.bf16.msra.mxu1 %v7596_v1  ;;  %v1073_v1 = vrot.slane %v1071_v55, 5  ;;  %v1097_v20 = vrot.slane %v1095_v9, 5  ;;  %v1101_v21 = vrot.slane %v1099_v10, 4  ;;  %v1107_v24 = vrot.slane %v1105_v15, 5  ;;  %v851_v46 = vld [vmem:[%s7731_s9 + $0x84] sm:$0xf] }
  0x6e   : > { %7244 = vmatprep.subr.bf16.mxu1 %v7598_v14  ;;  %7291 = vmatpush3.bf16.msra.mxu0 %v7599_v8  ;;  %v1068_v6 = vor.u32 %v1067_v62, %v1064_v61  ;;  %v1089_v8 = vshll.u32 %v845_v45, 16  ;;  %v1799_v26 = vrot.slane %v1665_v11, 5  ;;  %v6549_v31 = vrot.slane %v1666_v17, 9  ;;  %v852_v37 = vld [vmem:[%s7731_s9 + $0x88] sm:$0xf] }
  0x6f   : > { %7292 = vmatprep.subr.bf16.mxu0 %v7601_v29  ;;  %v1078_v13 = vor.u32 %v1077_v2, %v1073_v1  ;;  %v1102_v30 = vor.u32 %v1101_v21, %v1097_v20  ;;  %v1797_v35 = vsel %vm7849_vm5, %v6548_v16, %v1796_v25  ;;  %v1798_v36 = vrot.slane %v1796_v25, 4 }
  0x70   : > { %7165 = vmatmul.mubr.bf16.gmra.mxu1 %v6523_v59  ;;  %7213 = vmatmul.mubr.bf16.gmra.mxu0 %v6579_v60  ;;  %v1069_v18 = vrot.slane %v1068_v6, 4  ;;  %v1091_v19 = vrot.slane %v1089_v8, 5  ;;  %v1806_v45 = vrot.slane %v1668_v27, 5  ;;  %v1110_v51 = vshrl.u32 %v848_v32, 16  ;;  %v853_v59 = vld [vmem:[%s7731_s9 + $0x8c] sm:$0x1] }
  0x71   : > { %7245 = vmatpush3.bf16.msra.mxu1 %v7598_v14  ;;  %v1088_v14 = vrot.slane %v1086_v4, 4  ;;  %v1079_v23 = vrot.slane %v1078_v13, 4  ;;  %v1103_v44 = vrot.slane %v1102_v30, 4  ;;  %v1800_v48 = vsel %vm7849_vm5, %v1798_v36, %v1799_v26  ;;  %v1669_v60 = vld [vmem:[%s7731_s9 + $0x78] sm:$0xe] }
  0x72   : > { %7246 = vmatprep.subr.bf16.mxu1 %v7600_v38  ;;  %7293 = vmatpush3.bf16.msra.mxu0 %v7601_v29  ;;  %v1074_v28 = vsel %vm7829_vm4, %v1069_v18, %v1073_v1  ;;  %v6580_v55 = vcombine.low %v1797_v35, %v1800_v48  ;;  %v1112_v33 = vrot.slane %v1110_v51, 4  ;;  %v1119_v43 = vshll.u32 %v849_v39, 16  ;;  %v1670_v1 = vld [vmem:[%s7731_s9 + $0x7c] sm:$0xf]  ;;  %v1671_v6 = vld [vmem:[%s7731_s9 + $0x80] sm:$0x1] }
  0x73   : > { %7294 = vmatprep.subr.bf16.mxu0 %v7605_v56  ;;  %v1092_v29 = vor.u32 %v1091_v19, %v1088_v14  ;;  %v1084_v34 = vsel %vm7829_vm4, %v1079_v23, %v1083_v3  ;;  %v1108_v54 = vsel %vm7829_vm4, %v1103_v44, %v1107_v24  ;;  %v1123_v63 = vshrl.u32 %v849_v39, 16  ;;  %v1672_v13 = vld [vmem:[%s7731_s9 + $0x84] sm:$0xe]  ;;  %v1673_v18 = vld [vmem:[%s7731_s9 + $0x88] sm:$0xf] }
  0x74   : > { %v6524_v41 = vcombine.low %v1074_v28, %v1084_v34  ;;  %7216 = vmatprep.mubr.bf16.mxu0 %v6580_v55  ;;  %v1129_v0 = vshll.u32 %v850_v40, 16  ;;  %v1121_v2 = vrot.slane %v1119_v43, 5  ;;  %v1134_v3 = vshrl.u32 %v851_v46, 16  ;;  %v1674_v23 = vld [vmem:[%s7731_s9 + $0x8c] sm:$0x1] }
  0x75   : > { %7247 = vmatpush3.bf16.msra.mxu1 %v7600_v38  ;;  %v1803_v38 = vrot.slane %v1667_v22, 5  ;;  %v1093_v42 = vrot.slane %v1092_v29, 4  ;;  %v1137_v4 = vshll.u32 %v851_v46, 16  ;;  %v1143_v5 = vshll.u32 %v852_v37, 16  ;;  %v854_v28 = vld [vmem:[%s7731_s9 + $0x90] sm:$0xf] }
  0x76   : > { %7328 = vmatprep.subr.bf16.mxu1 %v8045_v47  ;;  %7295 = vmatpush3.bf16.msra.mxu0 %v7605_v56  ;;  %v1113_v56 = vshll.u32 %v848_v32, 16  ;;  %v1125_v9 = vrot.slane %v1123_v63, 4  ;;  %v1131_v10 = vrot.slane %v1129_v0, 5  ;;  %v1147_v11 = vshrl.u32 %v852_v37, 16  ;;  %v855_v34 = vld [vmem:[%s7731_s9 + $0x94] sm:$0xf] }
  0x77   : > { %7376 = vmatprep.subr.bf16.mxu0 %v8054_v12  ;;  %v1804_v49 = vsel %vm7849_vm5, %v6549_v31, %v1803_v38  ;;  %v1805_v50 = vrot.slane %v1803_v38, 4  ;;  %7168 = vmatprep.mubr.bf16.mxu1 %v6524_v41  ;;  %v1098_v53 = vsel %vm7829_vm4, %v1093_v42, %v1097_v20  ;;  %v1136_v14 = vrot.slane %v1134_v3, 4  ;;  %v856_v40 = vld [vmem:[%s7731_s9 + $0x98] sm:$0x1]  ;;  %v857_v41 = vld [vmem:[%s7731_s9 + $0x9c] sm:$0xf] }
  0x78   : > { %v6525_v57 = vcombine.low %v1098_v53, %v1108_v54  ;;  %v1115_v62 = vrot.slane %v1113_v56, 5  ;;  %v1139_v15 = vrot.slane %v1137_v4, 5  ;;  %v1145_v16 = vrot.slane %v1143_v5, 5  ;;  %v858_v37 = vld [vmem:[%s7731_s9 + $0xa0] sm:$0xf] }
  0x79   : > { %v1807_v58 = vsel %vm7849_vm5, %v1805_v50, %v1806_v45  ;;  %v1153_v17 = vshll.u32 %v853_v59, 16  ;;  %v1126_v20 = vor.u32 %v1125_v9, %v1121_v2  ;;  %v1149_v21 = vrot.slane %v1147_v11, 4  ;;  %v859_v59 = vld [vmem:[%s7731_s9 + $0xa4] sm:$0x1]  ;;  %v1675_v0 = vld [vmem:[%s7731_s9 + $0x90] sm:$0xe] }
  0x7a   : > { %v6581_v61 = vcombine.low %v1804_v49, %v1807_v58  ;;  %7169 = vmatmul.mubr.bf16.gmra.mxu1 %v6525_v57  ;;  %v1116_v8 = vor.u32 %v1115_v62, %v1112_v33  ;;  %v6550_v22 = vrot.slane %v1669_v60, 9  ;;  %v1140_v24 = vor.u32 %v1139_v15, %v1136_v14  ;;  %v1676_v5 = vld [vmem:[%s7731_s9 + $0x94] sm:$0xf]  ;;  %v1677_v11 = vld [vmem:[%s7731_s9 + $0x98] sm:$0x1] }
  0x7b   : > { %v1155_v25 = vrot.slane %v1153_v17, 5  ;;  %v1810_v26 = vrot.slane %v1670_v1, 5  ;;  %v1813_v27 = vrot.slane %v1671_v6, 5  ;;  %v1127_v30 = vrot.slane %v1126_v20, 4  ;;  %v1678_v17 = vld [vmem:[%s7731_s9 + $0x9c] sm:$0xe] }
  0x7c   : > { %7217 = vmatmul.mubr.bf16.gmra.mxu0 %v6581_v61  ;;  %v1117_v19 = vrot.slane %v1116_v8, 4  ;;  %v1150_v31 = vor.u32 %v1149_v21, %v1145_v16  ;;  %v6551_v32 = vrot.slane %v1672_v13, 9  ;;  %v1141_v35 = vrot.slane %v1140_v24, 4 }
  0x7d   : > { %v1811_v36 = vsel %vm7849_vm5, %v6550_v22, %v1810_v26  ;;  %v1812_v38 = vrot.slane %v1810_v26, 4  ;;  %v1817_v39 = vrot.slane %v1673_v18, 5  ;;  %v1132_v42 = vsel %vm7829_vm4, %v1127_v30, %v1131_v10  ;;  %v1679_v18 = vld [vmem:[%s7731_s9 + $0xa0] sm:$0xf] }
  0x7e   : > { %v1122_v29 = vsel %vm7829_vm4, %v1117_v19, %v1121_v2  ;;  %v1151_v44 = vrot.slane %v1150_v31, 4  ;;  %v1820_v45 = vrot.slane %v1674_v23, 5  ;;  %v1158_v46 = vshrl.u32 %v854_v28, 16  ;;  %v1680_v23 = vld [vmem:[%s7731_s9 + $0xa4] sm:$0x1] }
  0x7f   : > { %v6526_v48 = vcombine.low %v1122_v29, %v1132_v42  ;;  %v1146_v49 = vsel %vm7829_vm4, %v1141_v35, %v1145_v16  ;;  %v1814_v50 = vsel %vm7849_vm5, %v1812_v38, %v1813_v27  ;;  %v1818_v51 = vsel %vm7849_vm5, %v6551_v32, %v1817_v39 }
  0x80   : > { %v1156_v53 = vsel %vm7829_vm4, %v1151_v44, %v1155_v25  ;;  %v6582_v54 = vcombine.low %v1811_v36, %v1814_v50  ;;  %v1819_v55 = vrot.slane %v1817_v39, 4  ;;  %v1160_v56 = vrot.slane %v1158_v46, 4  ;;  %v863_v46 = vld [vmem:[%s7731_s9 + $0xb4] sm:$0xf] }
  0x81   : > { %7172 = vmatprep.mubr.bf16.mxu1 %v6526_v48  ;;  %v6527_v57 = vcombine.low %v1146_v49, %v1156_v53  ;;  %v1161_v58 = vshll.u32 %v854_v28, 16  ;;  %v1167_v33 = vshll.u32 %v855_v34, 16  ;;  %v1171_v43 = vshrl.u32 %v855_v34, 16  ;;  %v860_v28 = vld [vmem:[%s7731_s9 + $0xa8] sm:$0xf] }
  0x82   : > { %7220 = vmatprep.mubr.bf16.mxu0 %v6582_v54  ;;  %v1821_v60 = vsel %vm7849_vm5, %v1819_v55, %v1820_v45  ;;  %v1177_v61 = vshll.u32 %v856_v40, 16  ;;  %v1182_v62 = vshrl.u32 %v857_v41, 16  ;;  %v1185_v63 = vshll.u32 %v857_v41, 16  ;;  %v861_v34 = vld [vmem:[%s7731_s9 + $0xac] sm:$0xf] }
  0x83   : > { %7173 = vmatmul.mubr.bf16.gmra.mxu1 %v6527_v57  ;;  %v6583_v1 = vcombine.low %v1818_v51, %v1821_v60  ;;  %v1163_v2 = vrot.slane %v1161_v58, 5  ;;  %v1169_v3 = vrot.slane %v1167_v33, 5  ;;  %v1173_v4 = vrot.slane %v1171_v43, 4  ;;  %v862_v40 = vld [vmem:[%s7731_s9 + $0xb0] sm:$0x1] }
  0x84   : > { %v1179_v6 = vrot.slane %v1177_v61, 5  ;;  %v1184_v8 = vrot.slane %v1182_v62, 4  ;;  %v1187_v9 = vrot.slane %v1185_v63, 5  ;;  %v1191_v10 = vshll.u32 %v858_v37, 16  ;;  %v864_v53 = vld [vmem:[%s7731_s9 + $0xb8] sm:$0xf] }
  0x85   : > { %7221 = vmatmul.mubr.bf16.gmra.mxu0 %v6583_v1  ;;  %v1164_v13 = vor.u32 %v1163_v2, %v1160_v56  ;;  %v1174_v14 = vor.u32 %v1173_v4, %v1169_v3  ;;  %v1195_v15 = vshrl.u32 %v858_v37, 16  ;;  %v1201_v16 = vshll.u32 %v859_v59, 16  ;;  %v865_v57 = vld [vmem:[%s7731_s9 + $0xbc] sm:$0x1]  ;;  %v1681_v60 = vld [vmem:[%s7731_s9 + $0xa8] sm:$0xe] }
  0x86   : > { %v1188_v19 = vor.u32 %v1187_v9, %v1184_v8  ;;  %v1193_v20 = vrot.slane %v1191_v10, 5  ;;  %v6552_v21 = vrot.slane %v1675_v0, 9  ;;  %v1824_v22 = vrot.slane %v1676_v5, 5  ;;  %v1682_v1 = vld [vmem:[%s7731_s9 + $0xac] sm:$0xf] }
  0x87   : > { %v1165_v24 = vrot.slane %v1164_v13, 4  ;;  %v1175_v25 = vrot.slane %v1174_v14, 4  ;;  %v1197_v26 = vrot.slane %v1195_v15, 4  ;;  %v1203_v27 = vrot.slane %v1201_v16, 5  ;;  %v1683_v2 = vld [vmem:[%s7731_s9 + $0xb0] sm:$0x1] }
  0x88   : > { %v1189_v29 = vrot.slane %v1188_v19, 4  ;;  %v1825_v30 = vsel %vm7849_vm5, %v6552_v21, %v1824_v22  ;;  %v1826_v31 = vrot.slane %v1824_v22, 4  ;;  %v1827_v32 = vrot.slane %v1677_v11, 5  ;;  %v1684_v8 = vld [vmem:[%s7731_s9 + $0xb4] sm:$0xe] }
  0x89   : > { %v1170_v35 = vsel %vm7829_vm4, %v1165_v24, %v1169_v3  ;;  %v1180_v36 = vsel %vm7829_vm4, %v1175_v25, %v1179_v6  ;;  %v1198_v38 = vor.u32 %v1197_v26, %v1193_v20  ;;  %v6553_v39 = vrot.slane %v1678_v17, 9  ;;  %v1685_v14 = vld [vmem:[%s7731_s9 + $0xb8] sm:$0xf]  ;;  %v1686_v19 = vld [vmem:[%s7731_s9 + $0xbc] sm:$0x1] }
  0x8a   : > { %v6528_v41 = vcombine.low %v1170_v35, %v1180_v36  ;;  %v1194_v42 = vsel %vm7829_vm4, %v1189_v29, %v1193_v20  ;;  %v1828_v44 = vsel %vm7849_vm5, %v1826_v31, %v1827_v32  ;;  %v1831_v45 = vrot.slane %v1679_v18, 5 }
  0x8b   : > { %v1199_v48 = vrot.slane %v1198_v38, 4  ;;  %v6584_v49 = vcombine.low %v1825_v30, %v1828_v44  ;;  %v1834_v50 = vrot.slane %v1680_v23, 5  ;;  %v1206_v51 = vshrl.u32 %v860_v28, 16 }
  0x8c   : > { %7176 = vmatprep.mubr.bf16.mxu1 %v6528_v41  ;;  %v1832_v54 = vsel %vm7849_vm5, %v6553_v39, %v1831_v45  ;;  %v1833_v55 = vrot.slane %v1831_v45, 4  ;;  %v1209_v56 = vshll.u32 %v860_v28, 16  ;;  %v1215_v37 = vshll.u32 %v861_v34, 16 }
  0x8d   : > { %v1204_v58 = vsel %vm7829_vm4, %v1199_v48, %v1203_v27  ;;  %7224 = vmatprep.mubr.bf16.mxu0 %v6584_v49  ;;  %v1208_v33 = vrot.slane %v1206_v51, 4  ;;  %v1219_v43 = vshrl.u32 %v861_v34, 16  ;;  %v1225_v59 = vshll.u32 %v862_v40, 16  ;;  %v2687_v48 = vld [vmem:[%s7736_s12 + $0x4] sm:$0xf] }
  0x8e   : > { %v6529_v61 = vcombine.low %v1194_v42, %v1204_v58  ;;  %v1835_v62 = vsel %vm7849_vm5, %v1833_v55, %v1834_v50  ;;  %v1211_v63 = vrot.slane %v1209_v56, 5  ;;  %v1217_v0 = vrot.slane %v1215_v37, 5  ;;  %v2689_v56 = vld [vmem:[%s7736_s12 + $0xc] sm:$0xf] }
  0x8f   : > { %v6585_v3 = vcombine.low %v1832_v54, %v1835_v62  ;;  %v1221_v4 = vrot.slane %v1219_v43, 4  ;;  %v1227_v5 = vrot.slane %v1225_v59, 5  ;;  %v1230_v6 = vshrl.u32 %v863_v46, 16  ;;  %v2688_v54 = vld [vmem:[%s7736_s12 + $0x8] sm:$0x1] }
  0x90   : > { %7177 = vmatmul.mubr.bf16.gmra.mxu1 %v6529_v61  ;;  %v1212_v9 = vor.u32 %v1211_v63, %v1208_v33  ;;  %v1233_v10 = vshll.u32 %v863_v46, 16  ;;  %v1239_v11 = vshll.u32 %v864_v53, 16  ;;  %v1243_v13 = vshrl.u32 %v864_v53, 16  ;;  %v2686_v46 = vld [vmem:[%s7736_s12] sm:$0xf] }
  0x91   : > { %7225 = vmatmul.mubr.bf16.gmra.mxu0 %v6585_v3  ;;  %v1222_v15 = vor.u32 %v1221_v4, %v1217_v0  ;;  %v1232_v16 = vrot.slane %v1230_v6, 4  ;;  %v1249_v17 = vshll.u32 %v865_v57, 16  ;;  %v6554_v18 = vrot.slane %v1681_v60, 9  ;;  %v7602_v53 = vld [vmem:[%s7736_s12] sm:$0xff]   ;;  %v2690_v43 = vld [vmem:[%s7736_s12 + $0x10] sm:$0xf] }
  0x92   : > { %v1213_v20 = vrot.slane %v1212_v9, 4  ;;  %v1235_v21 = vrot.slane %v1233_v10, 5  ;;  %v1241_v22 = vrot.slane %v1239_v11, 5  ;;  %v1245_v23 = vrot.slane %v1243_v13, 4  ;;  %v2691_v59 = vld [vmem:[%s7736_s12 + $0x14] sm:$0x1] }
  0x93   : > { %v1223_v24 = vrot.slane %v1222_v15, 4  ;;  %v1251_v25 = vrot.slane %v1249_v17, 5  ;;  %v1838_v26 = vrot.slane %v1682_v1, 5  ;;  %v1841_v27 = vrot.slane %v1683_v2, 5  ;;  %v7603_v9 = vld [vmem:[%s7736_s12 + $0xc] sm:$0xff]  }
  0x94   : > { %v1218_v28 = vsel %vm7829_vm4, %v1213_v20, %v1217_v0  ;;  %v1236_v29 = vor.u32 %v1235_v21, %v1232_v16  ;;  %v1246_v30 = vor.u32 %v1245_v23, %v1241_v22  ;;  %v6555_v31 = vrot.slane %v1684_v8, 9  ;;  %v7606_v20 = vld [vmem:[%s7736_s12 + $0x18] sm:$0xff]  }
  0x95   : > { %v1228_v32 = vsel %vm7829_vm4, %v1223_v24, %v1227_v5  ;;  %v1839_v34 = vsel %vm7849_vm5, %v6554_v18, %v1838_v26  ;;  %v1840_v35 = vrot.slane %v1838_v26, 4  ;;  %v1845_v36 = vrot.slane %v1685_v14, 5  ;;  %v2692_v24 = vld [vmem:[%s7736_s12 + $0x18] sm:$0xf] }
  0x96   : > { %v6530_v38 = vcombine.low %v1218_v28, %v1228_v32  ;;  %v1237_v39 = vrot.slane %v1236_v29, 4  ;;  %v1247_v40 = vrot.slane %v1246_v30, 4  ;;  %v1848_v41 = vrot.slane %v1686_v19, 5  ;;  %v7608_v28 = vld [vmem:[%s9672_s3 + $0x170] sm:$0xff]   ;;  %v2694_v29 = vld [vmem:[%s7736_s12 + $0x20] sm:$0x1] }
  0x97   : > { %v1842_v42 = vsel %vm7849_vm5, %v1840_v35, %v1841_v27  ;;  %v1846_v44 = vsel %vm7849_vm5, %v6555_v31, %v1845_v36  ;;  %v1847_v45 = vrot.slane %v1845_v36, 4  ;;  %v2735_v55 = vshrl.u32 %v2686_v46, 16 }
  0x98   : > { %7180 = vmatprep.mubr.bf16.mxu1 %v6530_v38  ;;  %v1242_v49 = vsel %vm7829_vm4, %v1237_v39, %v1241_v22  ;;  %v1252_v50 = vsel %vm7829_vm4, %v1247_v40, %v1251_v25  ;;  %v6586_v51 = vcombine.low %v1839_v34, %v1842_v42  ;;  %v2738_v58 = vshll.u32 %v2686_v46, 16  ;;  %v2693_v25 = vld [vmem:[%s7736_s12 + $0x1c] sm:$0xf]  ;;  %v2695_v38 = vld [vmem:[%s7736_s12 + $0x24] sm:$0xf]  ;;  %v7612_v46 = vld [vmem:[%s9672_s3 + $0x168] sm:$0xff]  }
  0x99   : > { %v6531_v37 = vcombine.low %v1242_v49, %v1252_v50  ;;  %v1849_v57 = vsel %vm7849_vm5, %v1847_v45, %v1848_v41  ;;  %v2744_v33 = vshll.u32 %v2687_v48, 16  ;;  %v2737_v61 = vrot.slane %v2735_v55, 4  ;;  %v2697_v45 = vld [vmem:[%s7736_s12 + $0x2c] sm:$0x1]  ;;  %v7607_v55 = vld [vmem:[%s7736_s12 + $0x24] sm:$0xff]  }
  0x9a   : > { %7228 = vmatprep.mubr.bf16.mxu0 %v6586_v51  ;;  %v6587_v60 = vcombine.low %v1846_v44, %v1849_v57  ;;  %v2748_v62 = vshrl.u32 %v2687_v48, 16  ;;  %v2754_v63 = vshll.u32 %v2688_v54, 16  ;;  %v2740_v0 = vrot.slane %v2738_v58, 5  ;;  %v2696_v44 = vld [vmem:[%s7736_s12 + $0x28] sm:$0xf] }
  0x9b   : > { %7181 = vmatmul.mubr.bf16.gmra.mxu1 %v6531_v37  ;;  %v2746_v1 = vrot.slane %v2744_v33, 5  ;;  %v2759_v2 = vshrl.u32 %v2689_v56, 16  ;;  %v2762_v3 = vshll.u32 %v2689_v56, 16  ;;  %v2768_v6 = vshll.u32 %v2690_v43, 16 }
  0x9c   : > { %7229 = vmatmul.mubr.bf16.gmra.mxu0 %v6587_v60  ;;  %7248 = vmatprep.mubr.bf16.mxu1 %v7602_v53  ;;  %v2750_v4 = vrot.slane %v2748_v62, 4  ;;  %v2756_v5 = vrot.slane %v2754_v63, 5  ;;  %v2772_v8 = vshrl.u32 %v2690_v43, 16  ;;  %v2741_v10 = vor.u32 %v2740_v0, %v2737_v61  ;;  %v7613_v53 = vld [vmem:[%s9672_s3 + $0x1b0] sm:$0xff]  }
  0x9d   : > { %v2761_v11 = vrot.slane %v2759_v2, 4  ;;  %v2764_v13 = vrot.slane %v2762_v3, 5  ;;  %v2778_v14 = vshll.u32 %v2691_v59, 16  ;;  %v2770_v16 = vrot.slane %v2768_v6, 5  ;;  %v7610_v59 = vld [vmem:[%s7736_s12 + $0x30] sm:$0xff]   ;;  %v7616_v3 = vld [vmem:[%s9672_s3 + $0x160] sm:$0xff]  }
  0x9e   : > { %v2751_v15 = vor.u32 %v2750_v4, %v2746_v1  ;;  %v2774_v17 = vrot.slane %v2772_v8, 4  ;;  %v2742_v18 = vrot.slane %v2741_v10, 4  ;;  %v2783_v30 = vshrl.u32 %v2692_v24, 16  ;;  %v7617_v8 = vld [vmem:[%s9672_s3 + $0x1a8] sm:$0xff]   ;;  %v2698_v10 = vld [vmem:[%s7736_s12 + $0x30] sm:$0xf] }
  0x9f   : > { %v2765_v19 = vor.u32 %v2764_v13, %v2761_v11  ;;  %v2780_v23 = vrot.slane %v2778_v14, 5  ;;  %v2786_v31 = vshll.u32 %v2692_v24, 16  ;;  %v2792_v35 = vshll.u32 %v2693_v25, 16  ;;  %v2699_v11 = vld [vmem:[%s7736_s12 + $0x34] sm:$0xf] }
  0xa0   : > { %v2752_v21 = vrot.slane %v2751_v15, 4  ;;  %v2775_v22 = vor.u32 %v2774_v17, %v2770_v16  ;;  %v2747_v26 = vsel %vm7829_vm4, %v2742_v18, %v2746_v1  ;;  %v2796_v36 = vshrl.u32 %v2693_v25, 16  ;;  %v2700_v13 = vld [vmem:[%s7736_s12 + $0x38] sm:$0x1]  ;;  %v2701_v18 = vld [vmem:[%s7736_s12 + $0x3c] sm:$0xf] }
  0xa1   : > { %v2766_v27 = vrot.slane %v2765_v19, 4  ;;  %v2785_v41 = vrot.slane %v2783_v30, 4  ;;  %v2788_v42 = vrot.slane %v2786_v31, 5  ;;  %v2794_v49 = vrot.slane %v2792_v35, 5  ;;  %v7611_v25 = vld [vmem:[%s7736_s12 + $0x3c] sm:$0xff]  }
  0xa2   : > { %v2757_v32 = vsel %vm7829_vm4, %v2752_v21, %v2756_v5  ;;  %v2776_v34 = vrot.slane %v2775_v22, 4  ;;  %v2798_v50 = vrot.slane %v2796_v36, 4  ;;  %v2802_v51 = vshll.u32 %v2694_v29, 16  ;;  %v7620_v30 = vld [vmem:[%s9672_s3 + $0x158] sm:$0xff]   ;;  %v7614_v36 = vld [vmem:[%s7736_s12 + $0x48] sm:$0xff]  }
  0xa3   : > { %7249 = vmatmul.mubr.bf16.vlgmr.msra.gmra.mxu1 %v7603_v9  ;;  %v6652_v39 = vcombine.low %v2747_v26, %v2757_v32  ;;  %v2771_v40 = vsel %vm7829_vm4, %v2766_v27, %v2770_v16  ;;  %v2789_v56 = vor.u32 %v2788_v42, %v2785_v41  ;;  %v2807_v37 = vshrl.u32 %v2695_v38, 16 }
  0xa4   : > { %7329 = vmatpush3.bf16.msra.mxu1 %v8045_v47  ;;  %v2781_v48 = vsel %vm7829_vm4, %v2776_v34, %v2780_v23  ;;  %7252 = vmatprep.mubr.bf16.mxu1 %v7606_v20  ;;  %v2810_v57 = vshll.u32 %v2695_v38, 16  ;;  %v2799_v47 = vor.u32 %v2798_v50, %v2794_v49  ;;  %v2804_v58 = vrot.slane %v2802_v51, 5  ;;  %v2702_v23 = vld [vmem:[%s7736_s12 + $0x40] sm:$0xf] }
  0xa5   : > { %7296 = vmatprep.mubr.bf16.mxu0 %v6652_v39  ;;  %v6653_v54 = vcombine.low %v2771_v40, %v2781_v48  ;;  %7330 = vmatprep.subr.bf16.mxu1 %v7608_v28  ;;  %v2816_v33 = vshll.u32 %v2696_v44, 16  ;;  %v2820_v43 = vshrl.u32 %v2696_v44, 16  ;;  %v2790_v60 = vrot.slane %v2789_v56, 4  ;;  %v7621_v38 = vld [vmem:[%s9672_s3 + $0x1a0] sm:$0xff]  }
  0xa6   : > { %v2809_v61 = vrot.slane %v2807_v37, 4  ;;  %v2812_v62 = vrot.slane %v2810_v57, 5  ;;  %v2826_v63 = vshll.u32 %v2697_v45, 16  ;;  %v2800_v0 = vrot.slane %v2799_v47, 4 }
  0xa7   : > { %7297 = vmatmul.mubr.bf16.vlgmr.msra.gmra.mxu0 %v6653_v54  ;;  %v2818_v1 = vrot.slane %v2816_v33, 5  ;;  %v2822_v2 = vrot.slane %v2820_v43, 4  ;;  %v2795_v4 = vsel %vm7829_vm4, %v2790_v60, %v2794_v49  ;;  %v2831_v16 = vshrl.u32 %v2698_v10, 16  ;;  %v7624_v49 = vld [vmem:[%s9672_s3 + $0x150] sm:$0xff]   ;;  %v2705_v33 = vld [vmem:[%s7736_s12 + $0x4c] sm:$0xf] }
  0xa8   : > { %7331 = vmatpush3.bf16.msra.mxu1 %v7608_v28  ;;  %7377 = vmatpush3.bf16.msra.mxu0 %v8054_v12  ;;  %v2813_v5 = vor.u32 %v2812_v62, %v2809_v61  ;;  %v2828_v6 = vrot.slane %v2826_v63, 5  ;;  %v2805_v12 = vsel %vm7829_vm4, %v2800_v0, %v2804_v58  ;;  %v2834_v17 = vshll.u32 %v2698_v10, 16  ;;  %v2703_v28 = vld [vmem:[%s7736_s12 + $0x44] sm:$0x1]  ;;  %v2704_v58 = vld [vmem:[%s7736_s12 + $0x48] sm:$0xf] }
  0xa9   : > { %7332 = vmatprep.subr.bf16.mxu1 %v7612_v46  ;;  %7378 = vmatprep.subr.bf16.mxu0 %v7613_v53  ;;  %v2823_v9 = vor.u32 %v2822_v2, %v2818_v1  ;;  %v6654_v14 = vcombine.low %v2795_v4, %v2805_v12  ;;  %v2840_v20 = vshll.u32 %v2699_v11, 16  ;;  %v2844_v21 = vshrl.u32 %v2699_v11, 16  ;;  %v2706_v60 = vld [vmem:[%s7736_s12 + $0x50] sm:$0x1]  ;;  %v2707_v63 = vld [vmem:[%s7736_s12 + $0x54] sm:$0xf] }
  0xaa   : > { %v2814_v15 = vrot.slane %v2813_v5, 4  ;;  %v2850_v22 = vshll.u32 %v2700_v13, 16  ;;  %v2833_v26 = vrot.slane %v2831_v16, 4  ;;  %v2836_v27 = vrot.slane %v2834_v17, 5  ;;  %v7615_v2 = vld [vmem:[%s7736_s12 + $0x54] sm:$0xff]   ;;  %v7618_v13 = vld [vmem:[%s7736_s12 + $0x60] sm:$0xff]  }
  0xab   : > { %7253 = vmatmul.mubr.bf16.gmra.mxu1 %v7607_v55  ;;  %v2824_v19 = vrot.slane %v2823_v9, 4  ;;  %7300 = vmatprep.mubr.bf16.mxu0 %v6654_v14  ;;  %v2855_v29 = vshrl.u32 %v2701_v18, 16  ;;  %v2842_v32 = vrot.slane %v2840_v20, 5  ;;  %v2846_v34 = vrot.slane %v2844_v21, 4  ;;  %v2708_v5 = vld [vmem:[%s7736_s12 + $0x58] sm:$0xf] }
  0xac   : > { %7256 = vmatprep.mubr.bf16.mxu1 %v7610_v59  ;;  %7333 = vmatpush3.bf16.msra.mxu1 %v7612_v46  ;;  %v2819_v24 = vsel %vm7829_vm4, %v2814_v15, %v2818_v1  ;;  %v2852_v35 = vrot.slane %v2850_v22, 5  ;;  %v2837_v40 = vor.u32 %v2836_v27, %v2833_v26  ;;  %v2858_v42 = vshll.u32 %v2701_v18, 16  ;;  %v2709_v11 = vld [vmem:[%s7736_s12 + $0x5c] sm:$0x1]  ;;  %v7629_v18 = vld [vmem:[%s9672_s3 + $0x190] sm:$0xff]  }
  0xad   : > { %7379 = vmatpush3.bf16.msra.mxu0 %v7613_v53  ;;  %v2829_v31 = vsel %vm7829_vm4, %v2824_v19, %v2828_v6  ;;  %7334 = vmatprep.subr.bf16.mxu1 %v7616_v3  ;;  %v2857_v41 = vrot.slane %v2855_v29, 4  ;;  %v2847_v44 = vor.u32 %v2846_v34, %v2842_v32  ;;  %v2864_v45 = vshll.u32 %v2702_v23, 16  ;;  %v7625_v53 = vld [vmem:[%s9672_s3 + $0x198] sm:$0xff]   ;;  %v7628_v6 = vld [vmem:[%s9672_s3 + $0x148] sm:$0xff]   ;;  %v7632_v19 = vld [vmem:[%s9672_s3 + $0x140] sm:$0xff]  }
  0xae   : > { %7380 = vmatprep.subr.bf16.mxu0 %v7617_v8  ;;  %v6655_v39 = vcombine.low %v2819_v24, %v2829_v31  ;;  %v2868_v46 = vshrl.u32 %v2702_v23, 16  ;;  %v2874_v48 = vshll.u32 %v2703_v28, 16  ;;  %v2838_v50 = vrot.slane %v2837_v40, 4  ;;  %v7633_v28 = vld [vmem:[%s9672_s3 + $0x188] sm:$0xff]  }
  0xaf   : > { %v2860_v51 = vrot.slane %v2858_v42, 5  ;;  %v2848_v54 = vrot.slane %v2847_v44, 4  ;;  %v2866_v55 = vrot.slane %v2864_v45, 5  ;;  %v2879_v61 = vshrl.u32 %v2704_v58, 16  ;;  %v2710_v42 = vld [vmem:[%s7736_s12 + $0x60] sm:$0xf] }
  0xb0   : > { %7335 = vmatpush3.bf16.msra.mxu1 %v7616_v3  ;;  %7301 = vmatmul.mubr.bf16.gmra.mxu0 %v6655_v39  ;;  %v2870_v56 = vrot.slane %v2868_v46, 4  ;;  %v2876_v37 = vrot.slane %v2874_v48, 5  ;;  %v2843_v57 = vsel %vm7829_vm4, %v2838_v50, %v2842_v32  ;;  %v2882_v62 = vshll.u32 %v2704_v58, 16  ;;  %v2711_v44 = vld [vmem:[%s7736_s12 + $0x64] sm:$0xf]  ;;  %v7619_v46 = vld [vmem:[%s7736_s12 + $0x6c] sm:$0xff]  }
  0xb1   : > { %7336 = vmatprep.subr.bf16.mxu1 %v7620_v30  ;;  %7381 = vmatpush3.bf16.msra.mxu0 %v7617_v8  ;;  %v2861_v47 = vor.u32 %v2860_v51, %v2857_v41  ;;  %v2853_v43 = vsel %vm7829_vm4, %v2848_v54, %v2852_v35  ;;  %v2888_v3 = vshll.u32 %v2705_v33, 16  ;;  %v2892_v4 = vshrl.u32 %v2705_v33, 16  ;;  %v2712_v48 = vld [vmem:[%s7736_s12 + $0x68] sm:$0x1] }
  0xb2   : > { %7382 = vmatprep.subr.bf16.mxu0 %v7621_v38  ;;  %v2871_v59 = vor.u32 %v2870_v56, %v2866_v55  ;;  %v6656_v0 = vcombine.low %v2843_v57, %v2853_v43  ;;  %v2881_v12 = vrot.slane %v2879_v61, 4  ;;  %v2884_v9 = vrot.slane %v2882_v62, 5  ;;  %v2713_v57 = vld [vmem:[%s7736_s12 + $0x6c] sm:$0xf] }
  0xb3   : > { %7257 = vmatmul.mubr.bf16.gmra.mxu1 %v7611_v25  ;;  %v2862_v1 = vrot.slane %v2861_v47, 4  ;;  %v2898_v10 = vshll.u32 %v2706_v60, 16  ;;  %v2890_v15 = vrot.slane %v2888_v3, 5  ;;  %v2894_v16 = vrot.slane %v2892_v4, 4  ;;  %v2714_v47 = vld [vmem:[%s7736_s12 + $0x70] sm:$0xf] }
  0xb4   : > { %7260 = vmatprep.mubr.bf16.mxu1 %v7614_v36  ;;  %7337 = vmatpush3.bf16.msra.mxu1 %v7620_v30  ;;  %v2872_v8 = vrot.slane %v2871_v59, 4  ;;  %v2903_v17 = vshrl.u32 %v2707_v63, 16  ;;  %v2885_v21 = vor.u32 %v2884_v9, %v2881_v12  ;;  %v2906_v23 = vshll.u32 %v2707_v63, 16  ;;  %v8262_v36 = vld [vmem:[%s9672_s3 + $0x1f8] sm:$0xff]   ;;  %v2715_v60 = vld [vmem:[%s7736_s12 + $0x74] sm:$0x1] }
  0xb5   : > { %7338 = vmatprep.subr.bf16.mxu1 %v7624_v49  ;;  %7383 = vmatpush3.bf16.msra.mxu0 %v7621_v38  ;;  %v2867_v14 = vsel %vm7829_vm4, %v2862_v1, %v2866_v55  ;;  %v2900_v22 = vrot.slane %v2898_v10, 5  ;;  %v2895_v25 = vor.u32 %v2894_v16, %v2890_v15  ;;  %v2912_v27 = vshll.u32 %v2708_v5, 16  ;;  %v7622_v1 = vld [vmem:[%s7736_s12 + $0x78] sm:$0xff]  }
  0xb6   : > { %7304 = vmatprep.mubr.bf16.mxu0 %v6656_v0  ;;  %7384 = vmatprep.subr.bf16.mxu0 %v7625_v53  ;;  %v2877_v20 = vsel %vm7829_vm4, %v2872_v8, %v2876_v37  ;;  %v2905_v26 = vrot.slane %v2903_v17, 4  ;;  %v2886_v29 = vrot.slane %v2885_v21, 4  ;;  %v2908_v30 = vrot.slane %v2906_v23, 5  ;;  %v7623_v21 = vld [vmem:[%s7736_s12 + $0x84] sm:$0xff]  }
  0xb7   : > { %v6657_v24 = vcombine.low %v2867_v14, %v2877_v20  ;;  %v2916_v31 = vshrl.u32 %v2708_v5, 16  ;;  %v2922_v32 = vshll.u32 %v2709_v11, 16  ;;  %v2896_v34 = vrot.slane %v2895_v25, 4 }
  0xb8   : > { %7339 = vmatpush3.bf16.msra.mxu1 %v7624_v49  ;;  %v2914_v35 = vrot.slane %v2912_v27, 5  ;;  %v2891_v38 = vsel %vm7829_vm4, %v2886_v29, %v2890_v15  ;;  %v2909_v39 = vor.u32 %v2908_v30, %v2905_v26  ;;  %v2927_v49 = vshrl.u32 %v2710_v42, 16  ;;  %v8287_v15 = vld [vmem:[%s9672_s3 + $0x238] sm:$0xff]   ;;  %v2718_v27 = vld [vmem:[%s7736_s12 + $0x80] sm:$0x1] }
  0xb9   : > { %7340 = vmatprep.subr.bf16.mxu1 %v7628_v6  ;;  %7385 = vmatpush3.bf16.msra.mxu0 %v7625_v53  ;;  %v2918_v40 = vrot.slane %v2916_v31, 4  ;;  %v2924_v41 = vrot.slane %v2922_v32, 5  ;;  %v2901_v45 = vsel %vm7829_vm4, %v2896_v34, %v2900_v22  ;;  %v2930_v50 = vshll.u32 %v2710_v42, 16  ;;  %v7635_v53 = vld [vmem:[%s9672_s3 + $0x180] sm:$0xff]   ;;  %v2716_v22 = vld [vmem:[%s7736_s12 + $0x78] sm:$0xf] }
  0xba   : > { %7305 = vmatmul.mubr.bf16.gmra.mxu0 %v6657_v24  ;;  %v2936_v51 = vshll.u32 %v2711_v44, 16  ;;  %7386 = vmatprep.subr.bf16.mxu0 %v7629_v18  ;;  %v6658_v54 = vcombine.low %v2891_v38, %v2901_v45  ;;  %v2910_v55 = vrot.slane %v2909_v39, 4  ;;  %v2940_v37 = vshrl.u32 %v2711_v44, 16  ;;  %v2717_v26 = vld [vmem:[%s7736_s12 + $0x7c] sm:$0xf] }
  0xbb   : > { %7261 = vmatmul.mubr.bf16.gmra.mxu1 %v7615_v2  ;;  %v2919_v56 = vor.u32 %v2918_v40, %v2914_v35  ;;  %v2929_v58 = vrot.slane %v2927_v49, 4  ;;  %v2932_v33 = vrot.slane %v2930_v50, 5  ;;  %v2946_v59 = vshll.u32 %v2712_v48, 16  ;;  %v2719_v34 = vld [vmem:[%s7736_s12 + $0x84] sm:$0xf] }
  0xbc   : > { %7264 = vmatprep.mubr.bf16.mxu1 %v7618_v13  ;;  %7341 = vmatpush3.bf16.msra.mxu1 %v7628_v6  ;;  %v2938_v43 = vrot.slane %v2936_v51, 5  ;;  %v2915_v61 = vsel %vm7829_vm4, %v2910_v55, %v2914_v35  ;;  %v2942_v63 = vrot.slane %v2940_v37, 4  ;;  %v2951_v0 = vshrl.u32 %v2713_v57, 16  ;;  %v7626_v35 = vld [vmem:[%s7736_s12 + $0x90] sm:$0xff]   ;;  %v2720_v42 = vld [vmem:[%s7736_s12 + $0x88] sm:$0xf] }
  0xbd   : > { %7342 = vmatprep.subr.bf16.mxu1 %v7632_v19  ;;  %7387 = vmatpush3.bf16.msra.mxu0 %v7629_v18  ;;  %v2920_v62 = vrot.slane %v2919_v56, 4  ;;  %v2933_v2 = vor.u32 %v2932_v33, %v2929_v58  ;;  %v2948_v3 = vrot.slane %v2946_v59, 5  ;;  %v2954_v4 = vshll.u32 %v2713_v57, 16  ;;  %v2721_v48 = vld [vmem:[%s7736_s12 + $0x8c] sm:$0x1] }
  0xbe   : > { %7388 = vmatprep.subr.bf16.mxu0 %v7633_v28  ;;  %7308 = vmatprep.mubr.bf16.mxu0 %v6658_v54  ;;  %v2960_v5 = vshll.u32 %v2714_v47, 16  ;;  %v2943_v8 = vor.u32 %v2942_v63, %v2938_v43  ;;  %v2953_v12 = vrot.slane %v2951_v0, 4  ;;  %v2964_v9 = vshrl.u32 %v2714_v47, 16 }
  0xbf   : > { %v2925_v6 = vsel %vm7829_vm4, %v2920_v62, %v2924_v41  ;;  %v2934_v11 = vrot.slane %v2933_v2, 4  ;;  %v2956_v13 = vrot.slane %v2954_v4, 5  ;;  %v2970_v18 = vshll.u32 %v2715_v60, 16  ;;  %v7630_v2 = vld [vmem:[%s7736_s12 + $0xa8] sm:$0xff]   ;;  %v2722_v4 = vld [vmem:[%s7736_s12 + $0x90] sm:$0xf] }
  0xc0   : > { %7343 = vmatpush3.bf16.msra.mxu1 %v7632_v19  ;;  %v6659_v10 = vcombine.low %v2915_v61, %v2925_v6  ;;  %v2962_v14 = vrot.slane %v2960_v5, 5  ;;  %v2944_v16 = vrot.slane %v2943_v8, 4  ;;  %v2966_v17 = vrot.slane %v2964_v9, 4  ;;  %v7627_v61 = vld [vmem:[%s7736_s12 + $0x9c] sm:$0xff]   ;;  %v2723_v5 = vld [vmem:[%s7736_s12 + $0x94] sm:$0xf] }
  0xc1   : > { %7424 = vmatprep.subr.bf16.mxu1 %v8262_v36  ;;  %7389 = vmatpush3.bf16.msra.mxu0 %v7633_v28  ;;  %v2939_v19 = vsel %vm7829_vm4, %v2934_v11, %v2938_v43  ;;  %v2957_v20 = vor.u32 %v2956_v13, %v2953_v12  ;;  %v2972_v25 = vrot.slane %v2970_v18, 5  ;;  %v2975_v28 = vshrl.u32 %v2716_v22, 16  ;;  %v2724_v9 = vld [vmem:[%s7736_s12 + $0x98] sm:$0x1]  ;;  %v2725_v11 = vld [vmem:[%s7736_s12 + $0x9c] sm:$0xf] }
  0xc2   : > { %7390 = vmatprep.subr.bf16.mxu0 %v7635_v53  ;;  %7309 = vmatmul.mubr.bf16.gmra.mxu0 %v6659_v10  ;;  %v2949_v23 = vsel %vm7829_vm4, %v2944_v16, %v2948_v3  ;;  %v2967_v24 = vor.u32 %v2966_v17, %v2962_v14  ;;  %v2978_v31 = vshll.u32 %v2716_v22, 16  ;;  %v2984_v32 = vshll.u32 %v2717_v26, 16  ;;  %v2726_v18 = vld [vmem:[%s7736_s12 + $0xa0] sm:$0xf] }
  0xc3   : > { %7265 = vmatmul.mubr.bf16.gmra.mxu1 %v7619_v46  ;;  %v6660_v29 = vcombine.low %v2939_v19, %v2949_v23  ;;  %v2958_v30 = vrot.slane %v2957_v20, 4  ;;  %v2977_v39 = vrot.slane %v2975_v28, 4  ;;  %v2988_v40 = vshrl.u32 %v2717_v26, 16  ;;  %v2727_v23 = vld [vmem:[%s7736_s12 + $0xa4] sm:$0x1] }
  0xc4   : > { %7268 = vmatprep.mubr.bf16.mxu1 %v7622_v1  ;;  %v2968_v38 = vrot.slane %v2967_v24, 4  ;;  %v2994_v41 = vshll.u32 %v2718_v27, 16  ;;  %v2980_v45 = vrot.slane %v2978_v31, 5  ;;  %v2986_v46 = vrot.slane %v2984_v32, 5 }
  0xc5   : > { %7391 = vmatpush3.bf16.msra.mxu0 %v7635_v53  ;;  %7312 = vmatprep.mubr.bf16.mxu0 %v6660_v29  ;;  %v2963_v44 = vsel %vm7829_vm4, %v2958_v30, %v2962_v14  ;;  %v2999_v49 = vshrl.u32 %v2719_v34, 16  ;;  %v2990_v51 = vrot.slane %v2988_v40, 4  ;;  %v3002_v54 = vshll.u32 %v2719_v34, 16 }
  0xc6   : > { %7472 = vmatprep.subr.bf16.mxu0 %v8287_v15  ;;  %v2973_v50 = vsel %vm7829_vm4, %v2968_v38, %v2972_v25  ;;  %v2996_v53 = vrot.slane %v2994_v41, 5  ;;  %v2981_v56 = vor.u32 %v2980_v45, %v2977_v39  ;;  %v3008_v57 = vshll.u32 %v2720_v42, 16  ;;  %v7631_v39 = vld [vmem:[%s7736_s12 + $0xb4] sm:$0xff]  }
  0xc7   : > { %v6661_v55 = vcombine.low %v2963_v44, %v2973_v50  ;;  %v3001_v37 = vrot.slane %v2999_v49, 4  ;;  %v2991_v47 = vor.u32 %v2990_v51, %v2986_v46  ;;  %v3004_v58 = vrot.slane %v3002_v54, 5  ;;  %v2728_v51 = vld [vmem:[%s7736_s12 + $0xa8] sm:$0xf] }
  0xc8   : > { %v3012_v33 = vshrl.u32 %v2720_v42, 16  ;;  %v3018_v43 = vshll.u32 %v2721_v48, 16  ;;  %v2982_v59 = vrot.slane %v2981_v56, 4  ;;  %v3010_v60 = vrot.slane %v3008_v57, 5  ;;  %v2730_v56 = vld [vmem:[%s7736_s12 + $0xb0] sm:$0x1] }
  0xc9   : > { %v2992_v62 = vrot.slane %v2991_v47, 4  ;;  %v3005_v63 = vor.u32 %v3004_v58, %v3001_v37  ;;  %v3023_v10 = vshrl.u32 %v2722_v4, 16  ;;  %v3026_v14 = vshll.u32 %v2722_v4, 16 }
  0xca   : > { %7313 = vmatmul.mubr.bf16.gmra.mxu0 %v6661_v55  ;;  %v3014_v0 = vrot.slane %v3012_v33, 4  ;;  %v3020_v1 = vrot.slane %v3018_v43, 5  ;;  %v2987_v3 = vsel %vm7829_vm4, %v2982_v59, %v2986_v46  ;;  %v3032_v16 = vshll.u32 %v2723_v5, 16  ;;  %v2729_v55 = vld [vmem:[%s7736_s12 + $0xac] sm:$0xf] }
  0xcb   : > { %7269 = vmatmul.mubr.bf16.gmra.mxu1 %v7623_v21  ;;  %v2997_v6 = vsel %vm7829_vm4, %v2992_v62, %v2996_v53  ;;  %v3006_v8 = vrot.slane %v3005_v63, 4  ;;  %v3036_v17 = vshrl.u32 %v2723_v5, 16  ;;  %v3025_v21 = vrot.slane %v3023_v10, 4  ;;  %v2731_v59 = vld [vmem:[%s7736_s12 + $0xb4] sm:$0xf] }
  0xcc   : > { %7272 = vmatprep.mubr.bf16.mxu1 %v7626_v35  ;;  %v3015_v12 = vor.u32 %v3014_v0, %v3010_v60  ;;  %v6662_v13 = vcombine.low %v2987_v3, %v2997_v6  ;;  %v3042_v22 = vshll.u32 %v2724_v9, 16  ;;  %v3028_v24 = vrot.slane %v3026_v14, 5  ;;  %v3504_v6 = vld [vmem:[%s7736_s12] sm:$0xe] }
  0xcd   : > { %v3011_v19 = vsel %vm7829_vm4, %v3006_v8, %v3010_v60  ;;  %v3034_v25 = vrot.slane %v3032_v16, 5  ;;  %v3038_v26 = vrot.slane %v3036_v17, 4  ;;  %v3047_v27 = vshrl.u32 %v2725_v11, 16  ;;  %v2732_v60 = vld [vmem:[%s7736_s12 + $0xb8] sm:$0xf] }
  0xce   : > { %v3016_v20 = vrot.slane %v3015_v12, 4  ;;  %7316 = vmatprep.mubr.bf16.mxu0 %v6662_v13  ;;  %v3044_v29 = vrot.slane %v3042_v22, 5  ;;  %v3050_v30 = vshll.u32 %v2725_v11, 16  ;;  %v3056_v31 = vshll.u32 %v2726_v18, 16  ;;  %v3505_v11 = vld [vmem:[%s7736_s12 + $0x4] sm:$0xf] }
  0xcf   : > { %v3029_v34 = vor.u32 %v3028_v24, %v3025_v21  ;;  %v3039_v35 = vor.u32 %v3038_v26, %v3034_v25  ;;  %v3049_v38 = vrot.slane %v3047_v27, 4  ;;  %v3060_v42 = vshrl.u32 %v2726_v18, 16  ;;  %v3506_v18 = vld [vmem:[%s7736_s12 + $0x8] sm:$0x1]  ;;  %v3508_v24 = vld [vmem:[%s7736_s12 + $0x10] sm:$0xf] }
  0xd0   : > { %v3021_v28 = vsel %vm7829_vm4, %v3016_v20, %v3020_v1  ;;  %v3052_v40 = vrot.slane %v3050_v30, 5  ;;  %v3058_v41 = vrot.slane %v3056_v31, 5  ;;  %v3066_v44 = vshll.u32 %v2727_v23, 16  ;;  %v2733_v1 = vld [vmem:[%s7736_s12 + $0xbc] sm:$0x1] }
  0xd1   : > { %v6663_v32 = vcombine.low %v3011_v19, %v3021_v28  ;;  %v3030_v45 = vrot.slane %v3029_v34, 4  ;;  %v3040_v46 = vrot.slane %v3039_v35, 4  ;;  %v3062_v49 = vrot.slane %v3060_v42, 4  ;;  %v3507_v23 = vld [vmem:[%s7736_s12 + $0xc] sm:$0xe] }
  0xd2   : > { %v3053_v48 = vor.u32 %v3052_v40, %v3049_v38  ;;  %v3068_v50 = vrot.slane %v3066_v44, 5  ;;  %v3071_v37 = vshrl.u32 %v2728_v51, 16  ;;  %v3074_v57 = vshll.u32 %v2728_v51, 16 }
  0xd3   : > { %7273 = vmatmul.mubr.bf16.gmra.mxu1 %v7627_v61  ;;  %7317 = vmatmul.mubr.bf16.gmra.mxu0 %v6663_v32  ;;  %v3035_v53 = vsel %vm7829_vm4, %v3030_v45, %v3034_v25  ;;  %v3045_v54 = vsel %vm7829_vm4, %v3040_v46, %v3044_v29  ;;  %v3063_v33 = vor.u32 %v3062_v49, %v3058_v41  ;;  %v3080_v43 = vshll.u32 %v2729_v55, 16  ;;  %v3509_v29 = vld [vmem:[%s7736_s12 + $0x14] sm:$0x1] }
  0xd4   : > { %7276 = vmatprep.mubr.bf16.mxu1 %v7630_v2  ;;  %v6664_v47 = vcombine.low %v3035_v53, %v3045_v54  ;;  %v3054_v58 = vrot.slane %v3053_v48, 4  ;;  %v3073_v61 = vrot.slane %v3071_v37, 4  ;;  %v3076_v62 = vrot.slane %v3074_v57, 5  ;;  %v3510_v54 = vld [vmem:[%s7736_s12 + $0x18] sm:$0xe] }
  0xd5   : > { %v3084_v63 = vshrl.u32 %v2729_v55, 16  ;;  %v3090_v0 = vshll.u32 %v2730_v56, 16  ;;  %v3064_v3 = vrot.slane %v3063_v33, 4  ;;  %v3082_v4 = vrot.slane %v3080_v43, 5  ;;  %v3512_v33 = vld [vmem:[%s7736_s12 + $0x20] sm:$0x1] }
  0xd6   : > { %7320 = vmatprep.mubr.bf16.mxu0 %v6664_v47  ;;  %v3059_v2 = vsel %vm7829_vm4, %v3054_v58, %v3058_v41  ;;  %v3095_v5 = vshrl.u32 %v2731_v59, 16  ;;  %v3077_v8 = vor.u32 %v3076_v62, %v3073_v61  ;;  %v3098_v10 = vshll.u32 %v2731_v59, 16  ;;  %v7636_v47 = vld [vmem:[%s7741_s15] sm:$0xff]   ;;  %v3511_v58 = vld [vmem:[%s7736_s12 + $0x1c] sm:$0xf] }
  0xd7   : > { %v3086_v12 = vrot.slane %v3084_v63, 4  ;;  %v3092_v9 = vrot.slane %v3090_v0, 5  ;;  %v3069_v13 = vsel %vm7829_vm4, %v3064_v3, %v3068_v50  ;;  %v3104_v16 = vshll.u32 %v2732_v60, 16  ;;  %v3513_v62 = vld [vmem:[%s7736_s12 + $0x24] sm:$0xe]  ;;  %v7638_v3 = vld [vmem:[%s9672_s3 + $0x1f0] sm:$0xff]  }
  0xd8   : > { %v3097_v14 = vrot.slane %v3095_v5, 4  ;;  %v3108_v17 = vshrl.u32 %v2732_v60, 16  ;;  %v6665_v19 = vcombine.low %v3059_v2, %v3069_v13  ;;  %v3078_v20 = vrot.slane %v3077_v8, 4  ;;  %v3514_v0 = vld [vmem:[%s7736_s12 + $0x28] sm:$0xf] }
  0xd9   : > { %v3087_v21 = vor.u32 %v3086_v12, %v3082_v4  ;;  %v3100_v22 = vrot.slane %v3098_v10, 5  ;;  %v3106_v25 = vrot.slane %v3104_v16, 5  ;;  %v3114_v27 = vshll.u32 %v2733_v1, 16  ;;  %v3515_v1 = vld [vmem:[%s7736_s12 + $0x2c] sm:$0x1] }
  0xda   : > { %v3110_v26 = vrot.slane %v3108_v17, 4  ;;  %v6676_v28 = vrot.slane %v3504_v6, 9  ;;  %v3083_v30 = vsel %vm7829_vm4, %v3078_v20, %v3082_v4  ;;  %v3602_v34 = vrot.slane %v3505_v11, 5  ;;  %v7642_v13 = vld [vmem:[%s9672_s3 + $0x1e8] sm:$0xff]   ;;  %v7640_v17 = vld [vmem:[%s7741_s15 + $0x18] sm:$0xff]  }
  0xdb   : > { %7277 = vmatmul.mubr.bf16.gmra.mxu1 %v7631_v39  ;;  %7321 = vmatmul.mubr.bf16.gmra.mxu0 %v6665_v19  ;;  %v3088_v31 = vrot.slane %v3087_v21, 4  ;;  %v3101_v32 = vor.u32 %v3100_v22, %v3097_v14  ;;  %v3116_v38 = vrot.slane %v3114_v27, 5  ;;  %v3605_v39 = vrot.slane %v3506_v18, 5  ;;  %v3516_v18 = vld [vmem:[%s7736_s12 + $0x30] sm:$0xe] }
  0xdc   : > { %v3111_v35 = vor.u32 %v3110_v26, %v3106_v25  ;;  %v6677_v40 = vrot.slane %v3507_v23, 9  ;;  %v3603_v44 = vsel %vm7849_vm5, %v6676_v28, %v3602_v34  ;;  %v3604_v45 = vrot.slane %v3602_v34, 4  ;;  %v3517_v20 = vld [vmem:[%s7736_s12 + $0x34] sm:$0xf]  ;;  %v3518_v21 = vld [vmem:[%s7736_s12 + $0x38] sm:$0x1] }
  0xdd   : > { %v3093_v41 = vsel %vm7829_vm4, %v3088_v31, %v3092_v9  ;;  %v3102_v42 = vrot.slane %v3101_v32, 4  ;;  %v3609_v49 = vrot.slane %v3508_v24, 5  ;;  %v3612_v50 = vrot.slane %v3509_v29, 5  ;;  %v7637_v9 = vld [vmem:[%s7741_s15 + $0xc] sm:$0xff]   ;;  %v3520_v26 = vld [vmem:[%s7736_s12 + $0x40] sm:$0xf] }
  0xde   : > { %v6666_v46 = vcombine.low %v3083_v30, %v3093_v41  ;;  %v3112_v48 = vrot.slane %v3111_v35, 4  ;;  %v3606_v53 = vsel %vm7849_vm5, %v3604_v45, %v3605_v39  ;;  %v6678_v59 = vrot.slane %v3510_v54, 9  ;;  %v7643_v23 = vld [vmem:[%s9672_s3 + $0x230] sm:$0xff]   ;;  %v3521_v28 = vld [vmem:[%s7736_s12 + $0x44] sm:$0x1]  ;;  %v7647_v39 = vld [vmem:[%s9672_s3 + $0x228] sm:$0xff]  }
  0xdf   : > { %v3107_v51 = vsel %vm7829_vm4, %v3102_v42, %v3106_v25  ;;  %v6708_v56 = vcombine.low %v3603_v44, %v3606_v53  ;;  %v3610_v37 = vsel %vm7849_vm5, %v6677_v40, %v3609_v49  ;;  %v3611_v57 = vrot.slane %v3609_v49, 4  ;;  %v3519_v25 = vld [vmem:[%s7736_s12 + $0x3c] sm:$0xe]  ;;  %v7646_v31 = vld [vmem:[%s9672_s3 + $0x1e0] sm:$0xff]   ;;  %v3523_v49 = vld [vmem:[%s7736_s12 + $0x4c] sm:$0xf] }
  0xe0   : > { %7324 = vmatprep.mubr.bf16.mxu0 %v6666_v46  ;;  %v3117_v55 = vsel %vm7829_vm4, %v3112_v48, %v3116_v38  ;;  %v3616_v60 = vrot.slane %v3511_v58, 5  ;;  %v3619_v61 = vrot.slane %v3512_v33, 5  ;;  %v6679_v2 = vrot.slane %v3513_v62, 9  ;;  %v7641_v44 = vld [vmem:[%s7741_s15 + $0x24] sm:$0xff]   ;;  %v7644_v54 = vld [vmem:[%s7741_s15 + $0x30] sm:$0xff]   ;;  %v7650_v33 = vld [vmem:[%s9672_s3 + $0x1d8] sm:$0xff]  }
  0xe1   : > { %v6667_v43 = vcombine.low %v3107_v51, %v3117_v55  ;;  %7344 = vmatprep.mubr.bf16.mxu1 %v6708_v56  ;;  %v3613_v63 = vsel %vm7849_vm5, %v3611_v57, %v3612_v50  ;;  %v3623_v8 = vrot.slane %v3514_v0, 5  ;;  %v3626_v12 = vrot.slane %v3515_v1, 5  ;;  %v3522_v48 = vld [vmem:[%s7736_s12 + $0x48] sm:$0xe]  ;;  %v3524_v50 = vld [vmem:[%s7736_s12 + $0x50] sm:$0x1] }
  0xe2   : > { %v6709_v4 = vcombine.low %v3610_v37, %v3613_v63  ;;  %v3617_v5 = vsel %vm7849_vm5, %v6678_v59, %v3616_v60  ;;  %v3618_v6 = vrot.slane %v3616_v60, 4  ;;  %v6680_v22 = vrot.slane %v3516_v18, 9  ;;  %v3525_v57 = vld [vmem:[%s7736_s12 + $0x54] sm:$0xe]  ;;  %v3527_v58 = vld [vmem:[%s7736_s12 + $0x5c] sm:$0x1] }
  0xe3   : > { %7325 = vmatmul.mubr.bf16.gmra.mxu0 %v6667_v43  ;;  %v3625_v11 = vrot.slane %v3623_v8, 4  ;;  %v3624_v16 = vsel %vm7849_vm5, %v6679_v2, %v3623_v8  ;;  %v3633_v24 = vrot.slane %v3518_v21, 5  ;;  %v6681_v29 = vrot.slane %v3519_v25, 9  ;;  %v7651_v0 = vld [vmem:[%s9672_s3 + $0x220] sm:$0xff]   ;;  %v3531_v21 = vld [vmem:[%s7736_s12 + $0x6c] sm:$0xe] }
  0xe4   : > { %7392 = vmatprep.mubr.bf16.mxu0 %v7636_v47  ;;  %7345 = vmatmul.mubr.bf16.vlgmr.msra.gmra.mxu1 %v6709_v4  ;;  %v3620_v10 = vsel %vm7849_vm5, %v3618_v6, %v3619_v61  ;;  %v3637_v30 = vrot.slane %v3520_v26, 5  ;;  %v3640_v35 = vrot.slane %v3521_v28, 5  ;;  %v6682_v55 = vrot.slane %v3522_v48, 9  ;;  %v3526_v47 = vld [vmem:[%s7736_s12 + $0x58] sm:$0xf]  ;;  %v7645_v18 = vld [vmem:[%s7741_s15 + $0x3c] sm:$0xff]  }
  0xe5   : > { %7425 = vmatpush3.bf16.msra.mxu1 %v8262_v36  ;;  %v6710_v14 = vcombine.low %v3617_v5, %v3620_v10  ;;  %v3627_v19 = vsel %vm7849_vm5, %v3625_v11, %v3626_v12  ;;  %v3630_v36 = vrot.slane %v3517_v20, 5  ;;  %v3644_v56 = vrot.slane %v3523_v49, 5  ;;  %v7648_v26 = vld [vmem:[%s7741_s15 + $0x48] sm:$0xff]   ;;  %v3534_v49 = vld [vmem:[%s7736_s12 + $0x78] sm:$0xe] }
  0xe6   : > { %7426 = vmatprep.subr.bf16.mxu1 %v7638_v3  ;;  %v6711_v27 = vcombine.low %v3624_v16, %v3627_v19  ;;  %v3639_v38 = vrot.slane %v3637_v30, 4  ;;  %v3638_v46 = vsel %vm7849_vm5, %v6681_v29, %v3637_v30  ;;  %v3647_v37 = vrot.slane %v3524_v50, 5  ;;  %v7658_v29 = vld [vmem:[%s9672_s3 + $0x1c8] sm:$0xff]   ;;  %v3535_v50 = vld [vmem:[%s7736_s12 + $0x7c] sm:$0xf] }
  0xe7   : > { %7348 = vmatprep.mubr.bf16.mxu1 %v6710_v14  ;;  %v3631_v32 = vsel %vm7849_vm5, %v6680_v22, %v3630_v36  ;;  %v3632_v34 = vrot.slane %v3630_v36, 4  ;;  %v3645_v60 = vsel %vm7849_vm5, %v6682_v55, %v3644_v56  ;;  %v3646_v61 = vrot.slane %v3644_v56, 4  ;;  %v3530_v14 = vld [vmem:[%s7736_s12 + $0x68] sm:$0x1]  ;;  %v3532_v22 = vld [vmem:[%s7736_s12 + $0x70] sm:$0xf] }
  0xe8   : > { %v3641_v53 = vsel %vm7849_vm5, %v3639_v38, %v3640_v35  ;;  %v6683_v62 = vrot.slane %v3525_v57, 9  ;;  %v3651_v63 = vrot.slane %v3526_v47, 5  ;;  %v3654_v8 = vrot.slane %v3527_v58, 5  ;;  %v7659_v38 = vld [vmem:[%s9672_s3 + $0x210] sm:$0xff]   ;;  %v3537_v56 = vld [vmem:[%s7736_s12 + $0x84] sm:$0xe] }
  0xe9   : > { %7427 = vmatpush3.bf16.msra.mxu1 %v7638_v3  ;;  %v3634_v42 = vsel %vm7849_vm5, %v3632_v34, %v3633_v24  ;;  %v6713_v1 = vcombine.low %v3638_v46, %v3641_v53  ;;  %v7654_v3 = vld [vmem:[%s9672_s3 + $0x1d0] sm:$0xff]   ;;  %v3648_v5 = vsel %vm7849_vm5, %v3646_v61, %v3647_v37  ;;  %v3661_v20 = vrot.slane %v3530_v14, 5  ;;  %v7662_v47 = vld [vmem:[%s9672_s3 + $0x1c0] sm:$0xff]   ;;  %v3538_v58 = vld [vmem:[%s7736_s12 + $0x88] sm:$0xf] }
  0xea   : > { %7428 = vmatprep.subr.bf16.mxu1 %v7642_v13  ;;  %v6712_v45 = vcombine.low %v3631_v32, %v3634_v42  ;;  %v3653_v6 = vrot.slane %v3651_v63, 4  ;;  %v6714_v12 = vcombine.low %v3645_v60, %v3648_v5  ;;  %v3652_v24 = vsel %vm7849_vm5, %v6683_v62, %v3651_v63  ;;  %v7652_v5 = vld [vmem:[%s7741_s15 + $0x60] sm:$0xff]   ;;  %v3540_v14 = vld [vmem:[%s7736_s12 + $0x90] sm:$0xe] }
  0xeb   : > { %7393 = vmatmul.mubr.bf16.vlgmr.msra.gmra.mxu0 %v7637_v9  ;;  %v3528_v9 = vld [vmem:[%s7736_s12 + $0x60] sm:$0xe]  ;;  %v3665_v28 = vrot.slane %v3532_v22, 5  ;;  %v6685_v32 = vrot.slane %v3531_v21, 9  ;;  %v6686_v53 = vrot.slane %v3534_v49, 9  ;;  %v6687_v61 = vrot.slane %v3537_v56, 9 }
  0xec   : > { %7473 = vmatpush3.bf16.msra.mxu0 %v8287_v15  ;;  %7396 = vmatprep.mubr.bf16.mxu0 %v7640_v17  ;;  %v6684_v16 = vrot.slane %v3528_v9, 9  ;;  %v7655_v17 = vld [vmem:[%s9672_s3 + $0x218] sm:$0xff]   ;;  %v3655_v25 = vsel %vm7849_vm5, %v3653_v6, %v3654_v8  ;;  %v3679_v62 = vrot.slane %v3538_v58, 5  ;;  %v7666_v22 = vld [vmem:[%s9672_s3 + $0x200] sm:$0xff]   ;;  %v3548_v56 = vld [vmem:[%s7736_s12 + $0xb0] sm:$0x1] }
  0xed   : > { %7349 = vmatmul.mubr.bf16.gmra.mxu1 %v6711_v27  ;;  %7474 = vmatprep.subr.bf16.mxu0 %v7643_v23  ;;  %v3533_v27 = vld [vmem:[%s7736_s12 + $0x74] sm:$0x1]  ;;  %v6715_v42 = vcombine.low %v3652_v24, %v3655_v25  ;;  %v7656_v58 = vld [vmem:[%s7741_s15 + $0x78] sm:$0xff]  }
  0xee   : > { %7429 = vmatpush3.bf16.msra.mxu1 %v7642_v13  ;;  %7352 = vmatprep.mubr.bf16.mxu1 %v6712_v45  ;;  %v3529_v13 = vld [vmem:[%s7736_s12 + $0x64] sm:$0xf] }
  0xef   : > { %7430 = vmatprep.subr.bf16.mxu1 %v7646_v31  ;;  %v3658_v19 = vrot.slane %v3529_v13, 5 }
  0xf0   : > { %7475 = vmatpush3.bf16.msra.mxu0 %v7643_v23 }
  0xf1   : > { %7476 = vmatprep.subr.bf16.mxu0 %v7647_v39  ;;  %v3659_v30 = vsel %vm7849_vm5, %v6684_v16, %v3658_v19 }
  0xf2   : > { %7431 = vmatpush3.bf16.msra.mxu1 %v7646_v31  ;;  %v3660_v31 = vrot.slane %v3658_v19, 4  ;;  %v6688_v19 = vrot.slane %v3540_v14, 9 }
  0xf3   : > { %7397 = vmatmul.mubr.bf16.gmra.mxu0 %v7641_v44  ;;  %7432 = vmatprep.subr.bf16.mxu1 %v7650_v33 }
  0xf4   : > { %7400 = vmatprep.mubr.bf16.mxu0 %v7644_v54  ;;  %7477 = vmatpush3.bf16.msra.mxu0 %v7647_v39  ;;  %v3667_v39 = vrot.slane %v3665_v28, 4  ;;  %v3662_v44 = vsel %vm7849_vm5, %v3660_v31, %v3661_v20  ;;  %v3672_v54 = vrot.slane %v3535_v50, 5 }
  0xf5   : > { %7353 = vmatmul.mubr.bf16.gmra.mxu1 %v6713_v1  ;;  %7478 = vmatprep.subr.bf16.mxu0 %v7651_v0  ;;  %v6716_v48 = vcombine.low %v3659_v30, %v3662_v44  ;;  %v7663_v1 = vld [vmem:[%s9672_s3 + $0x208] sm:$0xff]  }
  0xf6   : > { %7356 = vmatprep.mubr.bf16.mxu1 %v6714_v12  ;;  %7433 = vmatpush3.bf16.msra.mxu1 %v7650_v33  ;;  %v3539_v33 = vld [vmem:[%s7736_s12 + $0x8c] sm:$0x1]  ;;  %v3674_v60 = vrot.slane %v3672_v54, 4  ;;  %v3673_v6 = vsel %vm7849_vm5, %v6686_v53, %v3672_v54  ;;  %v3681_v12 = vrot.slane %v3679_v62, 4  ;;  %v3546_v54 = vld [vmem:[%s7736_s12 + $0xa8] sm:$0xe] }
  0xf7   : > { %7434 = vmatprep.subr.bf16.mxu1 %v7654_v3  ;;  %v3682_v9 = vrot.slane %v3539_v33, 5 }
  0xf8   : > { %v7122_v40 = vpop.f32.mrf.mxu1  ;;  %v8400_v41 = vpop.f32.mrf.mxu0  ;;  %7479 = vmatpush3.bf16.msra.mxu0 %v7651_v0 }
  0xf9   : > { %804 = vst [vmem:[%s7746_s18 + $0x90] sm:$0xff] %v7122_v40  ;;  %v3668_v40 = vrot.slane %v3533_v27, 5  ;;  %7480 = vmatprep.subr.bf16.mxu0 %v7655_v17  ;;  %v3544_v27 = vld [vmem:[%s7736_s12 + $0xa0] sm:$0xf] }
  0xfa   : > { %v691_v51 = vpop.f32.mrf.mxu1  ;;  %v8411_v15 = vpop.f32.mrf.mxu0  ;;  %7435 = vmatpush3.bf16.msra.mxu1 %v7654_v3  ;;  %v3693_v30 = vrot.slane %v3544_v27, 5 }
  0xfb   : > { %802 = vst [vmem:[%s7746_s18 + $0x80] sm:$0xff] %v691_v51  ;;  %v3536_v51 = vld [vmem:[%s7736_s12 + $0x80] sm:$0x1]  ;;  %7401 = vmatmul.mubr.bf16.gmra.mxu0 %v7645_v18  ;;  %7436 = vmatprep.subr.bf16.mxu1 %v7658_v29  ;;  %v3669_v3 = vsel %vm7849_vm5, %v3667_v39, %v3668_v40  ;;  %v3542_v18 = vld [vmem:[%s7736_s12 + $0x98] sm:$0x1]  ;;  %v7653_v40 = vld [vmem:[%s7741_s15 + $0x6c] sm:$0xff]  }
  0xfc   : > { %v7123_v43 = vpop.f32.mrf.mxu1  ;;  %v8423_v59 = vpop.f32.mrf.mxu0  ;;  %v3675_v55 = vrot.slane %v3536_v51, 5  ;;  %7404 = vmatprep.mubr.bf16.mxu0 %v7648_v26  ;;  %7481 = vmatpush3.bf16.msra.mxu0 %v7655_v17  ;;  %v3541_v17 = vld [vmem:[%s7736_s12 + $0x94] sm:$0xf]  ;;  %v3689_v25 = vrot.slane %v3542_v18, 5  ;;  %v3543_v26 = vld [vmem:[%s7736_s12 + $0x9c] sm:$0xe] }
  0xfd   : > { %805 = vst [vmem:[%s7746_s18 + $0x98] sm:$0xff] %v7123_v43  ;;  %7357 = vmatmul.mubr.bf16.gmra.mxu1 %v6715_v42  ;;  %v7649_v43 = vld [vmem:[%s7741_s15 + $0x54] sm:$0xff]   ;;  %7482 = vmatprep.subr.bf16.mxu0 %v7659_v38  ;;  %v3686_v24 = vrot.slane %v3541_v17, 5  ;;  %v3695_v44 = vrot.slane %v3693_v30, 4 }
  0xfe   : > { %v694_v2 = vpop.f32.mrf.mxu1  ;;  %v8434_v4 = vpop.f32.mrf.mxu0  ;;  %7360 = vmatprep.mubr.bf16.mxu1 %v6716_v48  ;;  %7437 = vmatpush3.bf16.msra.mxu1 %v7658_v29  ;;  %v3676_v8 = vsel %vm7849_vm5, %v3674_v60, %v3675_v55  ;;  %v6689_v29 = vrot.slane %v3543_v26, 9  ;;  %v3547_v55 = vld [vmem:[%s7736_s12 + $0xac] sm:$0xf] }
  0xff   : > { %803 = vst [vmem:[%s7746_s18 + $0x88] sm:$0xff] %v694_v2  ;;  %v3666_v2 = vsel %vm7849_vm5, %v6685_v32, %v3665_v28  ;;  %7438 = vmatprep.subr.bf16.mxu1 %v7662_v47  ;;  %v3545_v28 = vld [vmem:[%s7736_s12 + $0xa4] sm:$0x1]  ;;  %v3688_v39 = vrot.slane %v3686_v24, 4  ;;  %v3687_v42 = vsel %vm7849_vm5, %v6688_v19, %v3686_v24  ;;  %v3700_v60 = vrot.slane %v3547_v55, 5 }
 0x100   : > { %v7126_v10 = vpop.f32.mrf.mxu1  ;;  %v8440_v11 = vpop.f32.mrf.mxu0  ;;  %7483 = vmatpush3.bf16.msra.mxu0 %v7659_v38  ;;  %v6717_v16 = vcombine.low %v3666_v2, %v3669_v3  ;;  %v3683_v38 = vsel %vm7849_vm5, %v3681_v12, %v3682_v9  ;;  %v8536_v53 = vsel %vm7849_vm5, %v6689_v29, %v3693_v30  ;;  %v3551_v2 = vld [vmem:[%s7736_s12 + $0xbc] sm:$0x1]  ;;  %v4550_v29 = vld [vmem:[%s7741_s15 + $0x8] sm:$0x1]  ;;  %v4553_v55 = vld [vmem:[%s7741_s15 + $0x14] sm:$0x1] }
 0x101   : > { %808 = vst [vmem:[%s7746_s18 + $0xb0] sm:$0xff] %v7126_v10  ;;  %7484 = vmatprep.subr.bf16.mxu0 %v7663_v1  ;;  %v3690_v50 = vsel %vm7849_vm5, %v3688_v39, %v3689_v25  ;;  %v3702_v12 = vrot.slane %v3700_v60, 4  ;;  %v4548_v25 = vld [vmem:[%s7741_s15] sm:$0xf] }
 0x102   : > { %v707_v23 = vpop.f32.mrf.mxu1  ;;  %v8451_v36 = vpop.f32.mrf.mxu0  ;;  %7439 = vmatpush3.bf16.msra.mxu1 %v7662_v47  ;;  %v6720_v33 = vcombine.low %v3687_v42, %v3690_v50  ;;  %v4597_v30 = vshrl.u32 %v4548_v25, 16 }
 0x103   : > { %806 = vst [vmem:[%s7746_s18 + $0xa0] sm:$0xff] %v707_v23  ;;  %v6718_v23 = vcombine.low %v3673_v6, %v3676_v8  ;;  %7405 = vmatmul.mubr.bf16.gmra.mxu0 %v7649_v43  ;;  %v6690_v43 = vrot.slane %v3546_v54, 9  ;;  %v4552_v54 = vld [vmem:[%s7741_s15 + $0x10] sm:$0xf] }
 0x104   : > { %v7127_v34 = vpop.f32.mrf.mxu1  ;;  %v8465_v35 = vpop.f32.mrf.mxu0  ;;  %7408 = vmatprep.mubr.bf16.mxu0 %v7652_v5  ;;  %7485 = vmatpush3.bf16.msra.mxu0 %v7663_v1  ;;  %v3550_v1 = vld [vmem:[%s7736_s12 + $0xb8] sm:$0xf] }
 0x105   : > { %809 = vst [vmem:[%s7746_s18 + $0xb8] sm:$0xff] %v7127_v34  ;;  %v3680_v34 = vsel %vm7849_vm5, %v6687_v61, %v3679_v62  ;;  %7361 = vmatmul.mubr.bf16.gmra.mxu1 %v6717_v16  ;;  %7486 = vmatprep.subr.bf16.mxu0 %v7666_v22  ;;  %v3703_v61 = vrot.slane %v3548_v56, 5  ;;  %v3549_v62 = vld [vmem:[%s7736_s12 + $0xb4] sm:$0xe]  ;;  %v8556_v8 = vsel %vm7849_vm5, %v6690_v43, %v3700_v60  ;;  %v3707_v9 = vrot.slane %v3550_v1, 5  ;;  %s6869_s12 = sshll.u32 %s7722_s25, 8 }
 0x106   : > { %v710_v45 = vpop.f32.mrf.mxu1  ;;  %v8473_v46 = vpop.f32.mrf.mxu0  ;;  %7364 = vmatprep.mubr.bf16.mxu1 %v6718_v23  ;;  %v6719_v51 = vcombine.low %v3680_v34, %v3683_v38  ;;  %v6691_v3 = vrot.slane %v3549_v62, 9  ;;  %v7660_v38 = vld [vmem:[%s7741_s15 + $0x90] sm:$0xff]   ;;  %v4630_v1 = vshll.u32 %v4552_v54, 16 }
 0x107   : > { %807 = vst [vmem:[%s7746_s18 + $0xa8] sm:$0xff] %v710_v45  ;;  %v3696_v45 = vrot.slane %v3545_v28, 5  ;;  %v8561_v17 = vsel %vm7849_vm5, %v3702_v12, %v3703_v61  ;;  %v3709_v19 = vrot.slane %v3707_v9, 4  ;;  %v5367_v12 = vld [vmem:[%s7741_s15 + $0x4] sm:$0xf] }
 0x108   : > { %v7130_v37 = vpop.f32.mrf.mxu1  ;;  %v8480_v57 = vpop.f32.mrf.mxu0  ;;  %7487 = vmatpush3.bf16.msra.mxu0 %v7666_v22  ;;  %v8565_v18 = vsel %vm7849_vm5, %v6691_v3, %v3707_v9  ;;  %v7657_v22 = vld [vmem:[%s7741_s15 + $0x84] sm:$0xff]   ;;  %v6722_v24 = vcombine.low %v8556_v8, %v8561_v17  ;;  %v5366_v8 = vld [vmem:[%s7741_s15] sm:$0xe] }
 0x109   : > { %812 = vst [vmem:[%s7746_s18 + $0xd0] sm:$0xff] %v7130_v37 }
 0x10a   : > { %v723_v63 = vpop.f32.mrf.mxu1  ;;  %v8489_v0 = vpop.f32.mrf.mxu0 }
 0x10b   : > { %810 = vst [vmem:[%s7746_s18 + $0xc0] sm:$0xff] %v723_v63  ;;  %v8548_v63 = vsel %vm7849_vm5, %v3695_v44, %v3696_v45  ;;  %7409 = vmatmul.mubr.bf16.gmra.mxu0 %v7653_v40  ;;  %v4616_v44 = vshll.u32 %v4550_v29, 16  ;;  %v4551_v45 = vld [vmem:[%s7741_s15 + $0xc] sm:$0xf]  ;;  %v5464_v29 = vrot.slane %v5367_v12, 5 }
 0x10c   : > { %v7131_v10 = vpop.f32.mrf.mxu1  ;;  %v8504_v13 = vpop.f32.mrf.mxu0  ;;  %7412 = vmatprep.mubr.bf16.mxu0 %v7656_v58  ;;  %v6721_v23 = vcombine.low %v8536_v53, %v8548_v63  ;;  %v4621_v43 = vshrl.u32 %v4551_v45, 16  ;;  %v4624_v63 = vshll.u32 %v4551_v45, 16  ;;  %v5370_v45 = vld [vmem:[%s7741_s15 + $0x10] sm:$0xf] }
 0x10d   : > { %813 = vst [vmem:[%s7746_s18 + $0xd8] sm:$0xff] %v7131_v10  ;;  %v3710_v10 = vrot.slane %v3551_v2, 5  ;;  %7365 = vmatmul.mubr.bf16.gmra.mxu1 %v6719_v51  ;;  %v4599_v51 = vrot.slane %v4597_v30, 4  ;;  %v4634_v2 = vshrl.u32 %v4552_v54, 16  ;;  %v5466_v54 = vrot.slane %v5464_v29, 4 }
 0x10e   : > { %v726_v20 = vpop.f32.mrf.mxu1  ;;  %v8510_v21 = vpop.f32.mrf.mxu0  ;;  %7368 = vmatprep.mubr.bf16.mxu1 %v6720_v33  ;;  %v4618_v33 = vrot.slane %v4616_v44, 5  ;;  %v4626_v17 = vrot.slane %v4624_v63, 5  ;;  %v5471_v63 = vrot.slane %v5370_v45, 5 }
 0x10f   : > { %811 = vst [vmem:[%s7746_s18 + $0xc8] sm:$0xff] %v726_v20  ;;  %v8579_v28 = vsel %vm7849_vm5, %v3709_v19, %v3710_v10  ;;  %v4632_v19 = vrot.slane %v4630_v1, 5 }
 0x110   : > { %v7134_v31 = vpop.f32.mrf.mxu1  ;;  %v8519_v32 = vpop.f32.mrf.mxu0  ;;  %v6723_v39 = vcombine.low %v8565_v18, %v8579_v28 }
 0x111   : > { %816 = vst [vmem:[%s7746_s18 + $0xf0] sm:$0xff] %v7134_v31  ;;  %v4600_v31 = vshll.u32 %v4548_v25, 16 }
 0x112   : > { %v739_v48 = vpop.f32.mrf.mxu1  ;;  %v8529_v49 = vpop.f32.mrf.mxu0 }
 0x113   : > { %814 = vst [vmem:[%s7746_s18 + $0xe0] sm:$0xff] %v739_v48  ;;  %v4602_v53 = vrot.slane %v4600_v31, 5  ;;  %7413 = vmatmul.mubr.bf16.gmra.mxu0 %v7657_v22  ;;  %v5368_v22 = vld [vmem:[%s7741_s15 + $0x8] sm:$0x1] }
 0x114   : > { %v7135_v37 = vpop.f32.mrf.mxu1  ;;  %v8541_v47 = vpop.f32.mrf.mxu0  ;;  %7416 = vmatprep.mubr.bf16.mxu0 %v7660_v38  ;;  %v5467_v44 = vrot.slane %v5368_v22, 5 }
 0x115   : > { %817 = vst [vmem:[%s7746_s18 + $0xf8] sm:$0xff] %v7135_v37  ;;  %v4603_v62 = vor.u32 %v4602_v53, %v4599_v51  ;;  %7369 = vmatmul.mubr.bf16.gmra.mxu1 %v6721_v23  ;;  %v5371_v23 = vld [vmem:[%s7741_s15 + $0x14] sm:$0x1] }
 0x116   : > { %v742_v5 = vpop.f32.mrf.mxu1  ;;  %v8552_v6 = vpop.f32.mrf.mxu0  ;;  %7372 = vmatprep.mubr.bf16.mxu1 %v6722_v24  ;;  %v5474_v1 = vrot.slane %v5371_v23, 5 }
 0x117   : > { %815 = vst [vmem:[%s7746_s18 + $0xe8] sm:$0xff] %v742_v5  ;;  %v4640_v5 = vshll.u32 %v4553_v55, 16  ;;  %v4554_v55 = vld [vmem:[%s7741_s15 + $0x18] sm:$0xf] }
 0x118   : > { %v7154_v14 = vpop.f32.mrf.mxu1  ;;  %v7202_v16 = vpop.f32.mrf.mxu0 }
 0x119   : > { %v1577_v20 = vadd.f32 %v7154_v14, %v8400_v41  ;;  %v4549_v41 = vld [vmem:[%s7741_s15 + $0x4] sm:$0xf] }
 0x11a   : > { %v1448_v26 = vpop.f32.mrf.mxu1  ;;  %v8575_v27 = vpop.f32.mrf.mxu0  ;;  %v4606_v40 = vshll.u32 %v4549_v41, 16  ;;  %v4610_v42 = vshrl.u32 %v4549_v41, 16  ;;  %v6812_v41 = vrot.slane %v5366_v8, 9 }
 0x11b   : > { %v8584_v34 = vadd.f32 %v1448_v26, %v8411_v15  ;;  %v2174_v15 = vadd.f32 %v7202_v16, %v1577_v20  ;;  %v4604_v16 = vrot.slane %v4603_v62, 4  ;;  %v4636_v20 = vrot.slane %v4634_v2, 4 }
 0x11c   : > { %v7155_v48 = vpop.f32.mrf.mxu1  ;;  %v8590_v50 = vpop.f32.mrf.mxu0  ;;  %v4608_v37 = vrot.slane %v4606_v40, 5  ;;  %v4612_v58 = vrot.slane %v4610_v42, 4  ;;  %v4642_v26 = vrot.slane %v4640_v5, 5  ;;  %v8622_v53 = vsel %vm7849_vm5, %v6812_v41, %v5464_v29 }
 0x11d   : > { %v8595_v56 = vadd.f32 %v7155_v48, %v8423_v59  ;;  %2206 = vst [vmem:[%s7746_s18 + $0x10] sm:$0xff] %v2174_v15  ;;  %v4623_v59 = vrot.slane %v4621_v43, 4  ;;  %v4637_v42 = vor.u32 %v4636_v20, %v4632_v19  ;;  %v7661_v48 = vld [vmem:[%s7741_s15 + $0x9c] sm:$0xff]   ;;  %v2172_v2 = vadd.f32 %v8575_v27, %v8584_v34  ;;  %v4557_v34 = vld [vmem:[%s7741_s15 + $0x24] sm:$0xf]  ;;  %7373 = vmatmul.mubr.bf16.gmra.mxu1 %v6723_v39  ;;  %v7665_v39 = vld [vmem:[%s7741_s15 + $0xb4] sm:$0xff]  }
 0x11e   : > { %v1451_v60 = vpop.f32.mrf.mxu1  ;;  %v8597_v61 = vpop.f32.mrf.mxu0  ;;  %v4613_v3 = vor.u32 %v4612_v58, %v4608_v37  ;;  %v4609_v38 = vsel %vm7829_vm4, %v4604_v16, %v4608_v37  ;;  %v7664_v58 = vld [vmem:[%s7741_s15 + $0xa8] sm:$0xff]   ;;  %v4645_v5 = vshrl.u32 %v4554_v55, 16  ;;  %7417 = vmatmul.mubr.bf16.gmra.mxu0 %v7661_v48 }
 0x11f   : > { %v8603_v9 = vadd.f32 %v1451_v60, %v8434_v4  ;;  %v5369_v4 = vld [vmem:[%s7741_s15 + $0xc] sm:$0xe]  ;;  %v4627_v40 = vor.u32 %v4626_v17, %v4623_v59  ;;  %v4638_v62 = vrot.slane %v4637_v42, 4  ;;  %v4556_v59 = vld [vmem:[%s7741_s15 + $0x20] sm:$0x1]  ;;  %2204 = vst [vmem:[%s7746_s18] sm:$0xff] %v2172_v2  ;;  %7420 = vmatprep.mubr.bf16.mxu0 %v7664_v58 }
 0x120   : > { %v7158_v10 = vpop.f32.mrf.mxu1  ;;  %v8605_v14 = vpop.f32.mrf.mxu0  ;;  %v4614_v25 = vrot.slane %v4613_v3, 4  ;;  %v6813_v24 = vrot.slane %v5369_v4, 9  ;;  %v4555_v3 = vld [vmem:[%s7741_s15 + $0x1c] sm:$0xf]  ;;  %v4647_v41 = vrot.slane %v4645_v5, 4 }
 0x121   : > { %v4628_v60 = vrot.slane %v4627_v40, 4  ;;  %v4643_v17 = vsel %vm7829_vm4, %v4638_v62, %v4642_v26  ;;  %v4654_v4 = vshll.u32 %v4555_v3, 16  ;;  %v4664_v40 = vshll.u32 %v4556_v59, 16  ;;  %v4559_v48 = vld [vmem:[%s7741_s15 + $0x2c] sm:$0x1] }
 0x122   : > { %v8609_v30 = vpop.f32.mrf.mxu1  ;;  %v8611_v31 = vpop.f32.mrf.mxu0  ;;  %v4619_v51 = vsel %vm7829_vm4, %v4614_v25, %v4618_v33  ;;  %v8632_v33 = vsel %vm7849_vm5, %v5466_v54, %v5467_v44  ;;  %v8650_v27 = vsel %vm7849_vm5, %v6813_v24, %v5471_v63  ;;  %v5473_v25 = vrot.slane %v5471_v63, 4  ;;  %v4558_v44 = vld [vmem:[%s7741_s15 + $0x28] sm:$0xf]  ;;  %v5372_v59 = vld [vmem:[%s7741_s15 + $0x18] sm:$0xe] }
 0x123   : > { %v6788_v43 = vcombine.low %v4609_v38, %v4619_v51  ;;  %v4633_v16 = vsel %vm7829_vm4, %v4628_v60, %v4632_v19  ;;  %v6844_v20 = vcombine.low %v8622_v53, %v8632_v33  ;;  %v4648_v19 = vshll.u32 %v4554_v55, 16 }
 0x124   : > { %v8625_v15 = vpop.f32.mrf.mxu1  ;;  %v8627_v37 = vpop.f32.mrf.mxu0  ;;  %v8653_v22 = vcombine.low %v4633_v16, %v4643_v17  ;;  %v4658_v38 = vshrl.u32 %v4555_v3, 16  ;;  %v1581_v42 = vadd.f32 %v7158_v10, %v8440_v11  ;;  %v8667_v45 = vsel %vm7849_vm5, %v5473_v25, %v5474_v1  ;;  %v5373_v25 = vld [vmem:[%s7741_s15 + $0x1c] sm:$0xf] }
 0x125   : > { %v4650_v23 = vrot.slane %v4648_v19, 5  ;;  %v4669_v51 = vshrl.u32 %v4557_v34, 16  ;;  %v4672_v53 = vshll.u32 %v4557_v34, 16  ;;  %7440 = vmatprep.mubr.bf16.mxu1 %v6788_v43  ;;  %v6845_v11 = vcombine.low %v8650_v27, %v8667_v45 }
 0x126   : > { %v8638_v8 = vpop.f32.mrf.mxu1  ;;  %v8640_v12 = vpop.f32.mrf.mxu0  ;;  %v4656_v10 = vrot.slane %v4654_v4, 5  ;;  %v4660_v18 = vrot.slane %v4658_v38, 4  ;;  %v4666_v28 = vrot.slane %v4664_v40, 5  ;;  %v4678_v62 = vshll.u32 %v4558_v44, 16  ;;  %7421 = vmatmul.mubr.bf16.gmra.mxu0 %v7665_v39  ;;  %v5377_v39 = vld [vmem:[%s7741_s15 + $0x2c] sm:$0x1]  ;;  %7441 = vmatmul.mubr.bf16.vlgmr.msra.gmra.mxu1 %v8653_v22 }
 0x127   : > { %v4651_v55 = vor.u32 %v4650_v23, %v4647_v41  ;;  %v4671_v58 = vrot.slane %v4669_v51, 4  ;;  %v4674_v60 = vrot.slane %v4672_v53, 5  ;;  %v4682_v1 = vshrl.u32 %v4558_v44, 16  ;;  %v5374_v41 = vld [vmem:[%s7741_s15 + $0x20] sm:$0x1]  ;;  %7488 = vmatprep.mubr.bf16.mxu0 %v6844_v20 }
 0x128   : > { %v8656_v29 = vpop.f32.mrf.mxu1  ;;  %v8658_v26 = vpop.f32.mrf.mxu0  ;;  %v4661_v43 = vor.u32 %v4660_v18, %v4656_v10  ;;  %v4688_v2 = vshll.u32 %v4559_v48, 16  ;;  %v2175_v3 = vadd.f32 %v8590_v50, %v8595_v56  ;;  %v4680_v17 = vrot.slane %v4678_v62, 5  ;;  %v5375_v50 = vld [vmem:[%s7741_s15 + $0x24] sm:$0xe]  ;;  %v5376_v51 = vld [vmem:[%s7741_s15 + $0x28] sm:$0xf] }
 0x129   : > { %v4652_v5 = vrot.slane %v4651_v55, 4  ;;  %v4675_v16 = vor.u32 %v4674_v60, %v4671_v58  ;;  %v1579_v34 = vadd.f32 %v8609_v30, %v8451_v36  ;;  %v4684_v4 = vrot.slane %v4682_v1, 4  ;;  %v4560_v55 = vld [vmem:[%s7741_s15 + $0x30] sm:$0xf] }
 0x12a   : > { %v8670_v54 = vpop.f32.mrf.mxu1  ;;  %v8672_v24 = vpop.f32.mrf.mxu0  ;;  %v4662_v19 = vrot.slane %v4661_v43, 4  ;;  %v4690_v38 = vrot.slane %v4688_v2, 5  ;;  %2207 = vst [vmem:[%s7746_s18 + $0x18] sm:$0xff] %v2175_v3  ;;  %v2173_v40 = vadd.f32 %v8597_v61, %v8603_v9  ;;  %v8700_v23 = vadd.f32 %v8625_v15, %v8465_v35  ;;  %v4562_v3 = vld [vmem:[%s7741_s15 + $0x38] sm:$0x1] }
 0x12b   : > { %v4657_v36 = vsel %vm7829_vm4, %v4652_v5, %v4656_v10  ;;  %v4676_v30 = vrot.slane %v4675_v16, 4  ;;  %v6814_v48 = vrot.slane %v5372_v59, 9  ;;  %v4685_v9 = vor.u32 %v4684_v4, %v4680_v17 }
 0x12c   : > { %v8677_v63 = vpop.f32.mrf.mxu1  ;;  %v8679_v33 = vpop.f32.mrf.mxu0  ;;  %v4667_v61 = vsel %vm7829_vm4, %v4662_v19, %v4666_v28  ;;  %2205 = vst [vmem:[%s7746_s18 + $0x8] sm:$0xff] %v2173_v40  ;;  %v5478_v53 = vrot.slane %v5373_v25, 5  ;;  %v5481_v18 = vrot.slane %v5374_v41, 5  ;;  %v2178_v15 = vadd.f32 %v8605_v14, %v1581_v42  ;;  %v4561_v42 = vld [vmem:[%s7741_s15 + $0x34] sm:$0xf] }
 0x12d   : > { %v6790_v10 = vcombine.low %v4657_v36, %v4667_v61  ;;  %v4681_v35 = vsel %vm7829_vm4, %v4676_v30, %v4680_v17  ;;  %v6815_v20 = vrot.slane %v5375_v50, 9  ;;  %v4686_v58 = vrot.slane %v4685_v9, 4  ;;  %v4563_v41 = vld [vmem:[%s7741_s15 + $0x3c] sm:$0xf]  ;;  %v4564_v30 = vld [vmem:[%s7741_s15 + $0x40] sm:$0xf] }
 0x12e   : > { %v8692_v56 = vpop.f32.mrf.mxu1  ;;  %v8694_v44 = vpop.f32.mrf.mxu0  ;;  %v5479_v28 = vsel %vm7849_vm5, %v6814_v48, %v5478_v53  ;;  %v5480_v60 = vrot.slane %v5478_v53, 4  ;;  %v5485_v62 = vrot.slane %v5376_v51, 5  ;;  %2210 = vst [vmem:[%s7746_s18 + $0x30] sm:$0xff] %v2178_v15  ;;  %v5488_v22 = vrot.slane %v5377_v39, 5  ;;  %7489 = vmatmul.mubr.bf16.vlgmr.msra.gmra.mxu0 %v6845_v11 }
 0x12f   : > { %7444 = vmatprep.mubr.bf16.mxu1 %v6790_v10  ;;  %v1580_v2 = vadd.f32 %v8638_v8, %v8473_v46  ;;  %v2176_v14 = vadd.f32 %v8611_v31, %v1579_v34  ;;  %v4693_v59 = vshrl.u32 %v4560_v55, 16  ;;  %v4691_v5 = vsel %vm7829_vm4, %v4686_v58, %v4690_v38 }
 0x130   : > { %v8714_v43 = vpop.f32.mrf.mxu1  ;;  %v8716_v1 = vpop.f32.mrf.mxu0  ;;  %v5482_v16 = vsel %vm7849_vm5, %v5480_v60, %v5481_v18  ;;  %v8730_v17 = vsel %vm7849_vm5, %v6815_v20, %v5485_v62  ;;  %v5487_v25 = vrot.slane %v5485_v62, 4  ;;  %v6791_v31 = vcombine.low %v4681_v35, %v4691_v5  ;;  %v4565_v18 = vld [vmem:[%s7741_s15 + $0x44] sm:$0x1]  ;;  %v5378_v62 = vld [vmem:[%s7741_s15 + $0x30] sm:$0xe] }
 0x131   : > { %v6846_v8 = vcombine.low %v5479_v28, %v5482_v16  ;;  %2208 = vst [vmem:[%s7746_s18 + $0x20] sm:$0xff] %v2176_v14  ;;  %v4695_v34 = vrot.slane %v4693_v59, 4  ;;  %v4696_v4 = vshll.u32 %v4560_v55, 16  ;;  %v4702_v40 = vshll.u32 %v4561_v42, 16  ;;  %v5380_v16 = vld [vmem:[%s7741_s15 + $0x38] sm:$0x1] }
 0x132   : > { %v8733_v19 = vpop.f32.mrf.mxu1  ;;  %v8735_v46 = vpop.f32.mrf.mxu0  ;;  %v5489_v38 = vsel %vm7849_vm5, %v5487_v25, %v5488_v22  ;;  %v4706_v50 = vshrl.u32 %v4561_v42, 16  ;;  %v4712_v36 = vshll.u32 %v4562_v3, 16  ;;  %v1585_v53 = vadd.f32 %v8656_v29, %v8480_v57  ;;  %7445 = vmatmul.mubr.bf16.gmra.mxu1 %v6791_v31  ;;  %v5379_v22 = vld [vmem:[%s7741_s15 + $0x34] sm:$0xf] }
 0x133   : > { %v6847_v61 = vcombine.low %v8730_v17, %v5489_v38  ;;  %v4698_v9 = vrot.slane %v4696_v4, 5  ;;  %v4717_v39 = vshrl.u32 %v4563_v41, 16  ;;  %7492 = vmatprep.mubr.bf16.mxu0 %v6846_v8  ;;  %v4704_v55 = vrot.slane %v4702_v40, 5 }
 0x134   : > { %v8741_v48 = vpop.f32.mrf.mxu1  ;;  %v8743_v51 = vpop.f32.mrf.mxu0  ;;  %v4708_v10 = vrot.slane %v4706_v50, 4  ;;  %v4714_v35 = vrot.slane %v4712_v36, 5  ;;  %v4720_v15 = vshll.u32 %v4563_v41, 16  ;;  %v4726_v45 = vshll.u32 %v4564_v30, 16  ;;  %v5383_v50 = vld [vmem:[%s7741_s15 + $0x44] sm:$0x1] }
 0x135   : > { %v4699_v20 = vor.u32 %v4698_v9, %v4695_v34  ;;  %v4719_v27 = vrot.slane %v4717_v39, 4  ;;  %v4730_v11 = vshrl.u32 %v4564_v30, 16  ;;  %v4736_v29 = vshll.u32 %v4565_v18, 16 }
 0x136   : > { %v8752_v58 = vpop.f32.mrf.mxu1  ;;  %v4709_v28 = vor.u32 %v4708_v10, %v4704_v55  ;;  %v4722_v57 = vrot.slane %v4720_v15, 5  ;;  %v2179_v60 = vadd.f32 %v8627_v37, %v8700_v23  ;;  %v8758_v14 = vpop.f32.mrf.mxu0  ;;  %v4728_v3 = vrot.slane %v4726_v45, 5  ;;  %v5381_v23 = vld [vmem:[%s7741_s15 + $0x3c] sm:$0xe]  ;;  %7493 = vmatmul.mubr.bf16.gmra.mxu0 %v6847_v61  ;;  %v4566_v15 = vld [vmem:[%s7741_s15 + $0x48] sm:$0xf] }
 0x137   : > { %v4700_v42 = vrot.slane %v4699_v20, 4  ;;  %v4732_v59 = vrot.slane %v4730_v11, 4  ;;  %v1583_v5 = vadd.f32 %v8670_v54, %v8489_v0  ;;  %v4738_v41 = vrot.slane %v4736_v29, 5  ;;  %v5382_v0 = vld [vmem:[%s7741_s15 + $0x40] sm:$0xf] }
 0x138   : > { %v4710_v17 = vrot.slane %v4709_v28, 4  ;;  %v4723_v25 = vor.u32 %v4722_v57, %v4719_v27  ;;  %2211 = vst [vmem:[%s7746_s18 + $0x38] sm:$0xff] %v2179_v60  ;;  %v2177_v37 = vadd.f32 %v8640_v12, %v1580_v2  ;;  %v8770_v34 = vadd.f32 %v8677_v63, %v8504_v13  ;;  %v4567_v20 = vld [vmem:[%s7741_s15 + $0x4c] sm:$0xf]  ;;  %v4568_v11 = vld [vmem:[%s7741_s15 + $0x50] sm:$0x1] }
 0x139   : > { %v4705_v31 = vsel %vm7829_vm4, %v4700_v42, %v4704_v55  ;;  %v4733_v8 = vor.u32 %v4732_v59, %v4728_v3  ;;  %v6816_v4 = vrot.slane %v5378_v62, 9  ;;  %v5492_v12 = vrot.slane %v5379_v22, 5 }
 0x13a   : > { %v8773_v54 = vpop.f32.mrf.mxu1  ;;  %v4715_v38 = vsel %vm7829_vm4, %v4710_v17, %v4714_v35  ;;  %v4724_v40 = vrot.slane %v4723_v25, 4  ;;  %2209 = vst [vmem:[%s7746_s18 + $0x28] sm:$0xff] %v2177_v37  ;;  %v5495_v2 = vrot.slane %v5380_v16, 5  ;;  %v2182_v30 = vadd.f32 %v8658_v26, %v1585_v53  ;;  %v4570_v25 = vld [vmem:[%s7741_s15 + $0x58] sm:$0xf] }
 0x13b   : > { %v6792_v13 = vcombine.low %v4705_v31, %v4715_v38  ;;  %v4734_v63 = vrot.slane %v4733_v8, 4  ;;  %v6817_v9 = vrot.slane %v5381_v23, 9  ;;  %v5493_v55 = vsel %vm7849_vm5, %v6816_v4, %v5492_v12 }
 0x13c   : > { %v8779_v36 = vpop.f32.mrf.mxu0  ;;  %v8782_v18 = vpop.f32.mrf.mxu1  ;;  %v4729_v39 = vsel %vm7829_vm4, %v4724_v40, %v4728_v3  ;;  %v5494_v10 = vrot.slane %v5492_v12, 4  ;;  %v5499_v35 = vrot.slane %v5382_v0, 5  ;;  %2214 = vst [vmem:[%s7746_s18 + $0x50] sm:$0xff] %v2182_v30  ;;  %v5502_v53 = vrot.slane %v5383_v50, 5 }
 0x13d   : > { %7448 = vmatprep.mubr.bf16.mxu1 %v6792_v13  ;;  %v4739_v26 = vsel %vm7829_vm4, %v4734_v63, %v4738_v41  ;;  %v1584_v27 = vadd.f32 %v8692_v56, %v8510_v21  ;;  %v2180_v45 = vadd.f32 %v8672_v24, %v1583_v5  ;;  %v4741_v42 = vshrl.u32 %v4566_v15, 16  ;;  %v4569_v56 = vld [vmem:[%s7741_s15 + $0x54] sm:$0xf]  ;;  %v4571_v41 = vld [vmem:[%s7741_s15 + $0x5c] sm:$0x1] }
 0x13e   : > { %v8790_v61 = vpop.f32.mrf.mxu0  ;;  %v8799_v28 = vpop.f32.mrf.mxu1  ;;  %v6793_v57 = vcombine.low %v4729_v39, %v4739_v26  ;;  %v5496_v29 = vsel %vm7849_vm5, %v5494_v10, %v5495_v2  ;;  %v5500_v60 = vsel %vm7849_vm5, %v6817_v9, %v5499_v35  ;;  %v5501_v62 = vrot.slane %v5499_v35, 4  ;;  %v5385_v10 = vld [vmem:[%s7741_s15 + $0x4c] sm:$0xf] }
 0x13f   : > { %v6848_v22 = vcombine.low %v5493_v55, %v5496_v29  ;;  %2212 = vst [vmem:[%s7746_s18 + $0x40] sm:$0xff] %v2180_v45  ;;  %v4744_v3 = vshll.u32 %v4566_v15, 16  ;;  %v4750_v21 = vshll.u32 %v4567_v20, 16  ;;  %v4754_v5 = vshrl.u32 %v4567_v20, 16  ;;  %v5384_v55 = vld [vmem:[%s7741_s15 + $0x48] sm:$0xe] }
 0x140   : > { %v8807_v24 = vpop.f32.mrf.mxu0  ;;  %7449 = vmatmul.mubr.bf16.gmra.mxu1 %v6793_v57  ;;  %v5503_v59 = vsel %vm7849_vm5, %v5501_v62, %v5502_v53  ;;  %v4760_v16 = vshll.u32 %v4568_v11, 16  ;;  %v1589_v17 = vadd.f32 %v8714_v43, %v8519_v32  ;;  %v4743_v23 = vrot.slane %v4741_v42, 4  ;;  %v8815_v4 = vpop.f32.mrf.mxu1  ;;  %v5386_v53 = vld [vmem:[%s7741_s15 + $0x50] sm:$0x1] }
 0x141   : > { %7496 = vmatprep.mubr.bf16.mxu0 %v6848_v22  ;;  %v6849_v37 = vcombine.low %v5500_v60, %v5503_v59  ;;  %v4746_v31 = vrot.slane %v4744_v3, 5  ;;  %v4752_v8 = vrot.slane %v4750_v21, 5  ;;  %v4756_v0 = vrot.slane %v4754_v5, 4  ;;  %v5388_v3 = vld [vmem:[%s7741_s15 + $0x58] sm:$0xf] }
 0x142   : > { %v4762_v38 = vrot.slane %v4760_v16, 5  ;;  %v4765_v40 = vshrl.u32 %v4569_v56, 16  ;;  %v4768_v12 = vshll.u32 %v4569_v56, 16  ;;  %v4774_v50 = vshll.u32 %v4570_v25, 16  ;;  %v8817_v13 = vpop.f32.mrf.mxu0  ;;  %v5389_v59 = vld [vmem:[%s7741_s15 + $0x5c] sm:$0x1] }
 0x143   : > { %7497 = vmatmul.mubr.bf16.gmra.mxu0 %v6849_v37  ;;  %v4747_v2 = vor.u32 %v4746_v31, %v4743_v23  ;;  %v4778_v32 = vshrl.u32 %v4570_v25, 16  ;;  %v4784_v43 = vshll.u32 %v4571_v41, 16  ;;  %v4757_v63 = vor.u32 %v4756_v0, %v4752_v8  ;;  %v8826_v45 = vpop.f32.mrf.mxu1  ;;  %v4573_v0 = vld [vmem:[%s7741_s15 + $0x64] sm:$0xf] }
 0x144   : > { %v4767_v30 = vrot.slane %v4765_v40, 4  ;;  %v4770_v9 = vrot.slane %v4768_v12, 5  ;;  %v8821_v39 = vadd.f32 %v8679_v33, %v8770_v34  ;;  %v4776_v15 = vrot.slane %v4774_v50, 5  ;;  %v5387_v33 = vld [vmem:[%s7741_s15 + $0x54] sm:$0xe] }
 0x145   : > { %v4748_v35 = vrot.slane %v4747_v2, 4  ;;  %v4780_v20 = vrot.slane %v4778_v32, 4  ;;  %v4786_v26 = vrot.slane %v4784_v43, 5  ;;  %v4758_v11 = vrot.slane %v4757_v63, 4  ;;  %v8841_v21 = vpop.f32.mrf.mxu1  ;;  %v8843_v56 = vpop.f32.mrf.mxu0  ;;  %v4574_v2 = vld [vmem:[%s7741_s15 + $0x68] sm:$0x1] }
 0x146   : > { %v4771_v57 = vor.u32 %v4770_v9, %v4767_v30  ;;  %v1587_v29 = vadd.f32 %v8733_v19, %v8529_v49  ;;  %v8831_v60 = vadd.f32 %v8694_v44, %v1584_v27  ;;  %v8838_v22 = vadd.f32 %v8741_v48, %v8541_v47 }
 0x147   : > { %v4753_v34 = vsel %vm7829_vm4, %v4748_v35, %v4752_v8  ;;  %v4781_v62 = vor.u32 %v4780_v20, %v4776_v15  ;;  %v6818_v42 = vrot.slane %v5384_v55, 9  ;;  %v4763_v49 = vsel %vm7829_vm4, %v4758_v11, %v4762_v38  ;;  %v8851_v25 = vpop.f32.mrf.mxu0  ;;  %v4572_v8 = vld [vmem:[%s7741_s15 + $0x60] sm:$0xf]  ;;  %v8859_v38 = vpop.f32.mrf.mxu1  ;;  %v4577_v11 = vld [vmem:[%s7741_s15 + $0x74] sm:$0x1] }
 0x148   : > { %v4772_v44 = vrot.slane %v4771_v57, 4  ;;  %v5506_v19 = vrot.slane %v5385_v10, 5  ;;  %v5509_v27 = vrot.slane %v5386_v53, 5  ;;  %v6794_v5 = vcombine.low %v4753_v34, %v4763_v49  ;;  %v4576_v53 = vld [vmem:[%s7741_s15 + $0x70] sm:$0xf] }
 0x149   : > { %v4782_v16 = vrot.slane %v4781_v62, 4  ;;  %v8849_v47 = vadd.f32 %v8716_v1, %v1589_v17  ;;  %v6819_v48 = vrot.slane %v5387_v33, 9  ;;  %v5513_v31 = vrot.slane %v5388_v3, 5  ;;  %v8869_v50 = vpop.f32.mrf.mxu0  ;;  %v8882_v57 = vpop.f32.mrf.mxu1 }
 0x14a   : > { %v4777_v41 = vsel %vm7829_vm4, %v4772_v44, %v4776_v15  ;;  %v5507_v37 = vsel %vm7849_vm5, %v6818_v42, %v5506_v19  ;;  %v5508_v23 = vrot.slane %v5506_v19, 4  ;;  %7452 = vmatprep.mubr.bf16.mxu1 %v6794_v5  ;;  %v5516_v17 = vrot.slane %v5389_v59, 5 }
 0x14b   : > { %v4787_v1 = vsel %vm7829_vm4, %v4782_v16, %v4786_v26  ;;  %v1588_v40 = vadd.f32 %v8752_v58, %v8552_v6  ;;  %v8866_v12 = vadd.f32 %v8735_v46, %v1587_v29  ;;  %v5514_v63 = vsel %vm7849_vm5, %v6819_v48, %v5513_v31  ;;  %v1271_v58 = vld [vmem:[%s7746_s18 + $0x90] sm:$0xff]  ;;  %v4575_v46 = vld [vmem:[%s7741_s15 + $0x6c] sm:$0xf]  ;;  %v8884_v42 = vpop.f32.mrf.mxu0  ;;  %v1269_v16 = vld [vmem:[%s7746_s18 + $0x80] sm:$0xff] }
 0x14c   : > { %v6795_v32 = vcombine.low %v4777_v41, %v4787_v1  ;;  %v5510_v43 = vsel %vm7849_vm5, %v5508_v23, %v5509_v27  ;;  %v5515_v30 = vrot.slane %v5513_v31, 4  ;;  %v4789_v55 = vshrl.u32 %v4572_v8, 16  ;;  %v5390_v31 = vld [vmem:[%s7741_s15 + $0x60] sm:$0xe] }
 0x14d   : > { %v6850_v9 = vcombine.low %v5507_v37, %v5510_v43  ;;  %v4792_v10 = vshll.u32 %v4572_v8, 16  ;;  %v4798_v6 = vshll.u32 %v4573_v0, 16  ;;  %v4802_v15 = vshrl.u32 %v4573_v0, 16  ;;  %v5391_v8 = vld [vmem:[%s7741_s15 + $0x64] sm:$0xf] }
 0x14e   : > { %7453 = vmatmul.mubr.bf16.gmra.mxu1 %v6795_v32  ;;  %v5517_v35 = vsel %vm7849_vm5, %v5515_v30, %v5516_v17  ;;  %v4808_v20 = vshll.u32 %v4574_v2, 16  ;;  %v1593_v26 = vadd.f32 %v8773_v54, %v1271_v58  ;;  %v4791_v33 = vrot.slane %v4789_v55, 4  ;;  %v5392_v43 = vld [vmem:[%s7741_s15 + $0x68] sm:$0x1] }
 0x14f   : > { %7500 = vmatprep.mubr.bf16.mxu0 %v6850_v9  ;;  %v6851_v29 = vcombine.low %v5514_v63, %v5517_v35  ;;  %v4794_v34 = vrot.slane %v4792_v10, 5  ;;  %v4800_v62 = vrot.slane %v4798_v6, 5  ;;  %v4804_v3 = vrot.slane %v4802_v15, 4  ;;  %v5393_v10 = vld [vmem:[%s7741_s15 + $0x6c] sm:$0xe] }
 0x150   : > { %v4810_v49 = vrot.slane %v4808_v20, 5  ;;  %v4813_v44 = vshrl.u32 %v4575_v46, 16  ;;  %v4816_v19 = vshll.u32 %v4575_v46, 16  ;;  %v4822_v27 = vshll.u32 %v4576_v53, 16  ;;  %v8893_v0 = vpop.f32.mrf.mxu1  ;;  %v5394_v20 = vld [vmem:[%s7741_s15 + $0x70] sm:$0xf] }
 0x151   : > { %7501 = vmatmul.mubr.bf16.gmra.mxu0 %v6851_v29  ;;  %v4795_v54 = vor.u32 %v4794_v34, %v4791_v33  ;;  %v4826_v59 = vshrl.u32 %v4576_v53, 16  ;;  %v4832_v5 = vshll.u32 %v4577_v11, 16  ;;  %v4805_v48 = vor.u32 %v4804_v3, %v4800_v62  ;;  %v8896_v63 = vpop.f32.mrf.mxu0  ;;  %v5395_v29 = vld [vmem:[%s7741_s15 + $0x74] sm:$0x1] }
 0x152   : > { %v4815_v41 = vrot.slane %v4813_v44, 4  ;;  %v4818_v37 = vrot.slane %v4816_v19, 5  ;;  %v8889_v23 = vadd.f32 %v8743_v51, %v8838_v22  ;;  %v4824_v17 = vrot.slane %v4822_v27, 5  ;;  %v1272_v22 = vld [vmem:[%s7746_s18 + $0x98] sm:$0xff]  ;;  %v8904_v6 = vpop.f32.mrf.mxu1  ;;  %v1270_v44 = vld [vmem:[%s7746_s18 + $0x88] sm:$0xff] }
 0x153   : > { %v4796_v1 = vrot.slane %v4795_v54, 4  ;;  %v4828_v2 = vrot.slane %v4826_v59, 4  ;;  %v4834_v32 = vrot.slane %v4832_v5, 5  ;;  %v4806_v30 = vrot.slane %v4805_v48, 4  ;;  %v8912_v53 = vpop.f32.mrf.mxu0  ;;  %v4578_v5 = vld [vmem:[%s7741_s15 + $0x78] sm:$0xf] }
 0x154   : > { %v4819_v9 = vor.u32 %v4818_v37, %v4815_v41  ;;  %v1591_v55 = vadd.f32 %v8782_v18, %v1269_v16  ;;  %v8900_v51 = vadd.f32 %v8758_v14, %v1588_v40  ;;  %v8909_v35 = vadd.f32 %v8799_v28, %v1272_v22  ;;  %v8917_v33 = vpop.f32.mrf.mxu1  ;;  %v4579_v16 = vld [vmem:[%s7741_s15 + $0x7c] sm:$0xf]  ;;  %v4580_v37 = vld [vmem:[%s7741_s15 + $0x80] sm:$0x1] }
 0x155   : > { %v4801_v58 = vsel %vm7829_vm4, %v4796_v1, %v4800_v62  ;;  %v4829_v46 = vor.u32 %v4828_v2, %v4824_v17  ;;  %v6820_v15 = vrot.slane %v5390_v31, 9  ;;  %v4811_v14 = vsel %vm7829_vm4, %v4806_v30, %v4810_v49  ;;  %v8923_v19 = vpop.f32.mrf.mxu0 }
 0x156   : > { %9681 = vst [vmem:[#allocation2_spill] sm:$0xff] %v8900_v51  ;;  %v4820_v18 = vrot.slane %v4819_v9, 4  ;;  %v5520_v40 = vrot.slane %v5391_v8, 5  ;;  %v5523_v11 = vrot.slane %v5392_v43, 5  ;;  %v6796_v34 = vcombine.low %v4801_v58, %v4811_v14  ;;  %v8938_v31 = vpop.f32.mrf.mxu1  ;;  %v1275_v9 = vld [vmem:[%s7746_s18 + $0xb0] sm:$0xff] }
 0x157   : > { %v4830_v62 = vrot.slane %v4829_v46, 4  ;;  %v8920_v28 = vadd.f32 %v8779_v36, %v1593_v26  ;;  %v6821_v3 = vrot.slane %v5393_v10, 9  ;;  %v5527_v59 = vrot.slane %v5394_v20, 5  ;;  %v4583_v20 = vld [vmem:[%s7741_s15 + $0x8c] sm:$0x1] }
 0x158   : > { %v4825_v49 = vsel %vm7829_vm4, %v4820_v18, %v4824_v17  ;;  %v5521_v54 = vsel %vm7849_vm5, %v6820_v15, %v5520_v40  ;;  %v5522_v27 = vrot.slane %v5520_v40, 4  ;;  %7456 = vmatprep.mubr.bf16.mxu1 %v6796_v34  ;;  %v5530_v26 = vrot.slane %v5395_v29, 5  ;;  %v4582_v15 = vld [vmem:[%s7741_s15 + $0x88] sm:$0xf] }
 0x159   : > { %9682 = vst [vmem:[#allocation3_spill] sm:$0xff] %v8920_v28  ;;  %v4835_v36 = vsel %vm7829_vm4, %v4830_v62, %v4834_v32  ;;  %v1592_v48 = vadd.f32 %v8815_v4, %v1270_v44  ;;  %v8935_v41 = vadd.f32 %v8790_v61, %v1591_v55  ;;  %v5528_v17 = vsel %vm7849_vm5, %v6821_v3, %v5527_v59  ;;  %v8944_v32 = vpop.f32.mrf.mxu0  ;;  %v4581_v55 = vld [vmem:[%s7741_s15 + $0x84] sm:$0xf]  ;;  %v5412_v28 = vld [vmem:[%s7741_s15 + $0xb8] sm:$0xf] }
 0x15a   : > { %v6797_v8 = vcombine.low %v4825_v49, %v4835_v36  ;;  %v5524_v1 = vsel %vm7849_vm5, %v5522_v27, %v5523_v11  ;;  %v5529_v2 = vrot.slane %v5527_v59, 4  ;;  %v4837_v4 = vshrl.u32 %v4578_v5, 16 }
 0x15b   : > { %9683 = vst [vmem:[#allocation4_spill] sm:$0xff] %v8935_v41  ;;  %v6852_v43 = vcombine.low %v5521_v54, %v5524_v1  ;;  %v4840_v30 = vshll.u32 %v4578_v5, 16  ;;  %v4846_v61 = vshll.u32 %v4579_v16, 16  ;;  %v4850_v10 = vshrl.u32 %v4579_v16, 16  ;;  %v8953_v29 = vpop.f32.mrf.mxu1  ;;  %v1273_v5 = vld [vmem:[%s7746_s18 + $0xa0] sm:$0xff] }
 0x15c   : > { %7457 = vmatmul.mubr.bf16.gmra.mxu1 %v6797_v8  ;;  %v5531_v22 = vsel %vm7849_vm5, %v5529_v2, %v5530_v26  ;;  %v4856_v58 = vshll.u32 %v4580_v37, 16  ;;  %v1597_v46 = vadd.f32 %v8826_v45, %v1275_v9  ;;  %v4839_v18 = vrot.slane %v4837_v4, 4  ;;  %v8955_v49 = vpop.f32.mrf.mxu0  ;;  %v5396_v1 = vld [vmem:[%s7741_s15 + $0x78] sm:$0xe]  ;;  %v5398_v9 = vld [vmem:[%s7741_s15 + $0x80] sm:$0x1] }
 0x15d   : > { %7504 = vmatprep.mubr.bf16.mxu0 %v6852_v43  ;;  %v6853_v14 = vcombine.low %v5528_v17, %v5531_v22  ;;  %v4842_v40 = vrot.slane %v4840_v30, 5  ;;  %v4848_v11 = vrot.slane %v4846_v61, 5  ;;  %v4852_v34 = vrot.slane %v4850_v10, 4  ;;  %v8958_v16 = vpop.f32.mrf.mxu1  ;;  %v5397_v17 = vld [vmem:[%s7741_s15 + $0x7c] sm:$0xf] }
 0x15e   : > { %v4858_v62 = vrot.slane %v4856_v58, 5  ;;  %v4861_v3 = vshrl.u32 %v4581_v55, 16  ;;  %v4864_v44 = vshll.u32 %v4581_v55, 16  ;;  %v4870_v54 = vshll.u32 %v4582_v15, 16  ;;  %v8966_v2 = vpop.f32.mrf.mxu0 }
 0x15f   : > { %7505 = vmatmul.mubr.bf16.gmra.mxu0 %v6853_v14  ;;  %v4843_v45 = vor.u32 %v4842_v40, %v4839_v18  ;;  %v4874_v27 = vshrl.u32 %v4582_v15, 16  ;;  %v4880_v59 = vshll.u32 %v4583_v20, 16  ;;  %v4853_v36 = vor.u32 %v4852_v34, %v4848_v11  ;;  %v8969_v55 = vpop.f32.mrf.mxu1  ;;  %v5399_v15 = vld [vmem:[%s7741_s15 + $0x84] sm:$0xe] }
 0x160   : > { %v4863_v26 = vrot.slane %v4861_v3, 4  ;;  %v4866_v37 = vrot.slane %v4864_v44, 5  ;;  %v8962_v8 = vadd.f32 %v8807_v24, %v8909_v35  ;;  %v4872_v4 = vrot.slane %v4870_v54, 5  ;;  %v1276_v35 = vld [vmem:[%s7746_s18 + $0xb8] sm:$0xff]  ;;  %v8977_v20 = vpop.f32.mrf.mxu0  ;;  %v5400_v3 = vld [vmem:[%s7741_s15 + $0x88] sm:$0xf] }
 0x161   : > { %v4844_v43 = vrot.slane %v4843_v45, 4  ;;  %v4876_v30 = vrot.slane %v4874_v27, 4  ;;  %v4882_v61 = vrot.slane %v4880_v59, 5  ;;  %v4854_v22 = vrot.slane %v4853_v36, 4  ;;  %v8985_v44 = vpop.f32.mrf.mxu1  ;;  %v5401_v54 = vld [vmem:[%s7741_s15 + $0x8c] sm:$0x1] }
 0x162   : > { %9684 = vst [vmem:[#allocation5_spill] sm:$0xff] %v8962_v8  ;;  %v4867_v10 = vor.u32 %v4866_v37, %v4863_v26  ;;  %v1595_v58 = vadd.f32 %v8841_v21, %v1273_v5  ;;  %v8973_v24 = vadd.f32 %v8817_v13, %v1592_v48  ;;  %v8982_v40 = vadd.f32 %v8859_v38, %v1276_v35  ;;  %v1274_v5 = vld [vmem:[%s7746_s18 + $0xa8] sm:$0xff]  ;;  %v8996_v26 = vpop.f32.mrf.mxu0 }
 0x163   : > { %v4849_v14 = vsel %vm7829_vm4, %v4844_v43, %v4848_v11  ;;  %v4877_v18 = vor.u32 %v4876_v30, %v4872_v4  ;;  %v6822_v34 = vrot.slane %v5396_v1, 9  ;;  %v4859_v13 = vsel %vm7829_vm4, %v4854_v22, %v4858_v62  ;;  %v8994_v36 = vpop.f32.mrf.mxu1  ;;  %v4584_v43 = vld [vmem:[%s7741_s15 + $0x90] sm:$0xf]  ;;  %v4585_v30 = vld [vmem:[%s7741_s15 + $0x94] sm:$0xf] }
 0x164   : > { %9685 = vst [vmem:[#allocation6_spill] sm:$0xff] %v8973_v24  ;;  %v4868_v21 = vrot.slane %v4867_v10, 4  ;;  %v5534_v48 = vrot.slane %v5397_v17, 5  ;;  %v5537_v45 = vrot.slane %v5398_v9, 5  ;;  %v6798_v27 = vcombine.low %v4849_v14, %v4859_v13  ;;  %v1279_v13 = vld [vmem:[%s7746_s18 + $0xd0] sm:$0xff] }
 0x165   : > { %v4878_v59 = vrot.slane %v4877_v18, 4  ;;  %v8991_v11 = vadd.f32 %v8843_v56, %v1597_v46  ;;  %v6823_v38 = vrot.slane %v5399_v15, 9  ;;  %v5541_v17 = vrot.slane %v5400_v3, 5  ;;  %v9011_v10 = vpop.f32.mrf.mxu1 }
 0x166   : > { %v4873_v62 = vsel %vm7829_vm4, %v4868_v21, %v4872_v4  ;;  %v5535_v37 = vsel %vm7849_vm5, %v6822_v34, %v5534_v48  ;;  %v5536_v1 = vrot.slane %v5534_v48, 4  ;;  %7460 = vmatprep.mubr.bf16.mxu1 %v6798_v27  ;;  %v5544_v46 = vrot.slane %v5401_v54, 5  ;;  %v4586_v4 = vld [vmem:[%s7741_s15 + $0x98] sm:$0x1] }
 0x167   : > { %9686 = vst [vmem:[#allocation7_spill] sm:$0xff] %v8991_v11  ;;  %v4883_v56 = vsel %vm7829_vm4, %v4878_v59, %v4882_v61  ;;  %v1596_v9 = vadd.f32 %v8882_v57, %v1274_v5  ;;  %v9008_v22 = vadd.f32 %v8851_v25, %v1595_v58  ;;  %v5542_v14 = vsel %vm7849_vm5, %v6823_v38, %v5541_v17  ;;  %v4587_v25 = vld [vmem:[%s7741_s15 + $0x9c] sm:$0xf]  ;;  %v9019_v58 = vpop.f32.mrf.mxu1  ;;  %v9021_v21 = vpop.f32.mrf.mxu0  ;;  %v4588_v59 = vld [vmem:[%s7741_s15 + $0xa0] sm:$0xf] }
 0x168   : > { %v6799_v35 = vcombine.low %v4873_v62, %v4883_v56  ;;  %v5538_v15 = vsel %vm7849_vm5, %v5536_v1, %v5537_v45  ;;  %v5543_v18 = vrot.slane %v5541_v17, 4  ;;  %v4885_v34 = vshrl.u32 %v4584_v43, 16  ;;  %v4589_v38 = vld [vmem:[%s7741_s15 + $0xa4] sm:$0x1]  ;;  %v5406_v11 = vld [vmem:[%s7741_s15 + $0xa0] sm:$0xf] }
 0x169   : > { %9687 = vst [vmem:[#allocation8_spill] sm:$0xff] %v9008_v22  ;;  %v6854_v61 = vcombine.low %v5535_v37, %v5538_v15  ;;  %v4888_v3 = vshll.u32 %v4584_v43, 16  ;;  %v4894_v57 = vshll.u32 %v4585_v30, 16  ;;  %v4898_v45 = vshrl.u32 %v4585_v30, 16  ;;  %v9028_v17 = vpop.f32.mrf.mxu1  ;;  %v9030_v43 = vpop.f32.mrf.mxu0 }
 0x16a   : > { %7461 = vmatmul.mubr.bf16.gmra.mxu1 %v6799_v35  ;;  %v5545_v48 = vsel %vm7849_vm5, %v5543_v18, %v5544_v46  ;;  %v4904_v54 = vshll.u32 %v4586_v4, 16  ;;  %v1601_v27 = vadd.f32 %v8893_v0, %v1279_v13  ;;  %v4887_v62 = vrot.slane %v4885_v34, 4 }
 0x16b   : > { %7508 = vmatprep.mubr.bf16.mxu0 %v6854_v61  ;;  %v6855_v5 = vcombine.low %v5542_v14, %v5545_v48  ;;  %v4890_v37 = vrot.slane %v4888_v3, 5  ;;  %v4896_v1 = vrot.slane %v4894_v57, 5  ;;  %v4900_v56 = vrot.slane %v4898_v45, 4  ;;  %v1277_v14 = vld [vmem:[%s7746_s18 + $0xc0] sm:$0xff]  ;;  %v9033_v61 = vpop.f32.mrf.mxu1  ;;  %v9035_v34 = vpop.f32.mrf.mxu0  ;;  %v5403_v45 = vld [vmem:[%s7741_s15 + $0x94] sm:$0xf] }
 0x16c   : > { %v4906_v35 = vrot.slane %v4904_v54, 5  ;;  %v4909_v30 = vshrl.u32 %v4587_v25, 16  ;;  %v4912_v46 = vshll.u32 %v4587_v25, 16  ;;  %v4918_v4 = vshll.u32 %v4588_v59, 16  ;;  %v5402_v25 = vld [vmem:[%s7741_s15 + $0x90] sm:$0xe] }
 0x16d   : > { %7509 = vmatmul.mubr.bf16.gmra.mxu0 %v6855_v5  ;;  %v4891_v0 = vor.u32 %v4890_v37, %v4887_v62  ;;  %v4922_v15 = vshrl.u32 %v4588_v59, 16  ;;  %v4928_v18 = vshll.u32 %v4589_v38, 16  ;;  %v4901_v3 = vor.u32 %v4900_v56, %v4896_v1  ;;  %v5404_v62 = vld [vmem:[%s7741_s15 + $0x98] sm:$0x1]  ;;  %v9044_v37 = vpop.f32.mrf.mxu1  ;;  %v9046_v22 = vpop.f32.mrf.mxu0 }
 0x16e   : > { %v4911_v57 = vrot.slane %v4909_v30, 4  ;;  %v4914_v13 = vrot.slane %v4912_v46, 5  ;;  %v9039_v48 = vadd.f32 %v8869_v50, %v8982_v40  ;;  %v4920_v5 = vrot.slane %v4918_v4, 5  ;;  %v1280_v40 = vld [vmem:[%s7746_s18 + $0xd8] sm:$0xff] }
 0x16f   : > { %v4892_v54 = vrot.slane %v4891_v0, 4  ;;  %v4924_v59 = vrot.slane %v4922_v15, 4  ;;  %v4930_v38 = vrot.slane %v4928_v18, 5  ;;  %v4902_v56 = vrot.slane %v4901_v3, 4  ;;  %v9060_v3 = vpop.f32.mrf.mxu1 }
 0x170   : > { %9688 = vst [vmem:[#allocation9_spill] sm:$0xff] %v9039_v48  ;;  %v4915_v30 = vor.u32 %v4914_v13, %v4911_v57  ;;  %v1599_v46 = vadd.f32 %v8904_v6, %v1277_v14  ;;  %v9050_v50 = vadd.f32 %v8884_v42, %v1596_v9  ;;  %v5405_v48 = vld [vmem:[%s7741_s15 + $0x9c] sm:$0xe]  ;;  %v9057_v15 = vadd.f32 %v8917_v33, %v1280_v40  ;;  %v5407_v57 = vld [vmem:[%s7741_s15 + $0xa4] sm:$0x1] }
 0x171   : > { %v4897_v0 = vsel %vm7829_vm4, %v4892_v54, %v4896_v1  ;;  %v4925_v4 = vor.u32 %v4924_v59, %v4920_v5  ;;  %v6824_v18 = vrot.slane %v5402_v25, 9  ;;  %v4907_v6 = vsel %vm7829_vm4, %v4902_v56, %v4906_v35  ;;  %v1278_v25 = vld [vmem:[%s7746_s18 + $0xc8] sm:$0xff]  ;;  %v9069_v54 = vpop.f32.mrf.mxu0  ;;  %v9071_v59 = vpop.f32.mrf.mxu1 }
 0x172   : > { %9689 = vst [vmem:[#allocation10_spill] sm:$0xff] %v9050_v50  ;;  %v4916_v42 = vrot.slane %v4915_v30, 4  ;;  %v5548_v9 = vrot.slane %v5403_v45, 5  ;;  %v5551_v14 = vrot.slane %v5404_v62, 5  ;;  %v6800_v13 = vcombine.low %v4897_v0, %v4907_v6  ;;  %v4590_v30 = vld [vmem:[%s7741_s15 + $0xa8] sm:$0xf] }
 0x173   : > { %v4926_v50 = vrot.slane %v4925_v4, 4  ;;  %v9066_v1 = vadd.f32 %v8896_v63, %v1601_v27  ;;  %v6825_v33 = vrot.slane %v5405_v48, 9  ;;  %v5555_v56 = vrot.slane %v5406_v11, 5  ;;  %v4591_v40 = vld [vmem:[%s7741_s15 + $0xac] sm:$0xf]  ;;  %v9086_v4 = vpop.f32.mrf.mxu0 }
 0x174   : > { %v4921_v35 = vsel %vm7829_vm4, %v4916_v42, %v4920_v5  ;;  %v5549_v45 = vsel %vm7849_vm5, %v6824_v18, %v5548_v9  ;;  %v5550_v62 = vrot.slane %v5548_v9, 4  ;;  %7464 = vmatprep.mubr.bf16.mxu1 %v6800_v13  ;;  %v5558_v27 = vrot.slane %v5407_v57, 5  ;;  %v4592_v5 = vld [vmem:[%s7741_s15 + $0xb0] sm:$0x1]  ;;  %v9088_v18 = vpop.f32.mrf.mxu1  ;;  %v4593_v57 = vld [vmem:[%s7741_s15 + $0xb4] sm:$0xf] }
 0x175   : > { %9690 = vst [vmem:[#allocation11_spill] sm:$0xff] %v9066_v1  ;;  %v4931_v63 = vsel %vm7829_vm4, %v4926_v50, %v4930_v38  ;;  %v1600_v48 = vadd.f32 %v8938_v31, %v1278_v25  ;;  %v9083_v0 = vadd.f32 %v8912_v53, %v1599_v46  ;;  %v5556_v38 = vsel %vm7849_vm5, %v6825_v33, %v5555_v56  ;;  %v1283_v46 = vld [vmem:[%s7746_s18 + $0xf0] sm:$0xff]  ;;  %v9096_v13 = vpop.f32.mrf.mxu0 }
 0x176   : > { %v6801_v11 = vcombine.low %v4921_v35, %v4931_v63  ;;  %v5552_v6 = vsel %vm7849_vm5, %v5550_v62, %v5551_v14  ;;  %v5557_v50 = vrot.slane %v5555_v56, 4  ;;  %v4933_v31 = vshrl.u32 %v4590_v30, 16  ;;  %v9098_v25 = vpop.f32.mrf.mxu1  ;;  %v4594_v63 = vld [vmem:[%s7741_s15 + $0xb8] sm:$0xf]  ;;  %v4595_v56 = vld [vmem:[%s7741_s15 + $0xbc] sm:$0x1] }
 0x177   : > { %9691 = vst [vmem:[#allocation12_spill] sm:$0xff] %v9083_v0  ;;  %v6856_v42 = vcombine.low %v5549_v45, %v5552_v6  ;;  %v4936_v9 = vshll.u32 %v4590_v30, 16  ;;  %v4942_v53 = vshll.u32 %v4591_v40, 16  ;;  %v4946_v35 = vshrl.u32 %v4591_v40, 16  ;;  %v9105_v1 = vpop.f32.mrf.mxu0 }
 0x178   : > { %7465 = vmatmul.mubr.bf16.gmra.mxu1 %v6801_v11  ;;  %v5559_v14 = vsel %vm7849_vm5, %v5557_v50, %v5558_v27  ;;  %v4952_v62 = vshll.u32 %v4592_v5, 16  ;;  %v1605_v33 = vadd.f32 %v8953_v29, %v1283_v46  ;;  %v4935_v30 = vrot.slane %v4933_v31, 4  ;;  %v9107_v24 = vpop.f32.mrf.mxu1 }
 0x179   : > { %7512 = vmatprep.mubr.bf16.mxu0 %v6856_v42  ;;  %v6857_v45 = vcombine.low %v5556_v38, %v5559_v14  ;;  %v4938_v6 = vrot.slane %v4936_v9, 5  ;;  %v4944_v0 = vrot.slane %v4942_v53, 5  ;;  %v4948_v11 = vrot.slane %v4946_v35, 4  ;;  %v1281_v38 = vld [vmem:[%s7746_s18 + $0xe0] sm:$0xff] }
 0x17a   : > { %v4954_v27 = vrot.slane %v4952_v62, 5  ;;  %v4957_v40 = vshrl.u32 %v4593_v57, 16  ;;  %v4960_v5 = vshll.u32 %v4593_v57, 16  ;;  %v4966_v50 = vshll.u32 %v4594_v63, 16  ;;  %v9110_v31 = vpop.f32.mrf.mxu1  ;;  %v5408_v62 = vld [vmem:[%s7741_s15 + $0xa8] sm:$0xe]  ;;  %v9119_v8 = vpop.f32.mrf.mxu0 }
 0x17b   : > { %7513 = vmatmul.mubr.bf16.gmra.mxu0 %v6857_v45  ;;  %v4939_v29 = vor.u32 %v4938_v6, %v4935_v30  ;;  %v4970_v42 = vshrl.u32 %v4594_v63, 16  ;;  %v4976_v46 = vshll.u32 %v4595_v56, 16  ;;  %v4949_v9 = vor.u32 %v4948_v11, %v4944_v0  ;;  %v5409_v57 = vld [vmem:[%s7741_s15 + $0xac] sm:$0xf]  ;;  %v5410_v56 = vld [vmem:[%s7741_s15 + $0xb0] sm:$0x1] }
 0x17c   : > { %v4959_v53 = vrot.slane %v4957_v40, 4  ;;  %v4962_v14 = vrot.slane %v4960_v5, 5  ;;  %v9114_v35 = vadd.f32 %v8923_v19, %v9057_v15  ;;  %v4968_v30 = vrot.slane %v4966_v50, 5  ;;  %v9121_v41 = vpop.f32.mrf.mxu1  ;;  %v1284_v15 = vld [vmem:[%s7746_s18 + $0xf8] sm:$0xff]  ;;  %v9133_v51 = vpop.f32.mrf.mxu0 }
 0x17d   : > { %v4940_v45 = vrot.slane %v4939_v29, 4  ;;  %v4972_v6 = vrot.slane %v4970_v42, 4  ;;  %v4978_v63 = vrot.slane %v4976_v46, 5  ;;  %v4950_v11 = vrot.slane %v4949_v9, 4 }
 0x17e   : > { %9692 = vst [vmem:[#allocation13_spill] sm:$0xff] %v9114_v35  ;;  %v4963_v40 = vor.u32 %v4962_v14, %v4959_v53  ;;  %v1603_v5 = vadd.f32 %v8958_v16, %v1281_v38  ;;  %v9125_v19 = vadd.f32 %v8944_v32, %v1600_v48  ;;  %v5411_v35 = vld [vmem:[%s7741_s15 + $0xb4] sm:$0xe]  ;;  %v1606_v42 = vadd.f32 %v8969_v55, %v1284_v15  ;;  %v9135_v9 = vpop.f32.mrf.mxu1  ;;  %v5413_v53 = vld [vmem:[%s7741_s15 + $0xbc] sm:$0x1] }
 0x17f   : > { %v4945_v29 = vsel %vm7829_vm4, %v4940_v45, %v4944_v0  ;;  %v4973_v50 = vor.u32 %v4972_v6, %v4968_v30  ;;  %v6826_v46 = vrot.slane %v5408_v62, 9  ;;  %v4955_v16 = vsel %vm7829_vm4, %v4950_v11, %v4954_v27  ;;  %v9143_v62 = vpop.f32.mrf.mxu0  ;;  %v1282_v11 = vld [vmem:[%s7746_s18 + $0xe8] sm:$0xff] }
 0x180   : > { %9693 = vst [vmem:[#allocation14_spill] sm:$0xff] %v9125_v19  ;;  %v4964_v32 = vrot.slane %v4963_v40, 4  ;;  %v5562_v48 = vrot.slane %v5409_v57, 5  ;;  %v5565_v38 = vrot.slane %v5410_v56, 5  ;;  %v6802_v14 = vcombine.low %v4945_v29, %v4955_v16  ;;  %v9145_v45 = vpop.f32.mrf.mxu1 }
 0x181   : > { %v4974_v19 = vrot.slane %v4973_v50, 4  ;;  %v9141_v0 = vadd.f32 %v8955_v49, %v1605_v33  ;;  %v6827_v55 = vrot.slane %v5411_v35, 9  ;;  %v5569_v56 = vrot.slane %v5412_v28, 5 }
 0x182   : > { %v4969_v6 = vsel %vm7829_vm4, %v4964_v32, %v4968_v30  ;;  %v5563_v27 = vsel %vm7849_vm5, %v6826_v46, %v5562_v48  ;;  %v5564_v57 = vrot.slane %v5562_v48, 4  ;;  %7468 = vmatprep.mubr.bf16.mxu1 %v6802_v14  ;;  %v5572_v33 = vrot.slane %v5413_v53, 5  ;;  %v3348_v30 = vpop.f32.mrf.mxu0  ;;  %v2546_v15 = vpop.f32.mrf.mxu1  ;;  %v2269_v32 = vld [vmem:[%s7746_s18 + $0x8] sm:$0xff] }
 0x183   : > { %v4979_v49 = vsel %vm7829_vm4, %v4974_v19, %v4978_v63  ;;  %v1604_v35 = vadd.f32 %v8985_v44, %v1282_v11  ;;  %v9156_v40 = vadd.f32 %v8966_v2, %v1603_v5  ;;  %v5570_v28 = vsel %vm7849_vm5, %v6827_v55, %v5569_v56  ;;  %v2270_v63 = vld [vmem:[%s7746_s18 + $0x10] sm:$0xff]  ;;  %v2268_v19 = vld [vmem:[%s7746_s18] sm:$0xff]  ;;  %v2271_v5 = vld [vmem:[%s7746_s18 + $0x18] sm:$0xff] }
 0x184   : > { %v6803_v29 = vcombine.low %v4969_v6, %v4979_v49  ;;  %v5566_v50 = vsel %vm7849_vm5, %v5564_v57, %v5565_v38  ;;  %v5571_v52 = vrot.slane %v5569_v56, 4  ;;  %v2624_v16 = vadd.f32 %v8994_v36, %v2270_v63  ;;  %v7266_v48 = vpop.f32.mrf.mxu1  ;;  %v2274_v36 = vld [vmem:[%s7746_s18 + $0x30] sm:$0xff]  ;;  %v2275_v6 = vld [vmem:[%s7746_s18 + $0x38] sm:$0xff]  ;;  %v2273_v11 = vld [vmem:[%s7746_s18 + $0x28] sm:$0xff] }
 0x185   : > { %v6858_v46 = vcombine.low %v5563_v27, %v5566_v50  ;;  %v9166_v44 = vadd.f32 %v8977_v20, %v1606_v42  ;;  %v2622_v2 = vadd.f32 %v9011_v10, %v2268_v19  ;;  %v9174_v53 = vadd.f32 %v8996_v26, %v1604_v35  ;;  %v2272_v26 = vld [vmem:[%s7746_s18 + $0x20] sm:$0xff]  ;;  %v7310_v27 = vpop.f32.mrf.mxu0  ;;  %v2278_v49 = vld [vmem:[%s7746_s18 + $0x50] sm:$0xff] }
 0x186   : > { %7469 = vmatmul.mubr.bf16.gmra.mxu1 %v6803_v29  ;;  %v5573_v38 = vsel %vm7849_vm5, %v5571_v52, %v5572_v33  ;;  %v2625_v14 = vadd.f32 %v9019_v58, %v2271_v5  ;;  %v2623_v20 = vadd.f32 %v9028_v17, %v2269_v32  ;;  %v9180_v42 = vadd.f32 %v9021_v21, %v2624_v16  ;;  %v2559_v58 = vpop.f32.mrf.mxu1 }
 0x187   : > { %7516 = vmatprep.mubr.bf16.mxu0 %v6858_v46  ;;  %v6859_v10 = vcombine.low %v5570_v28, %v5573_v38  ;;  %v9183_v55 = vadd.f32 %v9030_v43, %v2622_v2  ;;  %v2628_v7 = vadd.f32 %v9033_v61, %v2274_v36  ;;  %v2626_v17 = vadd.f32 %v9044_v37, %v2272_v26  ;;  %v2276_v43 = vld [vmem:[%s7746_s18 + $0x40] sm:$0xff]  ;;  %v3361_v29 = vpop.f32.mrf.mxu0 }
 0x188   : > { %v9189_v57 = vadd.f32 %v9035_v34, %v2625_v14  ;;  %v9193_v56 = vadd.f32 %v9046_v22, %v2623_v20  ;;  %v2629_v21 = vadd.f32 %v9060_v3, %v2275_v6  ;;  %v2627_v33 = vadd.f32 %v9071_v59, %v2273_v11  ;;  %v7267_v37 = vpop.f32.mrf.mxu1 }
 0x189   : > { %7517 = vmatmul.mubr.bf16.gmra.mxu0 %v6859_v10  ;;  %v9200_v61 = vadd.f32 %v9069_v54, %v2628_v7  ;;  %v2632_v35 = vadd.f32 %v9088_v18, %v2278_v49  ;;  %v2630_v34 = vadd.f32 %v9098_v25, %v2276_v43  ;;  %v9206_v22 = vadd.f32 %v9086_v4, %v2626_v17  ;;  %v9704_v7 = vld [vmem:[#allocation9_spill] sm:$0xff]  ;;  %v9705_v17 = vld [vmem:[#allocation10_spill] sm:$0xff] }
 0x18a   : > { %v9209_v3 = vadd.f32 %v9096_v13, %v2629_v21  ;;  %v2633_v50 = vadd.f32 %v9107_v24, %v8821_v39  ;;  %v2631_v54 = vadd.f32 %v9110_v31, %v8831_v60  ;;  %v9216_v59 = vadd.f32 %v9105_v1, %v2627_v33  ;;  %v7311_v13 = vpop.f32.mrf.mxu0  ;;  %v2562_v28 = vpop.f32.mrf.mxu1  ;;  %v9698_v31 = vld [vmem:[#allocation3_spill] sm:$0xff] }
 0x18b   : > { %v9219_v18 = vadd.f32 %v9119_v8, %v2632_v35  ;;  %v9222_v25 = vadd.f32 %v9133_v51, %v2630_v34  ;;  %v2636_v4 = vadd.f32 %v9121_v41, %v8849_v47  ;;  %v2634_v39 = vadd.f32 %v9135_v9, %v8866_v12  ;;  %v9697_v51 = vld [vmem:[#allocation2_spill] sm:$0xff]  ;;  %v9699_v47 = vld [vmem:[#allocation4_spill] sm:$0xff]  ;;  %v9700_v12 = vld [vmem:[#allocation5_spill] sm:$0xff] }
 0x18c   : > { %v9227_v52 = vadd.f32 %v9143_v62, %v2633_v50  ;;  %v9231_v60 = vadd.f32 %v3348_v30, %v2631_v54  ;;  %v2637_v8 = vadd.f32 %v9145_v45, %v8889_v23  ;;  %v2635_v1 = vadd.f32 %v2546_v15, %v9697_v51  ;;  %v3364_v19 = vpop.f32.mrf.mxu0  ;;  %v7270_v46 = vpop.f32.mrf.mxu1  ;;  %v9701_v30 = vld [vmem:[#allocation6_spill] sm:$0xff]  ;;  %v9702_v45 = vld [vmem:[#allocation7_spill] sm:$0xff] }
 0x18d   : > { %9694 = vst [vmem:[#allocation15_spill] sm:$0xff] %v9222_v25  ;;  %v9235_v24 = vadd.f32 %v7310_v27, %v2636_v4  ;;  %v2640_v63 = vadd.f32 %v7266_v48, %v9698_v31  ;;  %v2638_v41 = vadd.f32 %v2559_v58, %v9699_v47  ;;  %v9240_v62 = vadd.f32 %v3361_v29, %v2634_v39  ;;  %v9703_v48 = vld [vmem:[#allocation8_spill] sm:$0xff]  ;;  %v9706_v33 = vld [vmem:[#allocation11_spill] sm:$0xff] }
 0x18e   : > { %9695 = vst [vmem:[#allocation16_spill] sm:$0xff] %v9227_v52  ;;  %9696 = vst [vmem:[#allocation17_spill] sm:$0xff] %v9231_v60  ;;  %v9242_v16 = vadd.f32 %v7311_v13, %v2637_v8  ;;  %v2641_v9 = vadd.f32 %v7267_v37, %v9700_v12  ;;  %v2639_v2 = vadd.f32 %v2562_v28, %v9701_v30  ;;  %v7314_v23 = vpop.f32.mrf.mxu0  ;;  %v2575_v15 = vpop.f32.mrf.mxu1  ;;  %v9707_v29 = vld [vmem:[#allocation12_spill] sm:$0xff]  ;;  %v9708_v13 = vld [vmem:[#allocation13_spill] sm:$0xff] }
 0x18f   : > { %v9246_v5 = vadd.f32 %v3364_v19, %v2635_v1  ;;  %v2644_v32 = vadd.f32 %v7270_v46, %v9702_v45  ;;  %v9249_v38 = vadd.f32 %v7314_v23, %v2640_v63  ;;  %v2642_v14 = vadd.f32 %v2575_v15, %v9703_v48  ;;  %v9709_v1 = vld [vmem:[#allocation14_spill] sm:$0xff] }
 0x190   : > { %v3377_v20 = vpop.f32.mrf.mxu0  ;;  %v7271_v36 = vpop.f32.mrf.mxu1 }
 0x191   : > { %v9252_v10 = vadd.f32 %v3377_v20, %v2638_v41  ;;  %v2645_v26 = vadd.f32 %v7271_v36, %v9704_v7 }
 0x192   : > { %v7315_v6 = vpop.f32.mrf.mxu0  ;;  %v2578_v27 = vpop.f32.mrf.mxu1 }
 0x193   : > { %v9255_v58 = vadd.f32 %v7315_v6, %v2641_v9  ;;  %v2643_v21 = vadd.f32 %v2578_v27, %v9705_v17 }
 0x194   : > { %v3380_v11 = vpop.f32.mrf.mxu0  ;;  %v7274_v49 = vpop.f32.mrf.mxu1 }
 0x195   : > { %v9258_v43 = vadd.f32 %v3380_v11, %v2639_v2  ;;  %v2648_v35 = vadd.f32 %v7274_v49, %v9706_v33 }
 0x196   : > { %v2591_v34 = vpop.f32.mrf.mxu1  ;;  %v7318_v50 = vpop.f32.mrf.mxu0 }
 0x197   : > { %v2646_v37 = vadd.f32 %v2591_v34, %v9707_v29  ;;  %v9262_v4 = vadd.f32 %v7318_v50, %v2644_v32 }
 0x198   : > { %v7275_v54 = vpop.f32.mrf.mxu1  ;;  %v3393_v39 = vpop.f32.mrf.mxu0 }
 0x199   : > { %v2649_v28 = vadd.f32 %v7275_v54, %v9708_v13  ;;  %v9265_v51 = vadd.f32 %v3393_v39, %v2642_v14 }
 0x19a   : > { %v2594_v8 = vpop.f32.mrf.mxu1  ;;  %v7319_v63 = vpop.f32.mrf.mxu0 }
 0x19b   : > { %v2647_v31 = vadd.f32 %v2594_v8, %v9709_v1  ;;  %v9268_v41 = vadd.f32 %v7319_v63, %v2645_v26 }
 0x19c   : > { %v7278_v47 = vpop.f32.mrf.mxu1  ;;  %v3396_v46 = vpop.f32.mrf.mxu0 }
 0x19d   : > { %v2652_v19 = vadd.f32 %v7278_v47, %v9141_v0  ;;  %v9271_v9 = vadd.f32 %v3396_v46, %v2643_v21 }
 0x19e   : > { %v2607_v12 = vpop.f32.mrf.mxu1  ;;  %v7322_v2 = vpop.f32.mrf.mxu0 }
 0x19f   : > { %v2650_v30 = vadd.f32 %v2607_v12, %v9156_v40  ;;  %v9274_v23 = vadd.f32 %v7322_v2, %v2648_v35 }
 0x1a0   : > { %v3409_v45 = vpop.f32.mrf.mxu0  ;;  %v9276_v32 = vpop.f32.mrf.mxu1 }
 0x1a1   : > { %v9278_v15 = vadd.f32 %v3409_v45, %v2646_v37 }
 0x1a2   : > { %v7323_v48 = vpop.f32.mrf.mxu0  ;;  %v9282_v36 = vpop.f32.mrf.mxu1 }
 0x1a3   : > { %v9280_v14 = vadd.f32 %v7323_v48, %v2649_v28 }
 0x1a4   : > { %v3412_v20 = vpop.f32.mrf.mxu0  ;;  %v9288_v6 = vpop.f32.mrf.mxu1 }
 0x1a5   : > { %v9284_v0 = vadd.f32 %v3412_v20, %v2647_v31 }
 0x1a6   : > { %v7326_v7 = vpop.f32.mrf.mxu0  ;;  %v9294_v21 = vpop.f32.mrf.mxu1 }
 0x1a7   : > { %v9286_v26 = vadd.f32 %v7326_v7, %v2652_v19 }
 0x1a8   : > { %v3425_v40 = vpop.f32.mrf.mxu0  ;;  %v9298_v49 = vpop.f32.mrf.mxu1 }
 0x1a9   : > { %v9290_v27 = vadd.f32 %v3425_v40, %v2650_v30 }
 0x1aa   : > { %v9292_v17 = vpop.f32.mrf.mxu0  ;;  %v9302_v35 = vpop.f32.mrf.mxu1 }
 0x1ac   : > { %v9296_v11 = vpop.f32.mrf.mxu0 }
 0x1ad   : > { %v9306_v29 = vpop.f32.mrf.mxu1 }
 0x1ae   : > { %v9300_v33 = vpop.f32.mrf.mxu0 }
 0x1af   : > { %v9310_v50 = vpop.f32.mrf.mxu1 }
 0x1b0   : > { %v9304_v34 = vpop.f32.mrf.mxu0 }
 0x1b1   : > { %v9314_v13 = vpop.f32.mrf.mxu1 }
 0x1b2   : > { %v9308_v37 = vpop.f32.mrf.mxu0 }
 0x1b3   : > { %v9318_v39 = vpop.f32.mrf.mxu1 }
 0x1b4   : > { %v9312_v54 = vpop.f32.mrf.mxu0 }
 0x1b5   : > { %v9322_v1 = vpop.f32.mrf.mxu1 }
 0x1b6   : > { %v9316_v28 = vpop.f32.mrf.mxu0 }
 0x1b7   : > { %v9326_v63 = vpop.f32.mrf.mxu1 }
 0x1b8   : > { %v9320_v8 = vpop.f32.mrf.mxu0  ;;  %9710 = vst [vmem:[#allocation2_spill] sm:$0xff] %v9326_v63 }
 0x1b9   : > { %v9330_v19 = vpop.f32.mrf.mxu1 }
 0x1ba   : > { %v9324_v31 = vpop.f32.mrf.mxu0  ;;  %9712 = vst [vmem:[#allocation4_spill] sm:$0xff] %v9330_v19 }
 0x1bb   : > { %v9334_v12 = vpop.f32.mrf.mxu1 }
 0x1bc   : > { %v9328_v47 = vpop.f32.mrf.mxu0  ;;  %9714 = vst [vmem:[#allocation6_spill] sm:$0xff] %v9334_v12 }
 0x1bd   : > { %9711 = vst [vmem:[#allocation3_spill] sm:$0xff] %v9328_v47  ;;  %v7358_v2 = vpop.f32.mrf.mxu1 }
 0x1be   : > { %v9332_v46 = vpop.f32.mrf.mxu0  ;;  %v4048_v45 = vadd.f32 %v7358_v2, %v9235_v24 }
 0x1bf   : > { %9713 = vst [vmem:[#allocation5_spill] sm:$0xff] %v9332_v46  ;;  %v3955_v20 = vpop.f32.mrf.mxu1 }
 0x1c0   : > { %v9336_v30 = vpop.f32.mrf.mxu0  ;;  %v4046_v7 = vadd.f32 %v3955_v20, %v9240_v62 }
 0x1c1   : > { %9715 = vst [vmem:[#allocation7_spill] sm:$0xff] %v9336_v30  ;;  %v7359_v60 = vpop.f32.mrf.mxu1 }
 0x1c2   : > { %v9339_v48 = vpop.f32.mrf.mxu0  ;;  %v4049_v52 = vadd.f32 %v7359_v60, %v9242_v16 }
 0x1c3   : > { %9716 = vst [vmem:[#allocation8_spill] sm:$0xff] %v9339_v48  ;;  %v3958_v47 = vpop.f32.mrf.mxu1 }
 0x1c4   : > { %v9342_v40 = vpop.f32.mrf.mxu0  ;;  %v4047_v12 = vadd.f32 %v3958_v47, %v9246_v5 }
 0x1c5   : > { %9717 = vst [vmem:[#allocation9_spill] sm:$0xff] %v9342_v40  ;;  %v7362_v63 = vpop.f32.mrf.mxu1 }
 0x1c6   : > { %v7406_v19 = vpop.f32.mrf.mxu0  ;;  %v4052_v24 = vadd.f32 %v7362_v63, %v9249_v38 }
 0x1c7   : > { %v9345_v46 = vadd.f32 %v7406_v19, %v4048_v45  ;;  %v3971_v48 = vpop.f32.mrf.mxu1 }
 0x1c8   : > { %v4405_v30 = vpop.f32.mrf.mxu0  ;;  %v4050_v20 = vadd.f32 %v3971_v48, %v9252_v10 }
 0x1c9   : > { %v9348_v25 = vadd.f32 %v4405_v30, %v4046_v7  ;;  %v7363_v60 = vpop.f32.mrf.mxu1 }
 0x1ca   : > { %v7407_v2 = vpop.f32.mrf.mxu0  ;;  %v4053_v19 = vadd.f32 %v7363_v60, %v9255_v58 }
 0x1cb   : > { %v9351_v62 = vadd.f32 %v7407_v2, %v4049_v52  ;;  %v3974_v5 = vpop.f32.mrf.mxu1 }
 0x1cc   : > { %v4408_v40 = vpop.f32.mrf.mxu0  ;;  %v4051_v30 = vadd.f32 %v3974_v5, %v9258_v43 }
 0x1cd   : > { %v9354_v16 = vadd.f32 %v4408_v40, %v4047_v12  ;;  %v7366_v38 = vpop.f32.mrf.mxu1 }
 0x1ce   : > { %v7410_v45 = vpop.f32.mrf.mxu0  ;;  %v4056_v52 = vadd.f32 %v7366_v38, %v9262_v4 }
 0x1cf   : > { %v9357_v47 = vadd.f32 %v7410_v45, %v4052_v24  ;;  %v3987_v10 = vpop.f32.mrf.mxu1 }
 0x1d0   : > { %v4421_v7 = vpop.f32.mrf.mxu0  ;;  %v4054_v12 = vadd.f32 %v3987_v10, %v9265_v51 }
 0x1d1   : > { %v9360_v63 = vadd.f32 %v4421_v7, %v4050_v20  ;;  %v7367_v58 = vpop.f32.mrf.mxu1 }
 0x1d2   : > { %v7411_v2 = vpop.f32.mrf.mxu0  ;;  %v4057_v24 = vadd.f32 %v7367_v58, %v9268_v41 }
 0x1d3   : > { %v9363_v48 = vadd.f32 %v7411_v2, %v4053_v19  ;;  %v3990_v43 = vpop.f32.mrf.mxu1 }
 0x1d4   : > { %v4424_v40 = vpop.f32.mrf.mxu0  ;;  %v4055_v20 = vadd.f32 %v3990_v43, %v9271_v9  ;;  %v6064_v43 = vlaneseq }
 0x1d5   : > { %v9366_v60 = vadd.f32 %v4424_v40, %v4051_v30  ;;  %v7370_v4 = vpop.f32.mrf.mxu1 }
 0x1d6   : > { %v7414_v45 = vpop.f32.mrf.mxu0  ;;  %v4060_v19 = vadd.f32 %v7370_v4, %v9274_v23 }
 0x1d7   : > { %v9369_v5 = vadd.f32 %v7414_v45, %v4056_v52  ;;  %v4003_v51 = vpop.f32.mrf.mxu1 }
 0x1d8   : > { %v4437_v7 = vpop.f32.mrf.mxu0  ;;  %v4058_v30 = vadd.f32 %v4003_v51, %v9278_v15 }
 0x1d9   : > { %v9372_v38 = vadd.f32 %v4437_v7, %v4054_v12  ;;  %v7371_v41 = vpop.f32.mrf.mxu1 }
 0x1da   : > { %v7415_v2 = vpop.f32.mrf.mxu0  ;;  %v4061_v52 = vadd.f32 %v7371_v41, %v9280_v14  ;;  %v9389_v14 = vshrl.u32 %v6064_v43, 7 }
 0x1db   : > { %v9375_v10 = vadd.f32 %v7415_v2, %v4057_v24  ;;  %v4006_v9 = vpop.f32.mrf.mxu1  ;;  %v2653_v24 = vadd.f32 %v9276_v32, %v9166_v44  ;;  %v4036_v44 = vadd.f32 %v9288_v6, %v9180_v42 }
 0x1dc   : > { %v4440_v40 = vpop.f32.mrf.mxu0  ;;  %v4059_v23 = vadd.f32 %v4006_v9, %v9284_v0  ;;  %v6067_v43 = vadd.s32 16, %v9389_v14 }
 0x1dd   : > { %v9378_v58 = vadd.f32 %v4440_v40, %v4055_v20  ;;  %v7374_v4 = vpop.f32.mrf.mxu1  ;;  %v2651_v40 = vadd.f32 %v9282_v36, %v9174_v53  ;;  %v3471_v32 = vadd.f32 %v9292_v17, %v2653_v24  ;;  %v4034_v53 = vadd.f32 %v9294_v21, %v9183_v55 }
 0x1de   : > { %v7418_v45 = vpop.f32.mrf.mxu0  ;;  %v4064_v20 = vadd.f32 %v7374_v4, %v9286_v26  ;;  %v6068_v17 = vadd.s32 24, %v9389_v14  ;;  %v6071_v24 = vadd.s32 48, %v9389_v14  ;;  %v4037_v55 = vadd.f32 %v9298_v49, %v9189_v57 }
 0x1df   : > { %v9381_v12 = vadd.f32 %v7418_v45, %v4060_v19  ;;  %v4019_v51 = vpop.f32.mrf.mxu1  ;;  %v3469_v36 = vadd.f32 %v9296_v11, %v2651_v40  ;;  %v4486_v21 = vadd.f32 %v9300_v33, %v4036_v44 }
 0x1e0   : > { %v4453_v7 = vpop.f32.mrf.mxu0  ;;  %v4062_v0 = vadd.f32 %v4019_v51, %v9290_v27 }
 0x1e1   : > { %v9386_v15 = vadd.f32 %v4453_v7, %v4058_v30  ;;  %v7375_v45 = vpop.f32.mrf.mxu1  ;;  %v9403_v7 = vstv %s6869_s12 }
 0x1e2   : > { %v7419_v2 = vpop.f32.mrf.mxu0  ;;  %v4065_v27 = vadd.f32 %v7375_v45, %v3471_v32  ;;  %v9412_v6 = vadd.s32 %v9403_v7, %v9389_v14  ;;  %v9423_v40 = vadd.s32 %v9403_v7, %v6067_v43  ;;  %v4035_v45 = vadd.f32 %v9302_v35, %v9193_v56 }
 0x1e3   : > { %v9393_v19 = vadd.f32 %v7419_v2, %v4061_v52  ;;  %v4022_v9 = vpop.f32.mrf.mxu1  ;;  %v4484_v32 = vadd.f32 %v9304_v34, %v4034_v53  ;;  %v4040_v56 = vadd.f32 %v9306_v29, %v9200_v61  ;;  %v4487_v35 = vadd.f32 %v9308_v37, %v4037_v55 }
 0x1e4   : > { %v4456_v41 = vpop.f32.mrf.mxu0  ;;  %v4063_v11 = vadd.f32 %v4022_v9, %v3469_v36  ;;  %vm6130_vm6 = vcmp.lt.s32.totalorder %v9412_v6, 512  ;;  %v9437_v9 = vadd.s32 %v9403_v7, %v6071_v24  ;;  %v9446_v36 = vld [vmem:[%s9673_s4] ss:$0 sm:$0xff]  ;;  %vm6132_vm7 = vcmp.lt.s32.totalorder %v9423_v40, 512 }
 0x1e5   : > { %v9400_v26 = vadd.f32 %v4456_v41, %v4059_v23  ;;  %v6066_v23 = vadd.s32 8, %v9389_v14  ;;  %v6069_v41 = vadd.s32 32, %v9389_v14  ;;  %v6070_v61 = vadd.s32 40, %v9389_v14 }
 0x1e6   : > { %v7422_v30 = vpop.f32.mrf.mxu0  ;;  %v7442_v42 = vpop.f32.mrf.mxu1  ;;  %v4038_v29 = vadd.f32 %v9310_v50, %v9206_v22  ;;  %v4485_v37 = vadd.f32 %v9312_v54, %v4035_v45  ;;  %v4041_v24 = vadd.f32 %v9314_v13, %v9209_v3  ;;  %vm6136_vm11 = vcmp.lt.s32.totalorder %v9437_v9, 512 }
 0x1e7   : > { %v9408_v52 = vadd.f32 %v7422_v30, %v4064_v20  ;;  %v5304_v30 = vadd.f32 %v7442_v42, %v4486_v21  ;;  %v9434_v44 = vadd.s32 %v9403_v7, %v6066_v23  ;;  %v6072_v42 = vadd.s32 56, %v9389_v14 }
 0x1e8   : > { %v4469_v4 = vpop.f32.mrf.mxu0  ;;  %v5175_v51 = vpop.f32.mrf.mxu1  ;;  %v9472_v45 = vadd.s32 %v9403_v7, %v6070_v61  ;;  %v9720_v61 = vld [vmem:[#allocation3_spill] sm:$0xff] }
 0x1e9   : > { %v9420_v20 = vadd.f32 %v4469_v4, %v4062_v0  ;;  %v9431_v0 = vadd.s32 %v9403_v7, %v6068_v17  ;;  %v5302_v34 = vadd.f32 %v5175_v51, %v4484_v32  ;;  %v9450_v4 = vadd.s32 %v9403_v7, %v6069_v41 }
 0x1ea   : > { %v7423_v2 = vpop.f32.mrf.mxu0  ;;  %v7443_v33 = vpop.f32.mrf.mxu1  ;;  %vm6131_vm9 = vcmp.lt.s32.totalorder %v9434_v44, 512  ;;  %v4039_v51 = vadd.f32 %v9318_v39, %v9216_v59  ;;  %v9469_v13 = vadd.s32 %v9403_v7, %v6072_v42  ;;  %v4488_v32 = vadd.f32 %v9320_v8, %v4038_v29  ;;  %v9718_v42 = vld [vmem:[#allocation15_spill] sm:$0xff] }
 0x1eb   : > { %v4515_v57 = vadd.f32 %v7423_v2, %v4065_v27  ;;  %v5305_v17 = vadd.f32 %v7443_v33, %v4487_v35  ;;  %vm6133_vm8 = vcmp.lt.s32.totalorder %v9431_v0, 512  ;;  %v4490_v2 = vadd.f32 %v9316_v28, %v4040_v56 }
 0x1ec   : > { %v4472_v49 = vpop.f32.mrf.mxu0  ;;  %v5178_v27 = vpop.f32.mrf.mxu1  ;;  %vm6134_vm10 = vcmp.lt.s32.totalorder %v9450_v4, 512  ;;  %v6073_v28 = vadd.s32 64, %v9389_v14  ;;  %v4044_v39 = vadd.f32 %v9322_v1, %v9219_v18  ;;  %v9484_v35 = vadd.s32 88, %v9389_v14  ;;  %v9719_v18 = vld [vmem:[#allocation2_spill] sm:$0xff] }
 0x1ed   : > { %4547 = vst [vmem:[%s7746_s18 + $0xf8] sm:$0xff] %v4515_v57  ;;  %v4513_v43 = vadd.f32 %v4472_v49, %v4063_v11  ;;  %v6075_v11 = vadd.s32 80, %v9389_v14  ;;  %v5303_v50 = vadd.f32 %v5178_v27, %v4485_v37  ;;  %v4491_v8 = vadd.f32 %v9324_v31, %v4041_v24 }
 0x1ee   : > { %v7490_v53 = vpop.f32.mrf.mxu0  ;;  %v4042_v1 = vadd.f32 %v9719_v18, %v9718_v42  ;;  %v4489_v29 = vadd.f32 %v9720_v61, %v4039_v51  ;;  %vm6135_vm12 = vcmp.lt.s32.totalorder %v9472_v45, 512  ;;  %vm6137_vm13 = vcmp.lt.s32.totalorder %v9469_v13, 512 }
 0x1ef   : > { %4545 = vst [vmem:[%s7746_s18 + $0xe8] sm:$0xff] %v4513_v43  ;;  %v5898_v23 = vadd.f32 %v7490_v53, %v5304_v30  ;;  %v9481_v56 = vadd.s32 %v9403_v7, %v6075_v11  ;;  %v9721_v11 = vld [vmem:[#allocation16_spill] sm:$0xff] }
 0x1f0   : > { %v5769_v55 = vpop.f32.mrf.mxu0 }
 0x1f1   : > { %v6001_v22 = vadd.f32 %v9446_v36, %v5898_v23  ;;  %v5896_v54 = vadd.f32 %v5769_v55, %v5302_v34  ;;  %v6074_v34 = vadd.s32 72, %v9389_v14  ;;  %v9496_v23 = vadd.s32 %v9403_v7, %v6073_v28 }
 0x1f2   : > { %v7446_v21 = vpop.f32.mrf.mxu1  ;;  %v7491_v41 = vpop.f32.mrf.mxu0  ;;  %vm6140_vm15 = vcmp.lt.s32.totalorder %v9481_v56, 512 }
 0x1f3   : > { %6033 = vst [vmem:[%s7746_s18 + $0x10] sm:$0xff] %v6001_v22  ;;  %v5999_v30 = vadd.f32 %v9446_v36, %v5896_v54  ;;  %v5308_v57 = vadd.f32 %v7446_v21, %v4490_v2  ;;  %v5899_v59 = vadd.f32 %v7491_v41, %v5305_v17  ;;  %v9722_v2 = vld [vmem:[#allocation4_spill] sm:$0xff]  ;;  %v9723_v54 = vld [vmem:[#allocation5_spill] sm:$0xff]  ;;  %v6228_v41 = vsel %vm6132_vm7, %v6001_v22, 0.0 }
 0x1f4   : > { %v5191_v3 = vpop.f32.mrf.mxu1  ;;  %v5772_v49 = vpop.f32.mrf.mxu0  ;;  %v4494_v51 = vadd.f32 %v9723_v54, %v4044_v39  ;;  %v9509_v6 = vadd.s32 %v9403_v7, %v6074_v34  ;;  %v9725_v39 = vld [vmem:[#allocation6_spill] sm:$0xff]  ;;  %vm6138_vm14 = vcmp.lt.s32.totalorder %v9496_v23, 512 }
 0x1f5   : > { %6031 = vst [vmem:[%s7746_s18] sm:$0xff] %v5999_v30  ;;  %v6002_v43 = vadd.f32 %v9446_v36, %v5899_v59  ;;  %v5306_v53 = vadd.f32 %v5191_v3, %v4488_v32  ;;  %v5897_v27 = vadd.f32 %v5772_v49, %v5303_v50  ;;  %v6226_v31 = vsel %vm6130_vm6, %v5999_v30, 0.0  ;;  %v9724_v59 = vld [vmem:[#allocation17_spill] sm:$0xff] }
 0x1f6   : > { %v7447_v33 = vpop.f32.mrf.mxu1  ;;  %v7494_v37 = vpop.f32.mrf.mxu0  ;;  %v4045_v50 = vadd.f32 %v9722_v2, %v9721_v11  ;;  %v4043_v49 = vadd.f32 %v9725_v39, %v9724_v59  ;;  %v6299_v40 = vmul.f32 %v6226_v31, %v6226_v31  ;;  %vm6139_vm0 = vcmp.lt.s32.totalorder %v9509_v6, 512 }
 0x1f7   : > { %6034 = vst [vmem:[%s7746_s18 + $0x18] sm:$0xff] %v6002_v43  ;;  %v6000_v24 = vadd.f32 %v9446_v36, %v5897_v27  ;;  %v5309_v55 = vadd.f32 %v7447_v33, %v4491_v8  ;;  %v5902_v21 = vadd.f32 %v7494_v37, %v5308_v57  ;;  %v9726_v27 = vld [vmem:[#allocation7_spill] sm:$0xff]  ;;  %v6229_v34 = vsel %vm6133_vm8, %v6002_v43, 0.0 }
 0x1f8   : > { %v5194_v17 = vpop.f32.mrf.mxu1  ;;  %v5785_v3 = vpop.f32.mrf.mxu0  ;;  %v4492_v42 = vadd.f32 %v9726_v27, %v4042_v1  ;;  %v6302_v2 = vmul.f32 %v6229_v34, %v6229_v34 }
 0x1f9   : > { %6032 = vst [vmem:[%s7746_s18 + $0x8] sm:$0xff] %v6000_v24  ;;  %v6227_v28 = vsel %vm6131_vm9, %v6000_v24, 0.0  ;;  %v6005_v32 = vadd.f32 %v9446_v36, %v5902_v21  ;;  %v5307_v30 = vadd.f32 %v5194_v17, %v4489_v29  ;;  %v5900_v57 = vadd.f32 %v5785_v3, %v5306_v53  ;;  %v9727_v21 = vld [vmem:[#allocation8_spill] sm:$0xff] }
 0x1fa   : > { %v6259_v22 = vadd.f32 %v6227_v28, %v6226_v31  ;;  %v6300_v33 = vmul.f32 %v6227_v28, %v6227_v28  ;;  %v7495_v8 = vpop.f32.mrf.mxu0  ;;  %v6301_v29 = vmul.f32 %v6228_v41, %v6228_v41  ;;  %v4495_v31 = vadd.f32 %v9727_v21, %v4045_v50  ;;  %v9728_v28 = vld [vmem:[#allocation9_spill] sm:$0xff] }
 0x1fb   : > { %6037 = vst [vmem:[%s7746_s18 + $0x30] sm:$0xff] %v6005_v32  ;;  %v6003_v44 = vadd.f32 %v9446_v36, %v5900_v57  ;;  %v5903_v61 = vadd.f32 %v7495_v8, %v5309_v55  ;;  %v4493_v57 = vadd.f32 %v9728_v28, %v4043_v49 }
 0x1fc   : > { %v6260_v53 = vadd.f32 %v6259_v22, %v6228_v41  ;;  %v6331_v37 = vadd.f32 %v6300_v33, %v6299_v40  ;;  %v5788_v24 = vpop.f32.mrf.mxu0  ;;  %v6232_v33 = vsel %vm6136_vm11, %v6005_v32, 0.0 }
 0x1fd   : > { %6035 = vst [vmem:[%s7746_s18 + $0x20] sm:$0xff] %v6003_v44  ;;  %v6230_v1 = vsel %vm6134_vm10, %v6003_v44, 0.0  ;;  %v6006_v0 = vadd.f32 %v9446_v36, %v5903_v61  ;;  %v5901_v11 = vadd.f32 %v5788_v24, %v5307_v30  ;;  %v6305_v45 = vmul.f32 %v6232_v33, %v6232_v33 }
 0x1fe   : > { %v6332_v54 = vadd.f32 %v6331_v37, %v6301_v29  ;;  %v6261_v55 = vadd.f32 %v6260_v53, %v6229_v34  ;;  %v6303_v39 = vmul.f32 %v6230_v1, %v6230_v1  ;;  %v6109_v24 = vadd.s32 %v9403_v7, %v9484_v35 }
 0x1ff   : > { %6038 = vst [vmem:[%s7746_s18 + $0x38] sm:$0xff] %v6006_v0  ;;  %v6233_v53 = vsel %vm6137_vm13, %v6006_v0, 0.0  ;;  %v6077_v35 = vadd.s32 96, %v9389_v14 }
 0x200   : > { %v7450_v18 = vpop.f32.mrf.mxu1  ;;  %v6262_v4 = vadd.f32 %v6261_v55, %v6230_v1  ;;  %v6333_v40 = vadd.f32 %v6332_v54, %v6302_v2  ;;  %v6306_v0 = vmul.f32 %v6233_v53, %v6233_v53  ;;  %vm6141_vm1 = vcmp.lt.s32.totalorder %v6109_v24, 512 }
 0x201   : > { %v5312_v17 = vadd.f32 %v7450_v18, %v4494_v51  ;;  %v6004_v51 = vadd.f32 %v9446_v36, %v5901_v11 }
 0x202   : > { %v5207_v43 = vpop.f32.mrf.mxu1  ;;  %v6334_v34 = vadd.f32 %v6333_v40, %v6303_v39  ;;  %v6079_v39 = vadd.s32 112, %v9389_v14  ;;  %v6110_v40 = vadd.s32 %v9403_v7, %v6077_v35  ;;  %v6081_v35 = vadd.s32 128, %v9389_v14 }
 0x203   : > { %v5310_v3 = vadd.f32 %v5207_v43, %v4492_v42  ;;  %v7498_v41 = vpop.f32.mrf.mxu0  ;;  %6036 = vst [vmem:[%s7746_s18 + $0x28] sm:$0xff] %v6004_v51  ;;  %v6231_v49 = vsel %vm6135_vm12, %v6004_v51, 0.0 }
 0x204   : > { %v7451_v50 = vpop.f32.mrf.mxu1  ;;  %v5906_v59 = vadd.f32 %v7498_v41, %v5312_v17  ;;  %v6263_v44 = vadd.f32 %v6262_v4, %v6231_v49  ;;  %v6304_v18 = vmul.f32 %v6231_v49, %v6231_v49  ;;  %vm6142_vm2 = vcmp.lt.s32.totalorder %v6110_v40, 512 }
 0x205   : > { %v5313_v30 = vadd.f32 %v7451_v50, %v4495_v31  ;;  %v5801_v22 = vpop.f32.mrf.mxu0 }
 0x206   : > { %v6009_v8 = vadd.f32 %v9446_v36, %v5906_v59  ;;  %v5210_v27 = vpop.f32.mrf.mxu1  ;;  %v5904_v42 = vadd.f32 %v5801_v22, %v5310_v3  ;;  %v6264_v37 = vadd.f32 %v6263_v44, %v6232_v33  ;;  %v6335_v17 = vadd.f32 %v6334_v34, %v6304_v18 }
 0x207   : > { %v5311_v61 = vadd.f32 %v5210_v27, %v4493_v57  ;;  %v7499_v29 = vpop.f32.mrf.mxu0 }
 0x208   : > { %6041 = vst [vmem:[%s7746_s18 + $0x50] sm:$0xff] %v6009_v8  ;;  %v6007_v9 = vadd.f32 %v9446_v36, %v5904_v42  ;;  %v5907_v32 = vadd.f32 %v7499_v29, %v5313_v30  ;;  %v6336_v43 = vadd.f32 %v6335_v17, %v6305_v45  ;;  %v6265_v11 = vadd.f32 %v6264_v37, %v6233_v53 }
 0x209   : > { %v5804_v21 = vpop.f32.mrf.mxu0  ;;  %v6236_v23 = vsel %vm6140_vm15, %v6009_v8, 0.0  ;;  %v6078_v30 = vadd.s32 104, %v9389_v14 }
 0x20a   : > { %6039 = vst [vmem:[%s7746_s18 + $0x40] sm:$0xff] %v6007_v9  ;;  %v6234_v31 = vsel %vm6138_vm14, %v6007_v9, 0.0  ;;  %v6010_v13 = vadd.f32 %v9446_v36, %v5907_v32  ;;  %v5905_v1 = vadd.f32 %v5804_v21, %v5311_v61  ;;  %v6337_v3 = vadd.f32 %v6336_v43, %v6306_v0 }
 0x20b   : > { %v6266_v54 = vadd.f32 %v6265_v11, %v6234_v31  ;;  %v6307_v55 = vmul.f32 %v6234_v31, %v6234_v31  ;;  %v6309_v22 = vmul.f32 %v6236_v23, %v6236_v23  ;;  %v6112_v9 = vadd.s32 %v9403_v7, %v6079_v39 }
 0x20c   : > { %6042 = vst [vmem:[%s7746_s18 + $0x58] sm:$0xff] %v6010_v13  ;;  %v6008_v2 = vadd.f32 %v9446_v36, %v5905_v1  ;;  %v6237_v59 = vsel %vm6141_vm1, %v6010_v13, 0.0  ;;  %v6111_v24 = vadd.s32 %v9403_v7, %v6078_v30 }
 0x20d   : > { %v6338_v57 = vadd.f32 %v6337_v3, %v6307_v55  ;;  %v6310_v34 = vmul.f32 %v6237_v59, %v6237_v59  ;;  %vm6144_vm3 = vcmp.lt.s32.totalorder %v6112_v9, 512 }
 0x20e   : > { %v7454_v41 = vpop.f32.mrf.mxu1  ;;  %6040 = vst [vmem:[%s7746_s18 + $0x48] sm:$0xff] %v6008_v2  ;;  %v6235_v28 = vsel %vm6139_vm0, %v6008_v2, 0.0  ;;  %vm6143_vm4 = vcmp.lt.s32.totalorder %v6111_v24, 512 }
 0x20f   : > { %v5316_v51 = vadd.f32 %v7454_v41, %v9345_v46  ;;  %v6267_v50 = vadd.f32 %v6266_v54, %v6235_v28  ;;  %v6308_v6 = vmul.f32 %v6235_v28, %v6235_v28  ;;  %v6080_v46 = vadd.s32 120, %v9389_v14 }
 0x210   : > { %v5223_v4 = vpop.f32.mrf.mxu1 }
 0x211   : > { %v5314_v56 = vadd.f32 %v5223_v4, %v9348_v25  ;;  %v6268_v33 = vadd.f32 %v6267_v50, %v6236_v23  ;;  %v6339_v49 = vadd.f32 %v6338_v57, %v6308_v6  ;;  %v7502_v8 = vpop.f32.mrf.mxu0  ;;  %v6113_v31 = vadd.s32 %v9403_v7, %v6080_v46 }
 0x212   : > { %v7455_v27 = vpop.f32.mrf.mxu1  ;;  %v5910_v42 = vadd.f32 %v7502_v8, %v5316_v51  ;;  %v6083_v6 = vadd.s32 144, %v9389_v14  ;;  %v6082_v4 = vadd.s32 136, %v9389_v14 }
 0x213   : > { %v6340_v44 = vadd.f32 %v6339_v49, %v6309_v22  ;;  %v5317_v18 = vadd.f32 %v7455_v27, %v9351_v62  ;;  %v5817_v61 = vpop.f32.mrf.mxu0  ;;  %v6269_v29 = vadd.f32 %v6268_v33, %v6237_v59  ;;  %vm6145_vm5 = vcmp.lt.s32.totalorder %v6113_v31, 512 }
 0x214   : > { %v6013_v53 = vadd.f32 %v9446_v36, %v5910_v42  ;;  %v5226_v25 = vpop.f32.mrf.mxu1  ;;  %v5908_v32 = vadd.f32 %v5817_v61, %v5314_v56  ;;  %v6114_v59 = vadd.s32 %v9403_v7, %v6081_v35 }
 0x215   : > { %v5315_v45 = vadd.f32 %v5226_v25, %v9354_v16  ;;  %v6341_v37 = vadd.f32 %v6340_v44, %v6310_v34  ;;  %v7503_v17 = vpop.f32.mrf.mxu0  ;;  %v6115_v25 = vadd.s32 %v9403_v7, %v6082_v4 }
 0x216   : > { %6045 = vst [vmem:[%s7746_s18 + $0x70] sm:$0xff] %v6013_v53  ;;  %v6011_v62 = vadd.f32 %v9446_v36, %v5908_v32  ;;  %v5911_v21 = vadd.f32 %v7503_v17, %v5317_v18  ;;  %v6240_v55 = vsel %vm6144_vm3, %v6013_v53, 0.0  ;;  %v6116_v18 = vadd.s32 %v9403_v7, %v6083_v6 }
 0x217   : > { %v5820_v13 = vpop.f32.mrf.mxu0  ;;  %v6313_v39 = vmul.f32 %v6240_v55, %v6240_v55  ;;  %vm6146_vm6 = vcmp.lt.s32.totalorder %v6114_v59, 512  ;;  %vm6147_vm8 = vcmp.lt.s32.totalorder %v6115_v25, 512  ;;  %v6089_v25 = vadd.s32 192, %v9389_v14 }
 0x218   : > { %6043 = vst [vmem:[%s7746_s18 + $0x60] sm:$0xff] %v6011_v62  ;;  %v6238_v1 = vsel %vm6142_vm2, %v6011_v62, 0.0  ;;  %v6014_v0 = vadd.f32 %v9446_v36, %v5911_v21  ;;  %v5909_v43 = vadd.f32 %v5820_v13, %v5315_v45  ;;  %vm6148_vm7 = vcmp.lt.s32.totalorder %v6116_v18, 512 }
 0x219   : > { %v6270_v16 = vadd.f32 %v6269_v29, %v6238_v1  ;;  %v6311_v11 = vmul.f32 %v6238_v1, %v6238_v1  ;;  %v6085_v13 = vadd.s32 160, %v9389_v14 }
 0x21a   : > { %6046 = vst [vmem:[%s7746_s18 + $0x78] sm:$0xff] %v6014_v0  ;;  %v6012_v2 = vadd.f32 %v9446_v36, %v5909_v43  ;;  %v6241_v51 = vsel %vm6145_vm5, %v6014_v0, 0.0 }
 0x21b   : > { %v6342_v54 = vadd.f32 %v6341_v37, %v6311_v11  ;;  %v6314_v8 = vmul.f32 %v6241_v51, %v6241_v51 }
 0x21c   : > { %v7458_v3 = vpop.f32.mrf.mxu1  ;;  %6044 = vst [vmem:[%s7746_s18 + $0x68] sm:$0xff] %v6012_v2  ;;  %v6239_v23 = vsel %vm6143_vm4, %v6012_v2, 0.0 }
 0x21d   : > { %v5320_v41 = vadd.f32 %v7458_v3, %v9357_v47  ;;  %v6271_v28 = vadd.f32 %v6270_v16, %v6239_v23  ;;  %v6312_v57 = vmul.f32 %v6239_v23, %v6239_v23  ;;  %v6084_v47 = vadd.s32 152, %v9389_v14 }
 0x21e   : > { %v5239_v50 = vpop.f32.mrf.mxu1  ;;  %v6087_v3 = vadd.s32 176, %v9389_v14  ;;  %v6118_v23 = vadd.s32 %v9403_v7, %v6085_v13  ;;  %v6122_v13 = vadd.s32 %v9403_v7, %v6089_v25 }
 0x21f   : > { %v5318_v40 = vadd.f32 %v5239_v50, %v9360_v63  ;;  %v6272_v30 = vadd.f32 %v6271_v28, %v6240_v55  ;;  %v6343_v22 = vadd.f32 %v6342_v54, %v6312_v57  ;;  %v7506_v56 = vpop.f32.mrf.mxu0  ;;  %v6117_v45 = vadd.s32 %v9403_v7, %v6084_v47 }
 0x220   : > { %v7459_v33 = vpop.f32.mrf.mxu1  ;;  %v5914_v49 = vadd.f32 %v7506_v56, %v5320_v41  ;;  %v6086_v41 = vadd.s32 168, %v9389_v14  ;;  %vm6150_vm10 = vcmp.lt.s32.totalorder %v6118_v23, 512  ;;  %vm6154_vm14 = vcmp.lt.s32.totalorder %v6122_v13, 512 }
 0x221   : > { %v6344_v27 = vadd.f32 %v6343_v22, %v6313_v39  ;;  %v5321_v42 = vadd.f32 %v7459_v33, %v9363_v48  ;;  %v5833_v46 = vpop.f32.mrf.mxu0  ;;  %v6273_v34 = vadd.f32 %v6272_v30, %v6241_v51  ;;  %vm6149_vm9 = vcmp.lt.s32.totalorder %v6117_v45, 512 }
 0x222   : > { %v6017_v44 = vadd.f32 %v9446_v36, %v5914_v49  ;;  %v5242_v63 = vpop.f32.mrf.mxu1  ;;  %v5912_v61 = vadd.f32 %v5833_v46, %v5318_v40  ;;  %v6120_v49 = vadd.s32 %v9403_v7, %v6087_v3  ;;  %v6119_v46 = vadd.s32 %v9403_v7, %v6086_v41 }
 0x223   : > { %v5319_v29 = vadd.f32 %v5242_v63, %v9366_v60  ;;  %v6345_v53 = vadd.f32 %v6344_v27, %v6314_v8  ;;  %v7507_v9 = vpop.f32.mrf.mxu0 }
 0x224   : > { %6049 = vst [vmem:[%s7746_s18 + $0x90] sm:$0xff] %v6017_v44  ;;  %v6015_v48 = vadd.f32 %v9446_v36, %v5912_v61  ;;  %v5915_v32 = vadd.f32 %v7507_v9, %v5321_v42  ;;  %v6244_v0 = vsel %vm6148_vm7, %v6017_v44, 0.0  ;;  %vm6152_vm11 = vcmp.lt.s32.totalorder %v6120_v49, 512 }
 0x225   : > { %v5836_v37 = vpop.f32.mrf.mxu0  ;;  %v6317_v28 = vmul.f32 %v6244_v0, %v6244_v0  ;;  %vm6151_vm12 = vcmp.lt.s32.totalorder %v6119_v46, 512 }
 0x226   : > { %6047 = vst [vmem:[%s7746_s18 + $0x80] sm:$0xff] %v6015_v48  ;;  %v6242_v17 = vsel %vm6146_vm6, %v6015_v48, 0.0  ;;  %v6018_v24 = vadd.f32 %v9446_v36, %v5915_v32  ;;  %v5913_v62 = vadd.f32 %v5836_v37, %v5319_v29 }
 0x227   : > { %v6274_v60 = vadd.f32 %v6273_v34, %v6242_v17  ;;  %v6315_v21 = vmul.f32 %v6242_v17, %v6242_v17 }
 0x228   : > { %6050 = vst [vmem:[%s7746_s18 + $0x98] sm:$0xff] %v6018_v24  ;;  %v6016_v31 = vadd.f32 %v9446_v36, %v5913_v62  ;;  %v6245_v54 = vsel %vm6149_vm9, %v6018_v24, 0.0 }
 0x229   : > { %v6346_v1 = vadd.f32 %v6345_v53, %v6315_v21  ;;  %v6318_v39 = vmul.f32 %v6245_v54, %v6245_v54 }
 0x22a   : > { %v7462_v43 = vpop.f32.mrf.mxu1  ;;  %6048 = vst [vmem:[%s7746_s18 + $0x88] sm:$0xff] %v6016_v31  ;;  %v6243_v16 = vsel %vm6147_vm8, %v6016_v31, 0.0  ;;  %v6091_v31 = vadd.s32 208, %v9389_v14 }
 0x22b   : > { %v5324_v11 = vadd.f32 %v7462_v43, %v9369_v5  ;;  %v6275_v2 = vadd.f32 %v6274_v60, %v6243_v16  ;;  %v6316_v35 = vmul.f32 %v6243_v16, %v6243_v16  ;;  %v6088_v5 = vadd.s32 184, %v9389_v14 }
 0x22c   : > { %v5255_v55 = vpop.f32.mrf.mxu1 }
 0x22d   : > { %v5322_v57 = vadd.f32 %v5255_v55, %v9372_v38  ;;  %v6276_v51 = vadd.f32 %v6275_v2, %v6244_v0  ;;  %v6347_v50 = vadd.f32 %v6346_v1, %v6316_v35  ;;  %v7510_v6 = vpop.f32.mrf.mxu0  ;;  %v6121_v44 = vadd.s32 %v9403_v7, %v6088_v5 }
 0x22e   : > { %v7463_v59 = vpop.f32.mrf.mxu1  ;;  %v5918_v4 = vadd.f32 %v7510_v6, %v5324_v11  ;;  %v6090_v1 = vadd.s32 200, %v9389_v14 }
 0x22f   : > { %v6348_v40 = vadd.f32 %v6347_v50, %v6317_v28  ;;  %v5325_v30 = vadd.f32 %v7463_v59, %v9375_v10  ;;  %v5849_v22 = vpop.f32.mrf.mxu0  ;;  %v6277_v56 = vadd.f32 %v6276_v51, %v6245_v54  ;;  %vm6153_vm13 = vcmp.lt.s32.totalorder %v6121_v44, 512 }
 0x230   : > { %v6021_v33 = vadd.f32 %v9446_v36, %v5918_v4  ;;  %v5258_v38 = vpop.f32.mrf.mxu1  ;;  %v5916_v47 = vadd.f32 %v5849_v22, %v5322_v57  ;;  %v6124_v51 = vadd.s32 %v9403_v7, %v6091_v31  ;;  %v6123_v5 = vadd.s32 %v9403_v7, %v6090_v1 }
 0x231   : > { %v5323_v8 = vadd.f32 %v5258_v38, %v9378_v58  ;;  %v6349_v27 = vadd.f32 %v6348_v40, %v6318_v39  ;;  %v7511_v42 = vpop.f32.mrf.mxu0 }
 0x232   : > { %6053 = vst [vmem:[%s7746_s18 + $0xb0] sm:$0xff] %v6021_v33  ;;  %v6019_v10 = vadd.f32 %v9446_v36, %v5916_v47  ;;  %v5919_v34 = vadd.f32 %v7511_v42, %v5325_v30  ;;  %v6248_v32 = vsel %vm6152_vm11, %v6021_v33, 0.0  ;;  %vm6156_vm15 = vcmp.lt.s32.totalorder %v6124_v51, 512 }
 0x233   : > { %v5852_v18 = vpop.f32.mrf.mxu0  ;;  %v6321_v0 = vmul.f32 %v6248_v32, %v6248_v32  ;;  %vm6155_vm0 = vcmp.lt.s32.totalorder %v6123_v5, 512  ;;  %v6093_v47 = vadd.s32 224, %v9389_v14 }
 0x234   : > { %6051 = vst [vmem:[%s7746_s18 + $0xa0] sm:$0xff] %v6019_v10  ;;  %v6246_v63 = vsel %vm6150_vm10, %v6019_v10, 0.0  ;;  %v6022_v61 = vadd.f32 %v9446_v36, %v5919_v34  ;;  %v5917_v29 = vadd.f32 %v5852_v18, %v5323_v8 }
 0x235   : > { %v6278_v58 = vadd.f32 %v6277_v56, %v6246_v63  ;;  %v6319_v53 = vmul.f32 %v6246_v63, %v6246_v63 }
 0x236   : > { %6054 = vst [vmem:[%s7746_s18 + $0xb8] sm:$0xff] %v6022_v61  ;;  %v6020_v9 = vadd.f32 %v9446_v36, %v5917_v29  ;;  %v6249_v60 = vsel %vm6153_vm13, %v6022_v61, 0.0  ;;  %v6095_v61 = vadd.s32 240, %v9389_v14  ;;  %v6126_v29 = vadd.s32 %v9403_v7, %v6093_v47 }
 0x237   : > { %v6350_v48 = vadd.f32 %v6349_v27, %v6319_v53  ;;  %v6322_v55 = vmul.f32 %v6249_v60, %v6249_v60 }
 0x238   : > { %v7466_v45 = vpop.f32.mrf.mxu1  ;;  %6052 = vst [vmem:[%s7746_s18 + $0xa8] sm:$0xff] %v6020_v9  ;;  %v6247_v37 = vsel %vm6151_vm12, %v6020_v9, 0.0  ;;  %v6128_v1 = vadd.s32 %v9403_v7, %v6095_v61  ;;  %vm6158_vm2 = vcmp.lt.s32.totalorder %v6126_v29, 512 }
 0x239   : > { %v5328_v17 = vadd.f32 %v7466_v45, %v9381_v12  ;;  %v6279_v24 = vadd.f32 %v6278_v58, %v6247_v37  ;;  %v6320_v62 = vmul.f32 %v6247_v37, %v6247_v37  ;;  %v6092_v12 = vadd.s32 216, %v9389_v14  ;;  %v5011_v45 = vld [vmem:[%s7746_s18 + $0xf8] sm:$0xff] }
 0x23a   : > { %v5271_v21 = vpop.f32.mrf.mxu1  ;;  %v6094_v58 = vadd.s32 232, %v9389_v14  ;;  %vm6160_vm3 = vcmp.lt.s32.totalorder %v6128_v1, 512 }
 0x23b   : > { %v5326_v43 = vadd.f32 %v5271_v21, %v9386_v15  ;;  %v6280_v16 = vadd.f32 %v6279_v24, %v6248_v32  ;;  %v6351_v11 = vadd.f32 %v6350_v48, %v6320_v62  ;;  %v7514_v2 = vpop.f32.mrf.mxu0  ;;  %v6125_v40 = vadd.s32 %v9403_v7, %v6092_v12 }
 0x23c   : > { %v7467_v35 = vpop.f32.mrf.mxu1  ;;  %v5922_v54 = vadd.f32 %v7514_v2, %v5328_v17  ;;  %v6096_v17 = vadd.s32 248, %v9389_v14  ;;  %v6127_v14 = vadd.s32 %v9403_v7, %v6094_v58 }
 0x23d   : > { %v6352_v3 = vadd.f32 %v6351_v11, %v6321_v0  ;;  %v5329_v23 = vadd.f32 %v7467_v35, %v9393_v19  ;;  %v5865_v41 = vpop.f32.mrf.mxu0  ;;  %v6281_v28 = vadd.f32 %v6280_v16, %v6249_v60  ;;  %vm6157_vm1 = vcmp.lt.s32.totalorder %v6125_v40, 512 }
 0x23e   : > { %v6025_v57 = vadd.f32 %v9446_v36, %v5922_v54  ;;  %v5274_v15 = vpop.f32.mrf.mxu1  ;;  %v5920_v50 = vadd.f32 %v5865_v41, %v5326_v43  ;;  %v6129_v12 = vadd.s32 %v9403_v7, %v6096_v17  ;;  %vm6159_vm4 = vcmp.lt.s32.totalorder %v6127_v14, 512 }
 0x23f   : > { %v5327_v6 = vadd.f32 %v5274_v15, %v9400_v26  ;;  %v6353_v59 = vadd.f32 %v6352_v3, %v6322_v55  ;;  %v7515_v4 = vpop.f32.mrf.mxu0 }
 0x240   : > { %6057 = vst [vmem:[%s7746_s18 + $0xd0] sm:$0xff] %v6025_v57  ;;  %v6023_v19 = vadd.f32 %v9446_v36, %v5920_v50  ;;  %v5923_v39 = vadd.f32 %v7515_v4, %v5329_v23  ;;  %v6252_v27 = vsel %vm6156_vm15, %v6025_v57, 0.0  ;;  %vm6161_vm5 = vcmp.lt.s32.totalorder %v6129_v12, 512 }
 0x241   : > { %v5868_v30 = vpop.f32.mrf.mxu0  ;;  %v6325_v53 = vmul.f32 %v6252_v27, %v6252_v27 }
 0x242   : > { %6055 = vst [vmem:[%s7746_s18 + $0xc0] sm:$0xff] %v6023_v19  ;;  %v6250_v22 = vsel %vm6154_vm14, %v6023_v19, 0.0  ;;  %v6026_v56 = vadd.f32 %v9446_v36, %v5923_v39  ;;  %v5921_v33 = vadd.f32 %v5868_v30, %v5327_v6 }
 0x243   : > { %v6282_v26 = vadd.f32 %v6281_v28, %v6250_v22  ;;  %v6323_v49 = vmul.f32 %v6250_v22, %v6250_v22 }
 0x244   : > { %6058 = vst [vmem:[%s7746_s18 + $0xd8] sm:$0xff] %v6026_v56  ;;  %v6024_v38 = vadd.f32 %v9446_v36, %v5921_v33  ;;  %v6253_v18 = vsel %vm6157_vm1, %v6026_v56, 0.0 }
 0x245   : > { %v6354_v8 = vadd.f32 %v6353_v59, %v6323_v49  ;;  %v6326_v24 = vmul.f32 %v6253_v18, %v6253_v18 }
 0x246   : > { %v7470_v42 = vpop.f32.mrf.mxu1  ;;  %6056 = vst [vmem:[%s7746_s18 + $0xc8] sm:$0xff] %v6024_v38  ;;  %v6251_v46 = vsel %vm6155_vm0, %v6024_v38, 0.0 }
 0x247   : > { %v5332_v10 = vadd.f32 %v7470_v42, %v9408_v52  ;;  %v6283_v34 = vadd.f32 %v6282_v26, %v6251_v46  ;;  %v6324_v44 = vmul.f32 %v6251_v46, %v6251_v46  ;;  %v6258_v46 = vld [vmem:[%s9675_s6] sm:$0x1] }
 0x248   : > { %v5287_v63 = vpop.f32.mrf.mxu1 }
 0x249   : > { %v5330_v9 = vadd.f32 %v5287_v63, %v9420_v20  ;;  %v6284_v25 = vadd.f32 %v6283_v34, %v6252_v27  ;;  %v6355_v48 = vadd.f32 %v6354_v8, %v6324_v44  ;;  %v7518_v32 = vpop.f32.mrf.mxu0  ;;  %v5009_v20 = vld [vmem:[%s7746_s18 + $0xe8] sm:$0xff]  ;;  %v6298_v44 = vld [vmem:[%s9676_s7] sm:$0x1] }
 0x24a   : > { %v7471_v37 = vpop.f32.mrf.mxu1  ;;  %v5926_v52 = vadd.f32 %v7518_v32, %v5332_v10 }
 0x24b   : > { %v6356_v62 = vadd.f32 %v6355_v48, %v6325_v53  ;;  %v5333_v60 = vadd.f32 %v7471_v37, %v5011_v45  ;;  %v5881_v21 = vpop.f32.mrf.mxu0  ;;  %v6285_v31 = vadd.f32 %v6284_v25, %v6253_v18 }
 0x24c   : > { %v6029_v13 = vadd.f32 %v9446_v36, %v5926_v52  ;;  %v5290_v0 = vpop.f32.mrf.mxu1  ;;  %v5924_v43 = vadd.f32 %v5881_v21, %v5330_v9 }
 0x24d   : > { %v5331_v16 = vadd.f32 %v5290_v0, %v5009_v20  ;;  %v6357_v11 = vadd.f32 %v6356_v62, %v6326_v24  ;;  %v7519_v2 = vpop.f32.mrf.mxu0 }
 0x24e   : > { %6061 = vst [vmem:[%s7746_s18 + $0xf0] sm:$0xff] %v6029_v13  ;;  %v6027_v35 = vadd.f32 %v9446_v36, %v5924_v43  ;;  %v5927_v54 = vadd.f32 %v7519_v2, %v5333_v60  ;;  %v6256_v50 = vsel %vm6160_vm3, %v6029_v13, 0.0 }
 0x24f   : > { %v5884_v55 = vpop.f32.mrf.mxu0  ;;  %v6329_v5 = vmul.f32 %v6256_v50, %v6256_v50 }
 0x250   : > { %6059 = vst [vmem:[%s7746_s18 + $0xe0] sm:$0xff] %v6027_v35  ;;  %v6254_v3 = vsel %vm6158_vm2, %v6027_v35, 0.0  ;;  %v6030_v23 = vadd.f32 %v9446_v36, %v5927_v54  ;;  %v5925_v41 = vadd.f32 %v5884_v55, %v5331_v16 }
 0x251   : > { %v6286_v28 = vadd.f32 %v6285_v31, %v6254_v3  ;;  %v6327_v57 = vmul.f32 %v6254_v3, %v6254_v3 }
 0x252   : > { %6062 = vst [vmem:[%s7746_s18 + $0xf8] sm:$0xff] %v6030_v23  ;;  %v6028_v51 = vadd.f32 %v9446_v36, %v5925_v41  ;;  %v6257_v4 = vsel %vm6161_vm5, %v6030_v23, 0.0 }
 0x253   : > { %v6358_v15 = vadd.f32 %v6357_v11, %v6327_v57  ;;  %v6330_v40 = vmul.f32 %v6257_v4, %v6257_v4 }
 0x254   : > { %6060 = vst [vmem:[%s7746_s18 + $0xe8] sm:$0xff] %v6028_v51  ;;  %v6255_v6 = vsel %vm6159_vm4, %v6028_v51, 0.0 }
 0x255   : > { %v6287_v59 = vadd.f32 %v6286_v28, %v6255_v6  ;;  %v6328_v7 = vmul.f32 %v6255_v6, %v6255_v6 }
 0x257   : > { %v6288_v19 = vadd.f32 %v6287_v59, %v6256_v50  ;;  %v6359_v39 = vadd.f32 %v6358_v15, %v6328_v7 }
 0x259   : > { %v6289_v30 = vadd.f32 %v6288_v19, %v6257_v4  ;;  %v6360_v22 = vadd.f32 %v6359_v39, %v6329_v5 }
 0x25b   : > { %v6290_v56 = vrot.slane %v6289_v30, 4  ;;  %v6361_v33 = vadd.f32 %v6360_v22, %v6330_v40 }
 0x25d   : > { %v6291_v26 = vadd.f32 %v6290_v56, %v6289_v30  ;;  %v6362_v49 = vrot.slane %v6361_v33, 4 }
 0x25f   : > { %v6292_v38 = vrot.slane %v6291_v26, 2  ;;  %v6363_v36 = vadd.f32 %v6362_v49, %v6361_v33 }
 0x261   : > { %v6293_v47 = vadd.f32 %v6292_v38, %v6291_v26  ;;  %v6364_v8 = vrot.slane %v6363_v36, 2 }
 0x263   : > { %v6294_v27 = vrot.slane %v6293_v47, 1  ;;  %v6365_v42 = vadd.f32 %v6364_v8, %v6363_v36 }
 0x265   : > { %v6295_v10 = vadd.f32 %v6294_v27, %v6293_v47  ;;  %v6366_v34 = vrot.slane %v6365_v42, 1 }
 0x267   : > { %v6296_v18 = vadd.f32 %v6295_v10, %v6258_v46  ;;  %v6367_v63 = vadd.f32 %v6366_v34, %v6365_v42 }
 0x269   : > { %6297 = vst [vmem:[%s9675_s6] sm:$0x1] %v6296_v18  ;;  %v6368_v61 = vadd.f32 %v6367_v63, %v6298_v44 }
 0x26b   : > { %6369 = vst [vmem:[%s9676_s7] sm:$0x1] %v6368_v61 }
 0x26c PF: > { %s18_s24 = sadd.s32 1, %s7673_s24  }
 0x26d   : > { %p15_p6 = scmp.ge.s32.totalorder %s18_s24, 4  }
 0x26f   :  { %17 = sbr.rel (!%p15_p6) target bundleno = 1 (0x1), region = 104 }

</bundles_post_ra>
